<compile_context>
chip_gen: v7x
topology: tpu7x:2x2x1
jax: 0.10.0
libtpu: 0.0.40
codegen_flags: <defaults>
</compile_context>

<pallas_src>
import functools

import jax
import jax.numpy as jnp
from jax import lax
from jax.experimental import pallas as pl
from jax.experimental.pallas import tpu as pltpu

# Module hyper-params (nn.Conv2d kernel_size=3, padding=1 so the residual add is valid).
KH = KW = 3
PAD = 1
RES_SCALE = 1.0   # module default res_scale=1 (compile-time constant)
C8 = 8            # sublane-tile-aligned channel count


def resblock_kernel(x_ref, aux_ref, out_ref, *, wp, c_real):
    """Single invocation processes the whole (tiny) batch.

    x_ref:   (C8, L)        zero-padded input: channels in sublanes (real channels first,
                            zeros above), flattened padded spatial in lanes, zero tail.
    aux_ref: (C8, L + 128)  [:, :L]  = interior mask (1 at valid pixels, 0 on ring/tail)
                            [:, L:]  = packed weight/bias columns, Cout along sublanes:
                                       conv1 taps 0..9*c_real-1, conv1 bias, conv2 taps,
                                       conv2 bias (rest zero).
    out_ref: (C8, L)        result in the same layout (interior of real channels valid).
    """
    _, L = out_ref.shape
    a = x_ref[...]                       # (C8, L) f32, resident for both convs + residual
    aux = aux_ref[...]
    mask = aux[:, :L]                    # (C8, L)   interior mask
    params = aux[:, L:]                  # (C8, 128) weight/bias columns

    def conv3x3(v, col0):
        # v must carry exact zeros on every image's 1-pixel ring and on the lane tail
        # (see wrap-around invariant in the header comment).
        # dx taps: roll(v, s)[l] = v[l - s]; we want v[l + dx].
        x_dx = (pltpu.roll(v, 1, axis=1),       # dx = -1
                v,                              # dx =  0
                pltpu.roll(v, L - 1, axis=1))   # dx = +1
        # Per-dy partial sums over (dx, cin): pure VPU broadcast-weight MACs.
        parts = [jnp.zeros((C8, L), jnp.float32) for _ in range(3)]
        for dxi in range(3):
            for cin in range(c_real):
                # One input-channel row, sublane-broadcast across the Cout rows; hoisted
                # so the broadcast is done once and reused for all three dy taps.
                row = jnp.broadcast_to(x_dx[dxi][cin:cin + 1, :], (C8, L))
                for dyi in range(3):
                    col = col0 + (dyi * 3 + dxi) * c_real + cin
                    parts[dyi] = parts[dyi] + params[:, col:col + 1] * row
        bias = params[:, col0 + 9 * c_real:col0 + 9 * c_real + 1]    # (C8, 1)
        # dy taps commuted out of the contraction: 2 lane rolls of the partials instead
        # of 6 extra rolls of the input (8 -> 4 non-trivial rolls per conv).
        return (pltpu.roll(parts[0], wp, axis=1)        # dy = -1
                + parts[1]                              # dy =  0
                + pltpu.roll(parts[2], L - wp, axis=1)  # dy = +1
                + bias)

    # conv1 + bias + ReLU, then re-impose the zero ring / zero tail for conv2.
    h = jnp.maximum(conv3x3(a, 0), 0.0) * mask
    # conv2 + bias.
    r = conv3x3(h, 9 * c_real + 1)
    if RES_SCALE != 1.0:                # compile-time: default 1.0 -> no dead vmul
        r = r * RES_SCALE
    out_ref[...] = (r + a).astype(out_ref.dtype)


def resblock_pallas(x_nchw, w1, b1, w2, b2):
    """x_nchw: (N, C, H, W) f32. w*: (KH, KW, Cin, Cout) HWIO. b*: (1, Cout)."""
    N, C, H, W = x_nchw.shape
    Hp, Wp = H + 2 * PAD, W + 2 * PAD
    L_raw = N * Hp * Wp
    L = ((L_raw + 127) // 128) * 128           # lane-dense flat spatial

    # ---- pack activations: channels-first, zero ring, flat spatial, pad channels to 8.
    xpad = jnp.pad(x_nchw, ((0, 0), (0, 0), (PAD, PAD), (PAD, PAD)))     # (N, C, Hp, Wp)
    x_cf = jnp.transpose(xpad, (1, 0, 2, 3)).reshape(C, L_raw)
    x_flat = jnp.pad(x_cf, ((0, C8 - C), (0, L - L_raw)))                # (C8, L)

    # ---- pack weights/biases as per-tap Cout columns (tap-major, cin-minor).
    def pack_conv(w, b):
        cols = jnp.transpose(w.reshape(KH * KW * C, C))                  # (Cout, 9*Cin)
        cols = jnp.pad(cols, ((0, C8 - C), (0, 0)))                      # (C8, 9*Cin)
        bias = jnp.pad(jnp.transpose(b), ((0, C8 - C), (0, 0)))          # (C8, 1)
        return jnp.concatenate([cols, bias], axis=1)                     # (C8, 9*Cin + 1)

    params = jnp.concatenate([pack_conv(w1, b1), pack_conv(w2, b2)], axis=1)
    params = jnp.pad(params, ((0, 0), (0, 128 - params.shape[1])))       # (C8, 128)

    # ---- interior mask (1 at real non-ring pixels of real images, 0 elsewhere).
    mask = jnp.zeros((N, Hp, Wp), jnp.float32).at[:, PAD:PAD + H, PAD:PAD + W].set(1.0)
    mask_row = jnp.pad(mask.reshape(1, L_raw), ((0, 0), (0, L - L_raw)))
    mask_full = jnp.broadcast_to(mask_row, (C8, L))

    # One packed auxiliary operand: mask ++ params -> a single DMA.
    aux = jnp.concatenate([mask_full, params], axis=1)                   # (C8, L + 128)

    kernel = functools.partial(resblock_kernel, wp=Wp, c_real=C)
    out_flat = pl.pallas_call(
        kernel,
        out_shape=jax.ShapeDtypeStruct((C8, L), jnp.float32),
        in_specs=[pl.BlockSpec(memory_space=pltpu.MemorySpace.VMEM)] * 2,
        out_specs=pl.BlockSpec(memory_space=pltpu.MemorySpace.VMEM),
        compiler_params=pltpu.CompilerParams(vmem_limit_bytes=32 * 1024 * 1024),
    )(x_flat, aux)

    # Unpack (C8, L) -> (N, C, H, W): pure layout plumbing in XLA.
    out = out_flat[:C, :L_raw].reshape(C, N, Hp, Wp)[:, :, PAD:PAD + H, PAD:PAD + W]
    return jnp.transpose(out, (1, 0, 2, 3))


def resblock_reference(x_nchw, w1, b1, w2, b2):
    """Pure-JAX reference matching the PyTorch forward (f32-exact convs)."""
    dn = ('NHWC', 'HWIO', 'NHWC')
    hp = lax.Precision.HIGHEST
    x = jnp.transpose(x_nchw, (0, 2, 3, 1))
    h = lax.conv_general_dilated(x, w1, (1, 1), ((PAD, PAD), (PAD, PAD)),
                                 dimension_numbers=dn, precision=hp) + b1[0]
    h = jnp.maximum(h, 0.0)
    r = lax.conv_general_dilated(h, w2, (1, 1), ((PAD, PAD), (PAD, PAD)),
                                 dimension_numbers=dn, precision=hp) + b2[0]
    r = r * RES_SCALE + x
    return jnp.transpose(r, (0, 3, 1, 2))


if __name__ == "__main__":
    # Small shapes consistent with ResBlock(conv, n_feat=4, kernel_size=3, padding=1).
    N, C, H, W = 2, 4, 16, 16

    key = jax.random.PRNGKey(0)
    kx, k1, kb1, k2, kb2 = jax.random.split(key, 5)

    x = jax.random.normal(kx, (N, C, H, W), dtype=jnp.float32)
    # Deterministic synthetic parameters (HWIO layout), roughly Conv2d-init scaled.
    w1 = 0.1 * jax.random.normal(k1, (KH, KW, C, C), dtype=jnp.float32)
    b1 = 0.1 * jax.random.normal(kb1, (1, C), dtype=jnp.float32)
    w2 = 0.1 * jax.random.normal(k2, (KH, KW, C, C), dtype=jnp.float32)
    b2 = 0.1 * jax.random.normal(kb2, (1, C), dtype=jnp.float32)

    out = jax.block_until_ready(resblock_pallas(x, w1, b1, w2, b2))
    ref = jax.block_until_ready(resblock_reference(x, w1, b1, w2, b2))

    assert out.shape == (N, C, H, W), out.shape
    assert jnp.allclose(out, ref, atol=1e-5, rtol=1e-5), \
        float(jnp.max(jnp.abs(out - ref)))

    print("KERNEL_OK")
</pallas_src>

<mosaic_0001>
module attributes {stable_mosaic.version = 11 : i64} {
  func.func @resblock_kernel(%arg0: memref<8x768xf32, #tpu.memory_space<vmem>>, %arg1: memref<8x896xf32, #tpu.memory_space<vmem>>, %arg2: memref<8x768xf32, #tpu.memory_space<vmem>>) attributes {dimension_semantics = [], scalar_prefetch = 0 : i64, scratch_operands = 0 : i64, tpu.core_type = #tpu.core_type<tc>} {
    %c0 = arith.constant 0 : index
    %c0_0 = arith.constant 0 : index
    %0 = vector.load %arg0[%c0, %c0_0] : memref<8x768xf32, #tpu.memory_space<vmem>>, vector<8x768xf32>
    %c0_1 = arith.constant 0 : index
    %c0_2 = arith.constant 0 : index
    %1 = vector.load %arg1[%c0_1, %c0_2] : memref<8x896xf32, #tpu.memory_space<vmem>>, vector<8x896xf32>
    %2 = vector.extract_strided_slice %1 {offsets = [0, 0], sizes = [8, 768], strides = [1, 1]} : vector<8x896xf32> to vector<8x768xf32>
    %3 = vector.extract_strided_slice %1 {offsets = [0, 768], sizes = [8, 128], strides = [1, 1]} : vector<8x896xf32> to vector<8x128xf32>
    %c1_i32 = arith.constant 1 : i32
    %4 = tpu.dynamic_rotate %0 by %c1_i32 dim 1 : vector<8x768xf32>, i32 -> vector<8x768xf32>
    %c767_i32 = arith.constant 767 : i32
    %5 = tpu.dynamic_rotate %0 by %c767_i32 dim 1 : vector<8x768xf32>, i32 -> vector<8x768xf32>
    %cst = arith.constant 0.000000e+00 : f32
    %6 = vector.broadcast %cst : f32 to vector<8x768xf32>
    %cst_3 = arith.constant 0.000000e+00 : f32
    %7 = vector.broadcast %cst_3 : f32 to vector<8x768xf32>
    %cst_4 = arith.constant 0.000000e+00 : f32
    %8 = vector.broadcast %cst_4 : f32 to vector<8x768xf32>
    %9 = vector.extract_strided_slice %4 {offsets = [0, 0], sizes = [1, 768], strides = [1, 1]} : vector<8x768xf32> to vector<1x768xf32>
    %10 = vector.shape_cast %9 : vector<1x768xf32> to vector<1x768xf32>
    %11 = vector.broadcast %10 : vector<1x768xf32> to vector<8x768xf32>
    %12 = vector.extract_strided_slice %3 {offsets = [0, 0], sizes = [8, 1], strides = [1, 1]} : vector<8x128xf32> to vector<8x1xf32>
    %13 = vector.broadcast %12 : vector<8x1xf32> to vector<8x768xf32>
    %14 = arith.mulf %13, %11 : vector<8x768xf32>
    %15 = arith.addf %6, %14 : vector<8x768xf32>
    %16 = vector.extract_strided_slice %3 {offsets = [0, 12], sizes = [8, 1], strides = [1, 1]} : vector<8x128xf32> to vector<8x1xf32>
    %17 = vector.broadcast %16 : vector<8x1xf32> to vector<8x768xf32>
    %18 = arith.mulf %17, %11 : vector<8x768xf32>
    %19 = arith.addf %7, %18 : vector<8x768xf32>
    %20 = vector.extract_strided_slice %3 {offsets = [0, 24], sizes = [8, 1], strides = [1, 1]} : vector<8x128xf32> to vector<8x1xf32>
    %21 = vector.broadcast %20 : vector<8x1xf32> to vector<8x768xf32>
    %22 = arith.mulf %21, %11 : vector<8x768xf32>
    %23 = arith.addf %8, %22 : vector<8x768xf32>
    %24 = vector.extract_strided_slice %4 {offsets = [1, 0], sizes = [1, 768], strides = [1, 1]} : vector<8x768xf32> to vector<1x768xf32>
    %25 = vector.shape_cast %24 : vector<1x768xf32> to vector<1x768xf32>
    %26 = vector.broadcast %25 : vector<1x768xf32> to vector<8x768xf32>
    %27 = vector.extract_strided_slice %3 {offsets = [0, 1], sizes = [8, 1], strides = [1, 1]} : vector<8x128xf32> to vector<8x1xf32>
    %28 = vector.broadcast %27 : vector<8x1xf32> to vector<8x768xf32>
    %29 = arith.mulf %28, %26 : vector<8x768xf32>
    %30 = arith.addf %15, %29 : vector<8x768xf32>
    %31 = vector.extract_strided_slice %3 {offsets = [0, 13], sizes = [8, 1], strides = [1, 1]} : vector<8x128xf32> to vector<8x1xf32>
    %32 = vector.broadcast %31 : vector<8x1xf32> to vector<8x768xf32>
    %33 = arith.mulf %32, %26 : vector<8x768xf32>
    %34 = arith.addf %19, %33 : vector<8x768xf32>
    %35 = vector.extract_strided_slice %3 {offsets = [0, 25], sizes = [8, 1], strides = [1, 1]} : vector<8x128xf32> to vector<8x1xf32>
    %36 = vector.broadcast %35 : vector<8x1xf32> to vector<8x768xf32>
    %37 = arith.mulf %36, %26 : vector<8x768xf32>
    %38 = arith.addf %23, %37 : vector<8x768xf32>
    %39 = vector.extract_strided_slice %4 {offsets = [2, 0], sizes = [1, 768], strides = [1, 1]} : vector<8x768xf32> to vector<1x768xf32>
    %40 = vector.shape_cast %39 : vector<1x768xf32> to vector<1x768xf32>
    %41 = vector.broadcast %40 : vector<1x768xf32> to vector<8x768xf32>
    %42 = vector.extract_strided_slice %3 {offsets = [0, 2], sizes = [8, 1], strides = [1, 1]} : vector<8x128xf32> to vector<8x1xf32>
    %43 = vector.broadcast %42 : vector<8x1xf32> to vector<8x768xf32>
    %44 = arith.mulf %43, %41 : vector<8x768xf32>
    %45 = arith.addf %30, %44 : vector<8x768xf32>
    %46 = vector.extract_strided_slice %3 {offsets = [0, 14], sizes = [8, 1], strides = [1, 1]} : vector<8x128xf32> to vector<8x1xf32>
    %47 = vector.broadcast %46 : vector<8x1xf32> to vector<8x768xf32>
    %48 = arith.mulf %47, %41 : vector<8x768xf32>
    %49 = arith.addf %34, %48 : vector<8x768xf32>
    %50 = vector.extract_strided_slice %3 {offsets = [0, 26], sizes = [8, 1], strides = [1, 1]} : vector<8x128xf32> to vector<8x1xf32>
    %51 = vector.broadcast %50 : vector<8x1xf32> to vector<8x768xf32>
    %52 = arith.mulf %51, %41 : vector<8x768xf32>
    %53 = arith.addf %38, %52 : vector<8x768xf32>
    %54 = vector.extract_strided_slice %4 {offsets = [3, 0], sizes = [1, 768], strides = [1, 1]} : vector<8x768xf32> to vector<1x768xf32>
    %55 = vector.shape_cast %54 : vector<1x768xf32> to vector<1x768xf32>
    %56 = vector.broadcast %55 : vector<1x768xf32> to vector<8x768xf32>
    %57 = vector.extract_strided_slice %3 {offsets = [0, 3], sizes = [8, 1], strides = [1, 1]} : vector<8x128xf32> to vector<8x1xf32>
    %58 = vector.broadcast %57 : vector<8x1xf32> to vector<8x768xf32>
    %59 = arith.mulf %58, %56 : vector<8x768xf32>
    %60 = arith.addf %45, %59 : vector<8x768xf32>
    %61 = vector.extract_strided_slice %3 {offsets = [0, 15], sizes = [8, 1], strides = [1, 1]} : vector<8x128xf32> to vector<8x1xf32>
    %62 = vector.broadcast %61 : vector<8x1xf32> to vector<8x768xf32>
    %63 = arith.mulf %62, %56 : vector<8x768xf32>
    %64 = arith.addf %49, %63 : vector<8x768xf32>
    %65 = vector.extract_strided_slice %3 {offsets = [0, 27], sizes = [8, 1], strides = [1, 1]} : vector<8x128xf32> to vector<8x1xf32>
    %66 = vector.broadcast %65 : vector<8x1xf32> to vector<8x768xf32>
    %67 = arith.mulf %66, %56 : vector<8x768xf32>
    %68 = arith.addf %53, %67 : vector<8x768xf32>
    %69 = vector.extract_strided_slice %0 {offsets = [0, 0], sizes = [1, 768], strides = [1, 1]} : vector<8x768xf32> to vector<1x768xf32>
    %70 = vector.shape_cast %69 : vector<1x768xf32> to vector<1x768xf32>
    %71 = vector.broadcast %70 : vector<1x768xf32> to vector<8x768xf32>
    %72 = vector.extract_strided_slice %3 {offsets = [0, 4], sizes = [8, 1], strides = [1, 1]} : vector<8x128xf32> to vector<8x1xf32>
    %73 = vector.broadcast %72 : vector<8x1xf32> to vector<8x768xf32>
    %74 = arith.mulf %73, %71 : vector<8x768xf32>
    %75 = arith.addf %60, %74 : vector<8x768xf32>
    %76 = vector.extract_strided_slice %3 {offsets = [0, 16], sizes = [8, 1], strides = [1, 1]} : vector<8x128xf32> to vector<8x1xf32>
    %77 = vector.broadcast %76 : vector<8x1xf32> to vector<8x768xf32>
    %78 = arith.mulf %77, %71 : vector<8x768xf32>
    %79 = arith.addf %64, %78 : vector<8x768xf32>
    %80 = vector.extract_strided_slice %3 {offsets = [0, 28], sizes = [8, 1], strides = [1, 1]} : vector<8x128xf32> to vector<8x1xf32>
    %81 = vector.broadcast %80 : vector<8x1xf32> to vector<8x768xf32>
    %82 = arith.mulf %81, %71 : vector<8x768xf32>
    %83 = arith.addf %68, %82 : vector<8x768xf32>
    %84 = vector.extract_strided_slice %0 {offsets = [1, 0], sizes = [1, 768], strides = [1, 1]} : vector<8x768xf32> to vector<1x768xf32>
    %85 = vector.shape_cast %84 : vector<1x768xf32> to vector<1x768xf32>
    %86 = vector.broadcast %85 : vector<1x768xf32> to vector<8x768xf32>
    %87 = vector.extract_strided_slice %3 {offsets = [0, 5], sizes = [8, 1], strides = [1, 1]} : vector<8x128xf32> to vector<8x1xf32>
    %88 = vector.broadcast %87 : vector<8x1xf32> to vector<8x768xf32>
    %89 = arith.mulf %88, %86 : vector<8x768xf32>
    %90 = arith.addf %75, %89 : vector<8x768xf32>
    %91 = vector.extract_strided_slice %3 {offsets = [0, 17], sizes = [8, 1], strides = [1, 1]} : vector<8x128xf32> to vector<8x1xf32>
    %92 = vector.broadcast %91 : vector<8x1xf32> to vector<8x768xf32>
    %93 = arith.mulf %92, %86 : vector<8x768xf32>
    %94 = arith.addf %79, %93 : vector<8x768xf32>
    %95 = vector.extract_strided_slice %3 {offsets = [0, 29], sizes = [8, 1], strides = [1, 1]} : vector<8x128xf32> to vector<8x1xf32>
    %96 = vector.broadcast %95 : vector<8x1xf32> to vector<8x768xf32>
    %97 = arith.mulf %96, %86 : vector<8x768xf32>
    %98 = arith.addf %83, %97 : vector<8x768xf32>
    %99 = vector.extract_strided_slice %0 {offsets = [2, 0], sizes = [1, 768], strides = [1, 1]} : vector<8x768xf32> to vector<1x768xf32>
    %100 = vector.shape_cast %99 : vector<1x768xf32> to vector<1x768xf32>
    %101 = vector.broadcast %100 : vector<1x768xf32> to vector<8x768xf32>
    %102 = vector.extract_strided_slice %3 {offsets = [0, 6], sizes = [8, 1], strides = [1, 1]} : vector<8x128xf32> to vector<8x1xf32>
    %103 = vector.broadcast %102 : vector<8x1xf32> to vector<8x768xf32>
    %104 = arith.mulf %103, %101 : vector<8x768xf32>
    %105 = arith.addf %90, %104 : vector<8x768xf32>
    %106 = vector.extract_strided_slice %3 {offsets = [0, 18], sizes = [8, 1], strides = [1, 1]} : vector<8x128xf32> to vector<8x1xf32>
    %107 = vector.broadcast %106 : vector<8x1xf32> to vector<8x768xf32>
    %108 = arith.mulf %107, %101 : vector<8x768xf32>
    %109 = arith.addf %94, %108 : vector<8x768xf32>
    %110 = vector.extract_strided_slice %3 {offsets = [0, 30], sizes = [8, 1], strides = [1, 1]} : vector<8x128xf32> to vector<8x1xf32>
    %111 = vector.broadcast %110 : vector<8x1xf32> to vector<8x768xf32>
    %112 = arith.mulf %111, %101 : vector<8x768xf32>
    %113 = arith.addf %98, %112 : vector<8x768xf32>
    %114 = vector.extract_strided_slice %0 {offsets = [3, 0], sizes = [1, 768], strides = [1, 1]} : vector<8x768xf32> to vector<1x768xf32>
    %115 = vector.shape_cast %114 : vector<1x768xf32> to vector<1x768xf32>
    %116 = vector.broadcast %115 : vector<1x768xf32> to vector<8x768xf32>
    %117 = vector.extract_strided_slice %3 {offsets = [0, 7], sizes = [8, 1], strides = [1, 1]} : vector<8x128xf32> to vector<8x1xf32>
    %118 = vector.broadcast %117 : vector<8x1xf32> to vector<8x768xf32>
    %119 = arith.mulf %118, %116 : vector<8x768xf32>
    %120 = arith.addf %105, %119 : vector<8x768xf32>
    %121 = vector.extract_strided_slice %3 {offsets = [0, 19], sizes = [8, 1], strides = [1, 1]} : vector<8x128xf32> to vector<8x1xf32>
    %122 = vector.broadcast %121 : vector<8x1xf32> to vector<8x768xf32>
    %123 = arith.mulf %122, %116 : vector<8x768xf32>
    %124 = arith.addf %109, %123 : vector<8x768xf32>
    %125 = vector.extract_strided_slice %3 {offsets = [0, 31], sizes = [8, 1], strides = [1, 1]} : vector<8x128xf32> to vector<8x1xf32>
    %126 = vector.broadcast %125 : vector<8x1xf32> to vector<8x768xf32>
    %127 = arith.mulf %126, %116 : vector<8x768xf32>
    %128 = arith.addf %113, %127 : vector<8x768xf32>
    %129 = vector.extract_strided_slice %5 {offsets = [0, 0], sizes = [1, 768], strides = [1, 1]} : vector<8x768xf32> to vector<1x768xf32>
    %130 = vector.shape_cast %129 : vector<1x768xf32> to vector<1x768xf32>
    %131 = vector.broadcast %130 : vector<1x768xf32> to vector<8x768xf32>
    %132 = vector.extract_strided_slice %3 {offsets = [0, 8], sizes = [8, 1], strides = [1, 1]} : vector<8x128xf32> to vector<8x1xf32>
    %133 = vector.broadcast %132 : vector<8x1xf32> to vector<8x768xf32>
    %134 = arith.mulf %133, %131 : vector<8x768xf32>
    %135 = arith.addf %120, %134 : vector<8x768xf32>
    %136 = vector.extract_strided_slice %3 {offsets = [0, 20], sizes = [8, 1], strides = [1, 1]} : vector<8x128xf32> to vector<8x1xf32>
    %137 = vector.broadcast %136 : vector<8x1xf32> to vector<8x768xf32>
    %138 = arith.mulf %137, %131 : vector<8x768xf32>
    %139 = arith.addf %124, %138 : vector<8x768xf32>
    %140 = vector.extract_strided_slice %3 {offsets = [0, 32], sizes = [8, 1], strides = [1, 1]} : vector<8x128xf32> to vector<8x1xf32>
    %141 = vector.broadcast %140 : vector<8x1xf32> to vector<8x768xf32>
    %142 = arith.mulf %141, %131 : vector<8x768xf32>
    %143 = arith.addf %128, %142 : vector<8x768xf32>
    %144 = vector.extract_strided_slice %5 {offsets = [1, 0], sizes = [1, 768], strides = [1, 1]} : vector<8x768xf32> to vector<1x768xf32>
    %145 = vector.shape_cast %144 : vector<1x768xf32> to vector<1x768xf32>
    %146 = vector.broadcast %145 : vector<1x768xf32> to vector<8x768xf32>
    %147 = vector.extract_strided_slice %3 {offsets = [0, 9], sizes = [8, 1], strides = [1, 1]} : vector<8x128xf32> to vector<8x1xf32>
    %148 = vector.broadcast %147 : vector<8x1xf32> to vector<8x768xf32>
    %149 = arith.mulf %148, %146 : vector<8x768xf32>
    %150 = arith.addf %135, %149 : vector<8x768xf32>
    %151 = vector.extract_strided_slice %3 {offsets = [0, 21], sizes = [8, 1], strides = [1, 1]} : vector<8x128xf32> to vector<8x1xf32>
    %152 = vector.broadcast %151 : vector<8x1xf32> to vector<8x768xf32>
    %153 = arith.mulf %152, %146 : vector<8x768xf32>
    %154 = arith.addf %139, %153 : vector<8x768xf32>
    %155 = vector.extract_strided_slice %3 {offsets = [0, 33], sizes = [8, 1], strides = [1, 1]} : vector<8x128xf32> to vector<8x1xf32>
    %156 = vector.broadcast %155 : vector<8x1xf32> to vector<8x768xf32>
    %157 = arith.mulf %156, %146 : vector<8x768xf32>
    %158 = arith.addf %143, %157 : vector<8x768xf32>
    %159 = vector.extract_strided_slice %5 {offsets = [2, 0], sizes = [1, 768], strides = [1, 1]} : vector<8x768xf32> to vector<1x768xf32>
    %160 = vector.shape_cast %159 : vector<1x768xf32> to vector<1x768xf32>
    %161 = vector.broadcast %160 : vector<1x768xf32> to vector<8x768xf32>
    %162 = vector.extract_strided_slice %3 {offsets = [0, 10], sizes = [8, 1], strides = [1, 1]} : vector<8x128xf32> to vector<8x1xf32>
    %163 = vector.broadcast %162 : vector<8x1xf32> to vector<8x768xf32>
    %164 = arith.mulf %163, %161 : vector<8x768xf32>
    %165 = arith.addf %150, %164 : vector<8x768xf32>
    %166 = vector.extract_strided_slice %3 {offsets = [0, 22], sizes = [8, 1], strides = [1, 1]} : vector<8x128xf32> to vector<8x1xf32>
    %167 = vector.broadcast %166 : vector<8x1xf32> to vector<8x768xf32>
    %168 = arith.mulf %167, %161 : vector<8x768xf32>
    %169 = arith.addf %154, %168 : vector<8x768xf32>
    %170 = vector.extract_strided_slice %3 {offsets = [0, 34], sizes = [8, 1], strides = [1, 1]} : vector<8x128xf32> to vector<8x1xf32>
    %171 = vector.broadcast %170 : vector<8x1xf32> to vector<8x768xf32>
    %172 = arith.mulf %171, %161 : vector<8x768xf32>
    %173 = arith.addf %158, %172 : vector<8x768xf32>
    %174 = vector.extract_strided_slice %5 {offsets = [3, 0], sizes = [1, 768], strides = [1, 1]} : vector<8x768xf32> to vector<1x768xf32>
    %175 = vector.shape_cast %174 : vector<1x768xf32> to vector<1x768xf32>
    %176 = vector.broadcast %175 : vector<1x768xf32> to vector<8x768xf32>
    %177 = vector.extract_strided_slice %3 {offsets = [0, 11], sizes = [8, 1], strides = [1, 1]} : vector<8x128xf32> to vector<8x1xf32>
    %178 = vector.broadcast %177 : vector<8x1xf32> to vector<8x768xf32>
    %179 = arith.mulf %178, %176 : vector<8x768xf32>
    %180 = arith.addf %165, %179 : vector<8x768xf32>
    %181 = vector.extract_strided_slice %3 {offsets = [0, 23], sizes = [8, 1], strides = [1, 1]} : vector<8x128xf32> to vector<8x1xf32>
    %182 = vector.broadcast %181 : vector<8x1xf32> to vector<8x768xf32>
    %183 = arith.mulf %182, %176 : vector<8x768xf32>
    %184 = arith.addf %169, %183 : vector<8x768xf32>
    %185 = vector.extract_strided_slice %3 {offsets = [0, 35], sizes = [8, 1], strides = [1, 1]} : vector<8x128xf32> to vector<8x1xf32>
    %186 = vector.broadcast %185 : vector<8x1xf32> to vector<8x768xf32>
    %187 = arith.mulf %186, %176 : vector<8x768xf32>
    %188 = arith.addf %173, %187 : vector<8x768xf32>
    %189 = vector.extract_strided_slice %3 {offsets = [0, 36], sizes = [8, 1], strides = [1, 1]} : vector<8x128xf32> to vector<8x1xf32>
    %c18_i32 = arith.constant 18 : i32
    %190 = tpu.dynamic_rotate %180 by %c18_i32 dim 1 : vector<8x768xf32>, i32 -> vector<8x768xf32>
    %191 = arith.addf %190, %184 : vector<8x768xf32>
    %c750_i32 = arith.constant 750 : i32
    %192 = tpu.dynamic_rotate %188 by %c750_i32 dim 1 : vector<8x768xf32>, i32 -> vector<8x768xf32>
    %193 = arith.addf %191, %192 : vector<8x768xf32>
    %194 = vector.broadcast %189 : vector<8x1xf32> to vector<8x768xf32>
    %195 = arith.addf %193, %194 : vector<8x768xf32>
    %cst_5 = arith.constant 0.000000e+00 : f32
    %196 = vector.broadcast %cst_5 : f32 to vector<8x768xf32>
    %197 = arith.maximumf %195, %196 : vector<8x768xf32>
    %198 = arith.mulf %197, %2 : vector<8x768xf32>
    %c1_i32_6 = arith.constant 1 : i32
    %199 = tpu.dynamic_rotate %198 by %c1_i32_6 dim 1 : vector<8x768xf32>, i32 -> vector<8x768xf32>
    %c767_i32_7 = arith.constant 767 : i32
    %200 = tpu.dynamic_rotate %198 by %c767_i32_7 dim 1 : vector<8x768xf32>, i32 -> vector<8x768xf32>
    %cst_8 = arith.constant 0.000000e+00 : f32
    %201 = vector.broadcast %cst_8 : f32 to vector<8x768xf32>
    %cst_9 = arith.constant 0.000000e+00 : f32
    %202 = vector.broadcast %cst_9 : f32 to vector<8x768xf32>
    %cst_10 = arith.constant 0.000000e+00 : f32
    %203 = vector.broadcast %cst_10 : f32 to vector<8x768xf32>
    %204 = vector.extract_strided_slice %199 {offsets = [0, 0], sizes = [1, 768], strides = [1, 1]} : vector<8x768xf32> to vector<1x768xf32>
    %205 = vector.shape_cast %204 : vector<1x768xf32> to vector<1x768xf32>
    %206 = vector.broadcast %205 : vector<1x768xf32> to vector<8x768xf32>
    %207 = vector.extract_strided_slice %3 {offsets = [0, 37], sizes = [8, 1], strides = [1, 1]} : vector<8x128xf32> to vector<8x1xf32>
    %208 = vector.broadcast %207 : vector<8x1xf32> to vector<8x768xf32>
    %209 = arith.mulf %208, %206 : vector<8x768xf32>
    %210 = arith.addf %201, %209 : vector<8x768xf32>
    %211 = vector.extract_strided_slice %3 {offsets = [0, 49], sizes = [8, 1], strides = [1, 1]} : vector<8x128xf32> to vector<8x1xf32>
    %212 = vector.broadcast %211 : vector<8x1xf32> to vector<8x768xf32>
    %213 = arith.mulf %212, %206 : vector<8x768xf32>
    %214 = arith.addf %202, %213 : vector<8x768xf32>
    %215 = vector.extract_strided_slice %3 {offsets = [0, 61], sizes = [8, 1], strides = [1, 1]} : vector<8x128xf32> to vector<8x1xf32>
    %216 = vector.broadcast %215 : vector<8x1xf32> to vector<8x768xf32>
    %217 = arith.mulf %216, %206 : vector<8x768xf32>
    %218 = arith.addf %203, %217 : vector<8x768xf32>
    %219 = vector.extract_strided_slice %199 {offsets = [1, 0], sizes = [1, 768], strides = [1, 1]} : vector<8x768xf32> to vector<1x768xf32>
    %220 = vector.shape_cast %219 : vector<1x768xf32> to vector<1x768xf32>
    %221 = vector.broadcast %220 : vector<1x768xf32> to vector<8x768xf32>
    %222 = vector.extract_strided_slice %3 {offsets = [0, 38], sizes = [8, 1], strides = [1, 1]} : vector<8x128xf32> to vector<8x1xf32>
    %223 = vector.broadcast %222 : vector<8x1xf32> to vector<8x768xf32>
    %224 = arith.mulf %223, %221 : vector<8x768xf32>
    %225 = arith.addf %210, %224 : vector<8x768xf32>
    %226 = vector.extract_strided_slice %3 {offsets = [0, 50], sizes = [8, 1], strides = [1, 1]} : vector<8x128xf32> to vector<8x1xf32>
    %227 = vector.broadcast %226 : vector<8x1xf32> to vector<8x768xf32>
    %228 = arith.mulf %227, %221 : vector<8x768xf32>
    %229 = arith.addf %214, %228 : vector<8x768xf32>
    %230 = vector.extract_strided_slice %3 {offsets = [0, 62], sizes = [8, 1], strides = [1, 1]} : vector<8x128xf32> to vector<8x1xf32>
    %231 = vector.broadcast %230 : vector<8x1xf32> to vector<8x768xf32>
    %232 = arith.mulf %231, %221 : vector<8x768xf32>
    %233 = arith.addf %218, %232 : vector<8x768xf32>
    %234 = vector.extract_strided_slice %199 {offsets = [2, 0], sizes = [1, 768], strides = [1, 1]} : vector<8x768xf32> to vector<1x768xf32>
    %235 = vector.shape_cast %234 : vector<1x768xf32> to vector<1x768xf32>
    %236 = vector.broadcast %235 : vector<1x768xf32> to vector<8x768xf32>
    %237 = vector.extract_strided_slice %3 {offsets = [0, 39], sizes = [8, 1], strides = [1, 1]} : vector<8x128xf32> to vector<8x1xf32>
    %238 = vector.broadcast %237 : vector<8x1xf32> to vector<8x768xf32>
    %239 = arith.mulf %238, %236 : vector<8x768xf32>
    %240 = arith.addf %225, %239 : vector<8x768xf32>
    %241 = vector.extract_strided_slice %3 {offsets = [0, 51], sizes = [8, 1], strides = [1, 1]} : vector<8x128xf32> to vector<8x1xf32>
    %242 = vector.broadcast %241 : vector<8x1xf32> to vector<8x768xf32>
    %243 = arith.mulf %242, %236 : vector<8x768xf32>
    %244 = arith.addf %229, %243 : vector<8x768xf32>
    %245 = vector.extract_strided_slice %3 {offsets = [0, 63], sizes = [8, 1], strides = [1, 1]} : vector<8x128xf32> to vector<8x1xf32>
    %246 = vector.broadcast %245 : vector<8x1xf32> to vector<8x768xf32>
    %247 = arith.mulf %246, %236 : vector<8x768xf32>
    %248 = arith.addf %233, %247 : vector<8x768xf32>
    %249 = vector.extract_strided_slice %199 {offsets = [3, 0], sizes = [1, 768], strides = [1, 1]} : vector<8x768xf32> to vector<1x768xf32>
    %250 = vector.shape_cast %249 : vector<1x768xf32> to vector<1x768xf32>
    %251 = vector.broadcast %250 : vector<1x768xf32> to vector<8x768xf32>
    %252 = vector.extract_strided_slice %3 {offsets = [0, 40], sizes = [8, 1], strides = [1, 1]} : vector<8x128xf32> to vector<8x1xf32>
    %253 = vector.broadcast %252 : vector<8x1xf32> to vector<8x768xf32>
    %254 = arith.mulf %253, %251 : vector<8x768xf32>
    %255 = arith.addf %240, %254 : vector<8x768xf32>
    %256 = vector.extract_strided_slice %3 {offsets = [0, 52], sizes = [8, 1], strides = [1, 1]} : vector<8x128xf32> to vector<8x1xf32>
    %257 = vector.broadcast %256 : vector<8x1xf32> to vector<8x768xf32>
    %258 = arith.mulf %257, %251 : vector<8x768xf32>
    %259 = arith.addf %244, %258 : vector<8x768xf32>
    %260 = vector.extract_strided_slice %3 {offsets = [0, 64], sizes = [8, 1], strides = [1, 1]} : vector<8x128xf32> to vector<8x1xf32>
    %261 = vector.broadcast %260 : vector<8x1xf32> to vector<8x768xf32>
    %262 = arith.mulf %261, %251 : vector<8x768xf32>
    %263 = arith.addf %248, %262 : vector<8x768xf32>
    %264 = vector.extract_strided_slice %198 {offsets = [0, 0], sizes = [1, 768], strides = [1, 1]} : vector<8x768xf32> to vector<1x768xf32>
    %265 = vector.shape_cast %264 : vector<1x768xf32> to vector<1x768xf32>
    %266 = vector.broadcast %265 : vector<1x768xf32> to vector<8x768xf32>
    %267 = vector.extract_strided_slice %3 {offsets = [0, 41], sizes = [8, 1], strides = [1, 1]} : vector<8x128xf32> to vector<8x1xf32>
    %268 = vector.broadcast %267 : vector<8x1xf32> to vector<8x768xf32>
    %269 = arith.mulf %268, %266 : vector<8x768xf32>
    %270 = arith.addf %255, %269 : vector<8x768xf32>
    %271 = vector.extract_strided_slice %3 {offsets = [0, 53], sizes = [8, 1], strides = [1, 1]} : vector<8x128xf32> to vector<8x1xf32>
    %272 = vector.broadcast %271 : vector<8x1xf32> to vector<8x768xf32>
    %273 = arith.mulf %272, %266 : vector<8x768xf32>
    %274 = arith.addf %259, %273 : vector<8x768xf32>
    %275 = vector.extract_strided_slice %3 {offsets = [0, 65], sizes = [8, 1], strides = [1, 1]} : vector<8x128xf32> to vector<8x1xf32>
    %276 = vector.broadcast %275 : vector<8x1xf32> to vector<8x768xf32>
    %277 = arith.mulf %276, %266 : vector<8x768xf32>
    %278 = arith.addf %263, %277 : vector<8x768xf32>
    %279 = vector.extract_strided_slice %198 {offsets = [1, 0], sizes = [1, 768], strides = [1, 1]} : vector<8x768xf32> to vector<1x768xf32>
    %280 = vector.shape_cast %279 : vector<1x768xf32> to vector<1x768xf32>
    %281 = vector.broadcast %280 : vector<1x768xf32> to vector<8x768xf32>
    %282 = vector.extract_strided_slice %3 {offsets = [0, 42], sizes = [8, 1], strides = [1, 1]} : vector<8x128xf32> to vector<8x1xf32>
    %283 = vector.broadcast %282 : vector<8x1xf32> to vector<8x768xf32>
    %284 = arith.mulf %283, %281 : vector<8x768xf32>
    %285 = arith.addf %270, %284 : vector<8x768xf32>
    %286 = vector.extract_strided_slice %3 {offsets = [0, 54], sizes = [8, 1], strides = [1, 1]} : vector<8x128xf32> to vector<8x1xf32>
    %287 = vector.broadcast %286 : vector<8x1xf32> to vector<8x768xf32>
    %288 = arith.mulf %287, %281 : vector<8x768xf32>
    %289 = arith.addf %274, %288 : vector<8x768xf32>
    %290 = vector.extract_strided_slice %3 {offsets = [0, 66], sizes = [8, 1], strides = [1, 1]} : vector<8x128xf32> to vector<8x1xf32>
    %291 = vector.broadcast %290 : vector<8x1xf32> to vector<8x768xf32>
    %292 = arith.mulf %291, %281 : vector<8x768xf32>
    %293 = arith.addf %278, %292 : vector<8x768xf32>
    %294 = vector.extract_strided_slice %198 {offsets = [2, 0], sizes = [1, 768], strides = [1, 1]} : vector<8x768xf32> to vector<1x768xf32>
    %295 = vector.shape_cast %294 : vector<1x768xf32> to vector<1x768xf32>
    %296 = vector.broadcast %295 : vector<1x768xf32> to vector<8x768xf32>
    %297 = vector.extract_strided_slice %3 {offsets = [0, 43], sizes = [8, 1], strides = [1, 1]} : vector<8x128xf32> to vector<8x1xf32>
    %298 = vector.broadcast %297 : vector<8x1xf32> to vector<8x768xf32>
    %299 = arith.mulf %298, %296 : vector<8x768xf32>
    %300 = arith.addf %285, %299 : vector<8x768xf32>
    %301 = vector.extract_strided_slice %3 {offsets = [0, 55], sizes = [8, 1], strides = [1, 1]} : vector<8x128xf32> to vector<8x1xf32>
    %302 = vector.broadcast %301 : vector<8x1xf32> to vector<8x768xf32>
    %303 = arith.mulf %302, %296 : vector<8x768xf32>
    %304 = arith.addf %289, %303 : vector<8x768xf32>
    %305 = vector.extract_strided_slice %3 {offsets = [0, 67], sizes = [8, 1], strides = [1, 1]} : vector<8x128xf32> to vector<8x1xf32>
    %306 = vector.broadcast %305 : vector<8x1xf32> to vector<8x768xf32>
    %307 = arith.mulf %306, %296 : vector<8x768xf32>
    %308 = arith.addf %293, %307 : vector<8x768xf32>
    %309 = vector.extract_strided_slice %198 {offsets = [3, 0], sizes = [1, 768], strides = [1, 1]} : vector<8x768xf32> to vector<1x768xf32>
    %310 = vector.shape_cast %309 : vector<1x768xf32> to vector<1x768xf32>
    %311 = vector.broadcast %310 : vector<1x768xf32> to vector<8x768xf32>
    %312 = vector.extract_strided_slice %3 {offsets = [0, 44], sizes = [8, 1], strides = [1, 1]} : vector<8x128xf32> to vector<8x1xf32>
    %313 = vector.broadcast %312 : vector<8x1xf32> to vector<8x768xf32>
    %314 = arith.mulf %313, %311 : vector<8x768xf32>
    %315 = arith.addf %300, %314 : vector<8x768xf32>
    %316 = vector.extract_strided_slice %3 {offsets = [0, 56], sizes = [8, 1], strides = [1, 1]} : vector<8x128xf32> to vector<8x1xf32>
    %317 = vector.broadcast %316 : vector<8x1xf32> to vector<8x768xf32>
    %318 = arith.mulf %317, %311 : vector<8x768xf32>
    %319 = arith.addf %304, %318 : vector<8x768xf32>
    %320 = vector.extract_strided_slice %3 {offsets = [0, 68], sizes = [8, 1], strides = [1, 1]} : vector<8x128xf32> to vector<8x1xf32>
    %321 = vector.broadcast %320 : vector<8x1xf32> to vector<8x768xf32>
    %322 = arith.mulf %321, %311 : vector<8x768xf32>
    %323 = arith.addf %308, %322 : vector<8x768xf32>
    %324 = vector.extract_strided_slice %200 {offsets = [0, 0], sizes = [1, 768], strides = [1, 1]} : vector<8x768xf32> to vector<1x768xf32>
    %325 = vector.shape_cast %324 : vector<1x768xf32> to vector<1x768xf32>
    %326 = vector.broadcast %325 : vector<1x768xf32> to vector<8x768xf32>
    %327 = vector.extract_strided_slice %3 {offsets = [0, 45], sizes = [8, 1], strides = [1, 1]} : vector<8x128xf32> to vector<8x1xf32>
    %328 = vector.broadcast %327 : vector<8x1xf32> to vector<8x768xf32>
    %329 = arith.mulf %328, %326 : vector<8x768xf32>
    %330 = arith.addf %315, %329 : vector<8x768xf32>
    %331 = vector.extract_strided_slice %3 {offsets = [0, 57], sizes = [8, 1], strides = [1, 1]} : vector<8x128xf32> to vector<8x1xf32>
    %332 = vector.broadcast %331 : vector<8x1xf32> to vector<8x768xf32>
    %333 = arith.mulf %332, %326 : vector<8x768xf32>
    %334 = arith.addf %319, %333 : vector<8x768xf32>
    %335 = vector.extract_strided_slice %3 {offsets = [0, 69], sizes = [8, 1], strides = [1, 1]} : vector<8x128xf32> to vector<8x1xf32>
    %336 = vector.broadcast %335 : vector<8x1xf32> to vector<8x768xf32>
    %337 = arith.mulf %336, %326 : vector<8x768xf32>
    %338 = arith.addf %323, %337 : vector<8x768xf32>
    %339 = vector.extract_strided_slice %200 {offsets = [1, 0], sizes = [1, 768], strides = [1, 1]} : vector<8x768xf32> to vector<1x768xf32>
    %340 = vector.shape_cast %339 : vector<1x768xf32> to vector<1x768xf32>
    %341 = vector.broadcast %340 : vector<1x768xf32> to vector<8x768xf32>
    %342 = vector.extract_strided_slice %3 {offsets = [0, 46], sizes = [8, 1], strides = [1, 1]} : vector<8x128xf32> to vector<8x1xf32>
    %343 = vector.broadcast %342 : vector<8x1xf32> to vector<8x768xf32>
    %344 = arith.mulf %343, %341 : vector<8x768xf32>
    %345 = arith.addf %330, %344 : vector<8x768xf32>
    %346 = vector.extract_strided_slice %3 {offsets = [0, 58], sizes = [8, 1], strides = [1, 1]} : vector<8x128xf32> to vector<8x1xf32>
    %347 = vector.broadcast %346 : vector<8x1xf32> to vector<8x768xf32>
    %348 = arith.mulf %347, %341 : vector<8x768xf32>
    %349 = arith.addf %334, %348 : vector<8x768xf32>
    %350 = vector.extract_strided_slice %3 {offsets = [0, 70], sizes = [8, 1], strides = [1, 1]} : vector<8x128xf32> to vector<8x1xf32>
    %351 = vector.broadcast %350 : vector<8x1xf32> to vector<8x768xf32>
    %352 = arith.mulf %351, %341 : vector<8x768xf32>
    %353 = arith.addf %338, %352 : vector<8x768xf32>
    %354 = vector.extract_strided_slice %200 {offsets = [2, 0], sizes = [1, 768], strides = [1, 1]} : vector<8x768xf32> to vector<1x768xf32>
    %355 = vector.shape_cast %354 : vector<1x768xf32> to vector<1x768xf32>
    %356 = vector.broadcast %355 : vector<1x768xf32> to vector<8x768xf32>
    %357 = vector.extract_strided_slice %3 {offsets = [0, 47], sizes = [8, 1], strides = [1, 1]} : vector<8x128xf32> to vector<8x1xf32>
    %358 = vector.broadcast %357 : vector<8x1xf32> to vector<8x768xf32>
    %359 = arith.mulf %358, %356 : vector<8x768xf32>
    %360 = arith.addf %345, %359 : vector<8x768xf32>
    %361 = vector.extract_strided_slice %3 {offsets = [0, 59], sizes = [8, 1], strides = [1, 1]} : vector<8x128xf32> to vector<8x1xf32>
    %362 = vector.broadcast %361 : vector<8x1xf32> to vector<8x768xf32>
    %363 = arith.mulf %362, %356 : vector<8x768xf32>
    %364 = arith.addf %349, %363 : vector<8x768xf32>
    %365 = vector.extract_strided_slice %3 {offsets = [0, 71], sizes = [8, 1], strides = [1, 1]} : vector<8x128xf32> to vector<8x1xf32>
    %366 = vector.broadcast %365 : vector<8x1xf32> to vector<8x768xf32>
    %367 = arith.mulf %366, %356 : vector<8x768xf32>
    %368 = arith.addf %353, %367 : vector<8x768xf32>
    %369 = vector.extract_strided_slice %200 {offsets = [3, 0], sizes = [1, 768], strides = [1, 1]} : vector<8x768xf32> to vector<1x768xf32>
    %370 = vector.shape_cast %369 : vector<1x768xf32> to vector<1x768xf32>
    %371 = vector.broadcast %370 : vector<1x768xf32> to vector<8x768xf32>
    %372 = vector.extract_strided_slice %3 {offsets = [0, 48], sizes = [8, 1], strides = [1, 1]} : vector<8x128xf32> to vector<8x1xf32>
    %373 = vector.broadcast %372 : vector<8x1xf32> to vector<8x768xf32>
    %374 = arith.mulf %373, %371 : vector<8x768xf32>
    %375 = arith.addf %360, %374 : vector<8x768xf32>
    %376 = vector.extract_strided_slice %3 {offsets = [0, 60], sizes = [8, 1], strides = [1, 1]} : vector<8x128xf32> to vector<8x1xf32>
    %377 = vector.broadcast %376 : vector<8x1xf32> to vector<8x768xf32>
    %378 = arith.mulf %377, %371 : vector<8x768xf32>
    %379 = arith.addf %364, %378 : vector<8x768xf32>
    %380 = vector.extract_strided_slice %3 {offsets = [0, 72], sizes = [8, 1], strides = [1, 1]} : vector<8x128xf32> to vector<8x1xf32>
    %381 = vector.broadcast %380 : vector<8x1xf32> to vector<8x768xf32>
    %382 = arith.mulf %381, %371 : vector<8x768xf32>
    %383 = arith.addf %368, %382 : vector<8x768xf32>
    %384 = vector.extract_strided_slice %3 {offsets = [0, 73], sizes = [8, 1], strides = [1, 1]} : vector<8x128xf32> to vector<8x1xf32>
    %c18_i32_11 = arith.constant 18 : i32
    %385 = tpu.dynamic_rotate %375 by %c18_i32_11 dim 1 : vector<8x768xf32>, i32 -> vector<8x768xf32>
    %386 = arith.addf %385, %379 : vector<8x768xf32>
    %c750_i32_12 = arith.constant 750 : i32
    %387 = tpu.dynamic_rotate %383 by %c750_i32_12 dim 1 : vector<8x768xf32>, i32 -> vector<8x768xf32>
    %388 = arith.addf %386, %387 : vector<8x768xf32>
    %389 = vector.broadcast %384 : vector<8x1xf32> to vector<8x768xf32>
    %390 = arith.addf %388, %389 : vector<8x768xf32>
    %391 = arith.addf %390, %0 : vector<8x768xf32>
    %c0_13 = arith.constant 0 : index
    %c0_14 = arith.constant 0 : index
    %392 = vector.load %arg2[%c0_13, %c0_14] : memref<8x768xf32, #tpu.memory_space<vmem>>, vector<8x768xf32>
    tpu.vector_store %arg2[%c0_13, %c0_14], %391 {strides = array<i32>} : memref<8x768xf32, #tpu.memory_space<vmem>>, vector<8x768xf32>,
    return
  }
}

</mosaic_0001>

<bundles_post_ra>
// kernel: tpu_custom_call.1
= control target key start
LH: loop header
LB: loop body
LE: loop exit
PB: predicated region body
PF: predicated region fallthrough
CT: control target
= control target key end

     0   :  { %7 = vsyncpa [#allocation3], 0  ;;  %s4314_s0 = inlined_call_operand.hbm [shape: f32[8,768], index: 0, kind: input, shape index: {}]   ;;  %s4315_s1 = inlined_call_operand.hbm [shape: f32[8,896], index: 1, kind: input, shape index: {}]   ;;  %s4316_s2 = inlined_call_operand.hbm [shape: f32[8,768], index: 2, kind: output, shape index: {}]  }
   0x1   :  { %8 = vsyncpa [#allocation6], 0 }
   0x2   :  { %9 = vsyncpa [#allocation4], 0  ;;  %s2246_s9 = smov [#allocation2]   ;;  %s2247_s11 = smov [#allocation5]  }
   0x3   :  { %s16_s10 = sshll.u32 %s2246_s9, 4  ;;  %s26_s12 = sshll.u32 %s2247_s11, 4  ;;  %s17_s10 = int_to_ptr.vmem [resolvable:$true] %s16_s10  ;;  %s27_s12 = int_to_ptr.vmem [resolvable:$true] %s26_s12 }
   0x4   :  { %s2174_s15 = scalar_lea.hbm %s4314_s0, 768 }
   0x5   :  { %p2175_p0 = scmp.ne.s32.totalorder %s4314_s0, %s2174_s15  ;;  %p2178_p1 = scmp.lt.u32.totalorder %s2174_s15, %s4314_s0 }
   0x7   :  { %p2180_p2 = pnand %p2178_p1, %p2175_p0 }
   0x9   :  { %2183 = shalt.err (!%p2180_p2)
}
   0xa   :  { %s2184_s20 = scalar_lea.vmem %s17_s10, 768  ;;  %p2189_p4 = scmp.lt.s32.totalorder %s17_s10, %s17_s10 }
   0xb   :  { %p2185_p3 = scmp.ne.s32.totalorder %s17_s10, %s2184_s20  ;;  %p2190_p5 = scmp.lt.s32.totalorder %s2184_s20, %s2184_s20 }
   0xd   :  { %p2191_p6 = por %p2190_p5, %p2189_p4 }
   0xf   :  { %p2192_p7 = pnand %p2191_p6, %p2185_p3 }
  0x11   :  { %2195 = shalt.err (!%p2192_p7)
}
  0x12   :  { %19 = dma.hbm_to_vmem [thread:$0]  %s4314_s0, 768, %s17_s10, [#allocation3]  }
  0x13   :  { %s2196_s25 = scalar_lea.hbm %s4315_s1, 896 }
  0x14   :  { %p2197_p8 = scmp.ne.s32.totalorder %s4315_s1, %s2196_s25  ;;  %p2200_p9 = scmp.lt.u32.totalorder %s2196_s25, %s4315_s1 }
  0x16   :  { %p2202_p10 = pnand %p2200_p9, %p2197_p8 }
  0x18   :  { %2205 = shalt.err (!%p2202_p10)
}
  0x19   :  { %s2206_s30 = scalar_lea.vmem %s27_s12, 896  ;;  %p2211_p12 = scmp.lt.s32.totalorder %s27_s12, %s27_s12 }
  0x1a   :  { %p2207_p11 = scmp.ne.s32.totalorder %s27_s12, %s2206_s30  ;;  %p2212_p13 = scmp.lt.s32.totalorder %s2206_s30, %s2206_s30 }
  0x1c   :  { %p2213_p0 = por %p2212_p13, %p2211_p12 }
  0x1e   :  { %p2214_p1 = pnand %p2213_p0, %p2207_p11 }
  0x20   :  { %2217 = shalt.err (!%p2214_p1)
}
  0x21   :  { %29 = dma.hbm_to_vmem [thread:$0]  %s4315_s1, 896, %s27_s12, [#allocation6]  }
  0x22   :  { %2240 = dma.done.wait [#allocation3], 768  }
  0x23   :  { %2241 = vsyncadd [#allocation3], 4294966528 }
  0x24   :  { %2242 = dma.done.wait [#allocation6], 896  }
  0x25   :  { %2243 = vsyncadd [#allocation6], 4294966400  ;;  %v2248_v0 = vmov 12   ;;  %v2249_v1 = vmov 0   ;;  %v2366_v2 = vld [vmem:[#allocation2 + $0x10] sm:$0xff]  ;;  %v2368_v3 = vld [vmem:[#allocation2] sm:$0xff]  ;;  %v61_v49 = vlaneseq }
  0x26   :  { %2094 = vset.pattern.permute.xlu1 %v2248_v0  ;;  %2093 = vset.pattern.permute.xlu0 %v2249_v1  ;;  %s2250_s4 = smov 1   ;;  %v2374_v4 = vld [vmem:[#allocation2 + $0x18] sm:$0xff]  ;;  %v2376_v5 = vld [vmem:[#allocation2 + $0x8] sm:$0xff]  ;;  %v2384_v7 = vld [vmem:[#allocation2 + $0x20] sm:$0xff]  ;;  %s2251_s1 = smov 127   ;;  %v2252_v9 = vmov 24  }
  0x27   :  { %53 = vrot.lane.b32.xlu1 %v2366_v2, %s2250_s4  ;;  %49 = vrot.lane.b32.xlu0 %v2368_v3, %s2250_s4  ;;  %v2382_v6 = vld [vmem:[#allocation2 + $0x28] sm:$0xff]  ;;  %v2402_v8 = vld [vmem:[#allocation5 + $0x30] sm:$0xff]  ;;  %v2253_v10 = vmov 1   ;;  %v2254_v11 = vmov 13   ;;  %v2255_v12 = vmov 2   ;;  %v2256_v13 = vmov 25  }
  0x28   :  { %v2257_v14 = vmov 3   ;;  %v2258_v15 = vmov 14   ;;  %v2259_v16 = vmov 4   ;;  %v2260_v17 = vmov 26   ;;  %s2291_s5 = smov 18   ;;  %s2292_s6 = smov 110  }
  0x29   :  { %v2261_v18 = vmov 5   ;;  %v2262_v19 = vmov 15   ;;  %v2263_v20 = vmov 6   ;;  %v2264_v21 = vmov 27   ;;  %s2326_s7 = smov [#allocation7]  }
  0x2a   :  { %v2265_v22 = vmov 31   ;;  %v2266_v23 = vmov 16   ;;  %v2267_v24 = vmov 9   ;;  %v2268_v25 = vmov 28   ;;  %s2002_s8 = sshll.u32 %s2326_s7, 4  ;;  %s2003_s8 = int_to_ptr.vmem [resolvable:$true] %s2002_s8 }
  0x2b   :  { %55 = vrot.lane.b32.xlu1 %v2374_v4, %s2250_s4  ;;  %51 = vrot.lane.b32.xlu0 %v2376_v5, %s2250_s4  ;;  %v2269_v26 = vmov 34   ;;  %v2270_v27 = vmov 17   ;;  %v2271_v28 = vmov 18   ;;  %v2272_v29 = vmov 29   ;;  %s2218_s9 = scalar_lea.vmem %s2003_s8, 768  ;;  %p2223_p3 = scmp.lt.s32.totalorder %s2003_s8, %s2003_s8 }
  0x2c   :  { %v2273_v30 = vmov 21   ;;  %v2274_v31 = vmov 30   ;;  %v2275_v32 = vmov 7   ;;  %v2276_v33 = vmov 8   ;;  %p2219_p2 = scmp.ne.s32.totalorder %s2003_s8, %s2218_s9  ;;  %p2224_p4 = scmp.lt.s32.totalorder %s2218_s9, %s2218_s9 }
  0x2d   :  { %v2277_v34 = vmov 36   ;;  %v2278_v35 = vmov 32   ;;  %v2279_v36 = vmov 37   ;;  %v2280_v37 = vmov 33  }
  0x2e   :  { %v2281_v38 = vmov 10   ;;  %v2282_v39 = vmov 11   ;;  %v2283_v42 = vmov 35   ;;  %v2284_v45 = vmov 19   ;;  %p2225_p5 = por %p2224_p4, %p2223_p3 }
  0x2f   :  { %59 = vrot.lane.b32.xlu1 %v2382_v6, %s2250_s4  ;;  %57 = vrot.lane.b32.xlu0 %v2384_v7, %s2250_s4  ;;  %v2285_v46 = vmov 20   ;;  %v2286_v50 = vmov 22   ;;  %v2287_v53 = vmov 38   ;;  %v90_v54 = vshrl.u32 %v61_v49, 7 }
  0x30   :  { %v2455_v55 = vand.u32 127, %v61_v49  ;;  %v2288_v56 = vmov 23   ;;  %v2289_v1 = vmov 49   ;;  %p2226_p6 = pnand %p2225_p5, %p2219_p2 }
  0x31   :  { %v2458_v57 = vsub.s32 0, %v90_v54  ;;  %v2465_v60 = vsub.s32 1, %v90_v54  ;;  %v2467_v61 = vsub.s32 2, %v90_v54  ;;  %v2469_v62 = vsub.s32 3, %v90_v54 }
  0x32   :  { %4441 = vst [vmem:[#allocation11_spill] sm:$0xff] %v2455_v55  ;;  %vm63_vm0 = vcmp.lt.s32.totalorder %v2455_v55, 1  ;;  %vm82_vm1 = vcmp.lt.s32.totalorder %v2455_v55, 127 }
  0x33   :  { %72 = vrot.lane.b32.xlu1 %v2376_v5, %s2251_s1  ;;  %70 = vrot.lane.b32.xlu0 %v2368_v3, %s2251_s1  ;;  %4442 = vst [vmem:[#allocation12_spill] sm:$0xff] %v2458_v57  ;;  %4443 = vst [vmem:[#allocation13_spill] sm:$0xff] %v2465_v60  ;;  %v2473_v63 = vrot.slane %v2376_v5, %v2458_v57  ;;  %v2477_v0 = vrot.slane %v2366_v2, %v2458_v57 }
  0x34   :  { %4444 = vst [vmem:[#allocation14_spill] sm:$0xff] %v2467_v61  ;;  %4445 = vst [vmem:[#allocation15_spill] sm:$0xff] %v2469_v62 }
  0x37   :  { %76 = vrot.lane.b32.xlu1 %v2374_v4, %s2251_s1  ;;  %74 = vrot.lane.b32.xlu0 %v2366_v2, %s2251_s1 }
  0x3b   :  { %80 = vrot.lane.b32.xlu1 %v2382_v6, %s2251_s1  ;;  %78 = vrot.lane.b32.xlu0 %v2384_v7, %s2251_s1 }
  0x3f   :  { %131 = vperm.xlu1 %2094, %v2402_v8   ;;  %115 = vperm.xlu0 %2093, %v2402_v8  }
  0x43   :  { %2095 = vset.pattern.permute.xlu1 %v2252_v9  ;;  %2096 = vset.pattern.permute.xlu0 %v2253_v10  ;;  %v2482_v9 = vrot.slane %v2374_v4, %v2458_v57  ;;  %v2486_v10 = vrot.slane %v2384_v7, %v2458_v57 }
  0x44   :  { %147 = vperm.xlu1 %2095, %v2402_v8   ;;  %187 = vperm.xlu0 %2096, %v2402_v8  }
  0x45   :  { %4446 = vst [vmem:[#allocation16_spill] sm:$0xff] %v2482_v9  ;;  %4447 = vst [vmem:[#allocation17_spill] sm:$0xff] %v2486_v10 }
  0x48   :  { %2097 = vset.pattern.permute.xlu1 %v2254_v11  ;;  %2099 = vset.pattern.permute.xlu0 %v2255_v12  ;;  %v2490_v11 = vrot.slane %v2382_v6, %v2458_v57  ;;  %v2494_v12 = vrot.slane %v2368_v3, %v2458_v57 }
  0x49   :  { %203 = vperm.xlu1 %2097, %v2402_v8   ;;  %259 = vperm.xlu0 %2099, %v2402_v8  }
  0x4a   :  { %4448 = vst [vmem:[#allocation18_spill] sm:$0xff] %v2490_v11 }
  0x4d   :  { %2098 = vset.pattern.permute.xlu1 %v2256_v13  ;;  %2102 = vset.pattern.permute.xlu0 %v2257_v14  ;;  %v2499_v13 = vrot.slane %v2376_v5, %v2465_v60  ;;  %v2503_v14 = vrot.slane %v2366_v2, %v2465_v60 }
  0x4e   :  { %219 = vperm.xlu1 %2098, %v2402_v8   ;;  %331 = vperm.xlu0 %2102, %v2402_v8  }
  0x4f   :  { %4449 = vst [vmem:[#allocation19_spill] sm:$0xff] %v2499_v13  ;;  %4450 = vst [vmem:[#allocation20_spill] sm:$0xff] %v2503_v14 }
  0x52   :  { %2100 = vset.pattern.permute.xlu1 %v2258_v15  ;;  %2105 = vset.pattern.permute.xlu0 %v2259_v16  ;;  %v2507_v15 = vrot.slane %v2374_v4, %v2465_v60  ;;  %v2511_v16 = vrot.slane %v2384_v7, %v2465_v60 }
  0x53   :  { %275 = vperm.xlu1 %2100, %v2402_v8   ;;  %403 = vperm.xlu0 %2105, %v2402_v8  }
  0x54   :  { %4451 = vst [vmem:[#allocation21_spill] sm:$0xff] %v2507_v15  ;;  %4452 = vst [vmem:[#allocation22_spill] sm:$0xff] %v2511_v16 }
  0x57   :  { %2101 = vset.pattern.permute.xlu1 %v2260_v17  ;;  %2108 = vset.pattern.permute.xlu0 %v2261_v18  ;;  %v2515_v17 = vrot.slane %v2382_v6, %v2465_v60  ;;  %v2523_v18 = vrot.slane %v2376_v5, %v2467_v61 }
  0x58   :  { %291 = vperm.xlu1 %2101, %v2402_v8   ;;  %475 = vperm.xlu0 %2108, %v2402_v8  }
  0x59   :  { %4453 = vst [vmem:[#allocation23_spill] sm:$0xff] %v2515_v17  ;;  %4455 = vst [vmem:[#allocation25_spill] sm:$0xff] %v2523_v18 }
  0x5c   :  { %2103 = vset.pattern.permute.xlu1 %v2262_v19  ;;  %2111 = vset.pattern.permute.xlu0 %v2263_v20 }
  0x5d   :  { %347 = vperm.xlu1 %2103, %v2402_v8   ;;  %547 = vperm.xlu0 %2111, %v2402_v8  }
  0x61   :  { %2104 = vset.pattern.permute.xlu1 %v2264_v21  ;;  %2114 = vset.pattern.permute.xlu0 %v2265_v22  ;;  %v2531_v22 = vrot.slane %v2366_v2, %v2467_v61 }
  0x62   :  { %363 = vperm.xlu1 %2104, %v2402_v8   ;;  %651 = vperm.xlu0 %2114, %v2402_v8  }
  0x63   :  { %4456 = vst [vmem:[#allocation26_spill] sm:$0xff] %v2531_v22 }
  0x66   :  { %2106 = vset.pattern.permute.xlu1 %v2266_v23  ;;  %2117 = vset.pattern.permute.xlu0 %v2267_v24  ;;  %v2535_v23 = vrot.slane %v2374_v4, %v2467_v61  ;;  %v2539_v24 = vrot.slane %v2384_v7, %v2467_v61 }
  0x67   :  { %419 = vperm.xlu1 %2106, %v2402_v8   ;;  %763 = vperm.xlu0 %2117, %v2402_v8  }
  0x68   :  { %4457 = vst [vmem:[#allocation27_spill] sm:$0xff] %v2535_v23  ;;  %4458 = vst [vmem:[#allocation28_spill] sm:$0xff] %v2539_v24 }
  0x6b   :  { %2107 = vset.pattern.permute.xlu1 %v2268_v25  ;;  %2120 = vset.pattern.permute.xlu0 %v2269_v26  ;;  %v2546_v26 = vrot.slane %v2382_v6, %v2467_v61 }
  0x6c   :  { %435 = vperm.xlu1 %2107, %v2402_v8   ;;  %867 = vperm.xlu0 %2120, %v2402_v8  }
  0x6d   :  { %4459 = vst [vmem:[#allocation29_spill] sm:$0xff] %v2546_v26 }
  0x70   :  { %2109 = vset.pattern.permute.xlu1 %v2270_v27  ;;  %2123 = vset.pattern.permute.xlu0 %v2271_v28  ;;  %v2550_v27 = vrot.slane %v2368_v3, %v2467_v61  ;;  %v2554_v28 = vrot.slane %v2376_v5, %v2469_v62 }
  0x71   :  { %491 = vperm.xlu1 %2109, %v2402_v8   ;;  %563 = vperm.xlu0 %2123, %v2402_v8  }
  0x72   :  { %4460 = vst [vmem:[#allocation30_spill] sm:$0xff] %v2550_v27  ;;  %4461 = vst [vmem:[#allocation31_spill] sm:$0xff] %v2554_v28 }
  0x75   :  { %2110 = vset.pattern.permute.xlu1 %v2272_v29  ;;  %2126 = vset.pattern.permute.xlu0 %v2273_v30  ;;  %v2290_v29 = vmov 61  }
  0x76   :  { %507 = vperm.xlu1 %2110, %v2402_v8   ;;  %779 = vperm.xlu0 %2126, %v2402_v8  }
  0x7a   :  { %2112 = vset.pattern.permute.xlu1 %v2274_v31  ;;  %2129 = vset.pattern.permute.xlu0 %v2277_v34  ;;  %v2561_v31 = vrot.slane %v2366_v2, %v2469_v62  ;;  %v2583_v2 = vrot.slane %v2368_v3, %v2469_v62 }
  0x7b   :  { %579 = vperm.xlu1 %2112, %v2402_v8   ;;  %1005 = vperm.xlu0 %2129, %v2402_v8  }
  0x7c   :  { %4462 = vst [vmem:[#allocation32_spill] sm:$0xff] %v2561_v31  ;;  %4466 = vst [vmem:[#allocation36_spill] sm:$0xff] %v2583_v2 }
  0x7f   :  { %2113 = vset.pattern.permute.xlu1 %v2275_v32  ;;  %2130 = vset.pattern.permute.xlu0 %v2279_v36  ;;  %v2565_v32 = vrot.slane %v2374_v4, %v2469_v62 }
  0x80   :  { %619 = vperm.xlu1 %2113, %v2402_v8   ;;  %1087 = vperm.xlu0 %2130, %v2402_v8  }
  0x81   :  { %4463 = vst [vmem:[#allocation33_spill] sm:$0xff] %v2565_v32 }
  0x84   :  { %2115 = vset.pattern.permute.xlu1 %v2276_v33  ;;  %2133 = vset.pattern.permute.xlu0 %v2287_v53  ;;  %v2569_v33 = vrot.slane %v2384_v7, %v2469_v62 }
  0x85   :  { %691 = vperm.xlu1 %2115, %v2402_v8  }
  0x86   :  { %4464 = vst [vmem:[#allocation34_spill] sm:$0xff] %v2569_v33 }
  0x89   :  { %2116 = vset.pattern.permute.xlu1 %v2278_v35  ;;  %v2579_v35 = vrot.slane %v2382_v6, %v2469_v62 }
  0x8a   :  { %723 = vperm.xlu1 %2116, %v2402_v8  }
  0x8b   :  { %4465 = vst [vmem:[#allocation35_spill] sm:$0xff] %v2579_v35 }
  0x8e   :  { %2118 = vset.pattern.permute.xlu1 %v2280_v37 }
  0x8f   :  { %795 = vperm.xlu1 %2118, %v2402_v8  }
  0x93   :  { %2119 = vset.pattern.permute.xlu1 %v2281_v38 }
  0x94   :  { %835 = vperm.xlu1 %2119, %v2402_v8  }
  0x98   :  { %2121 = vset.pattern.permute.xlu1 %v2282_v39 }
  0x99   :  { %907 = vperm.xlu1 %2121, %v2402_v8   ;;  %v2437_v40 = vpop.permute.xlu1 %53  ;;  %v2439_v41 = vpop.permute.xlu0 %49 }
  0x9d   :  { %2122 = vset.pattern.permute.xlu1 %v2283_v42  ;;  %v2442_v43 = vpop.permute.xlu1 %55  ;;  %v52_v44 = vpop.permute.xlu0 %51 }
  0x9e   :  { %939 = vperm.xlu1 %2122, %v2402_v8   ;;  %v66_v19 = vsel %vm63_vm0, %v2437_v40, %v2442_v43  ;;  %v68_v25 = vsel %vm63_vm0, %v2439_v41, %v52_v44  ;;  %v67_v30 = vsel %vm63_vm0, %v52_v44, %v2437_v40 }
  0x9f   :  { %v2572_v5 = vrot.slane %v66_v19, %v2458_v57  ;;  %v2575_v34 = vrot.slane %v66_v19, %v2465_v60  ;;  %v2586_v4 = vrot.slane %v66_v19, %v2467_v61  ;;  %v2589_v7 = vrot.slane %v66_v19, %v2469_v62 }
  0xa0   :  { %v2592_v36 = vrot.slane %v68_v25, %v2458_v57  ;;  %v2604_v39 = vrot.slane %v68_v25, %v2465_v60  ;;  %v2618_v44 = vrot.slane %v68_v25, %v2467_v61  ;;  %v2627_v49 = vrot.slane %v67_v30, %v2469_v62 }
  0xa1   :  { %v2445_v47 = vpop.permute.xlu1 %59  ;;  %v2447_v48 = vpop.permute.xlu0 %57 }
  0xa2   :  { %2124 = vset.pattern.permute.xlu1 %v2284_v45  ;;  %v69_v37 = vsel %vm63_vm0, %v2445_v47, %v2439_v41  ;;  %v64_v40 = vsel %vm63_vm0, %v2447_v48, %v2445_v47  ;;  %v65_v42 = vsel %vm63_vm0, %v2442_v43, %v2447_v48  ;;  %v2615_v41 = vrot.slane %v67_v30, %v2465_v60 }
  0xa3   :  { %635 = vperm.xlu1 %2124, %v2402_v8   ;;  %v2621_v45 = vrot.slane %v67_v30, %v2467_v61  ;;  %v2630_v47 = vrot.slane %v69_v37, %v2458_v57  ;;  %v2633_v43 = vrot.slane %v69_v37, %v2465_v60  ;;  %v2636_v48 = vrot.slane %v69_v37, %v2467_v61 }
  0xa4   :  { %v2642_v53 = vrot.slane %v65_v42, %v2458_v57  ;;  %v2645_v54 = vrot.slane %v64_v40, %v2458_v57  ;;  %v2655_v19 = vrot.slane %v64_v40, %v2465_v60  ;;  %v2670_v35 = vrot.slane %v65_v42, %v2467_v61 }
  0xa5   :  { %v2451_v51 = vpop.permute.xlu1 %72  ;;  %v2453_v52 = vpop.permute.xlu0 %70  ;;  %v2673_v33 = vrot.slane %v64_v40, %v2467_v61  ;;  %v2676_v32 = vrot.slane %v65_v42, %v2469_v62  ;;  %v2679_v31 = vrot.slane %v64_v40, %v2469_v62 }
  0xa7   :  { %2125 = vset.pattern.permute.xlu1 %v2285_v46  ;;  %v2624_v46 = vrot.slane %v68_v25, %v2469_v62  ;;  %4467 = vst [vmem:[#allocation37_spill] sm:$0xff] %v2673_v33  ;;  %4468 = vst [vmem:[#allocation38_spill] sm:$0xff] %v2676_v32 }
  0xa8   :  { %707 = vperm.xlu1 %2125, %v2402_v8  }
  0xa9   :  { %v2460_v58 = vpop.permute.xlu1 %76  ;;  %v2462_v59 = vpop.permute.xlu0 %74 }
  0xaa   :  { %v85_v25 = vsel %vm82_vm1, %v2462_v59, %v2460_v58 }
  0xab   :  { %v2731_v14 = vrot.slane %v85_v25, %v2467_v61  ;;  %v2737_v10 = vrot.slane %v85_v25, %v2469_v62 }
  0xac   :  { %2127 = vset.pattern.permute.xlu1 %v2286_v50  ;;  %v2639_v50 = vrot.slane %v69_v37, %v2469_v62 }
  0xad   :  { %851 = vperm.xlu1 %2127, %v2402_v8   ;;  %v81_v20 = vpop.permute.xlu1 %80  ;;  %v79_v21 = vpop.permute.xlu0 %78  ;;  %4478 = vst [vmem:[#allocation48_spill] sm:$0xff] %v2731_v14  ;;  %4480 = vst [vmem:[#allocation50_spill] sm:$0xff] %v2737_v10 }
  0xb1   :  { %2128 = vset.pattern.permute.xlu1 %v2288_v56  ;;  %v87_v56 = vsel %vm82_vm1, %v2453_v52, %v2451_v51 }
  0xb2   :  { %923 = vperm.xlu1 %2128, %v2402_v8   ;;  %v2682_v28 = vrot.slane %v87_v56, %v2458_v57  ;;  %v2691_v2 = vrot.slane %v87_v56, %v2469_v62 }
  0xb4   :  { %4469 = vst [vmem:[#allocation39_spill] sm:$0xff] %v2682_v28  ;;  %4472 = vst [vmem:[#allocation42_spill] sm:$0xff] %v2691_v2  ;;  %v2703_v28 = vrot.slane %v85_v25, %v2465_v60  ;;  %v83_v2 = vsel %vm82_vm1, %v79_v21, %v81_v20 }
  0xb6   :  { %2131 = vset.pattern.permute.xlu1 %v2289_v1  ;;  %v2652_v1 = vrot.slane %v65_v42, %v2465_v60  ;;  %v2697_v42 = vrot.slane %v85_v25, %v2458_v57  ;;  %4476 = vst [vmem:[#allocation46_spill] sm:$0xff] %v2703_v28 }
  0xb7   :  { %1103 = vperm.xlu1 %2131, %v2402_v8   ;;  %v2519_v8 = vrot.slane %v2368_v3, %v2465_v60  ;;  %v2601_v3 = vrot.slane %v67_v30, %v2458_v57 }
  0xb8   :  { %4474 = vst [vmem:[#allocation44_spill] sm:$0xff] %v2697_v42 }
  0xb9   :  { %4454 = vst [vmem:[#allocation24_spill] sm:$0xff] %v2519_v8 }
  0xbb   :  { %2132 = vset.pattern.permute.xlu1 %v2290_v29  ;;  %v86_v29 = vsel %vm82_vm1, %v2451_v51, %v2462_v59  ;;  %v2685_v51 = vrot.slane %v87_v56, %v2465_v60  ;;  %v2688_v59 = vrot.slane %v87_v56, %v2467_v61  ;;  %v88_v56 = vsel %vm82_vm1, %v81_v20, %v2453_v52 }
  0xbc   :  { %v2694_v26 = vrot.slane %v86_v29, %v2458_v57  ;;  %v2700_v40 = vrot.slane %v86_v29, %v2465_v60  ;;  %v2734_v13 = vrot.slane %v86_v29, %v2469_v62 }
  0xbd   :  { %4470 = vst [vmem:[#allocation40_spill] sm:$0xff] %v2685_v51  ;;  %4471 = vst [vmem:[#allocation41_spill] sm:$0xff] %v2688_v59  ;;  %v2706_v51 = vrot.slane %v86_v29, %v2467_v61  ;;  %v2753_v29 = vrot.slane %v88_v56, %v2469_v62 }
  0xbe   :  { %v132_v6 = vpop.permute.xlu1 %131  ;;  %v2598_v38 = vpop.permute.xlu0 %115  ;;  %4473 = vst [vmem:[#allocation43_spill] sm:$0xff] %v2694_v26  ;;  %4475 = vst [vmem:[#allocation45_spill] sm:$0xff] %v2700_v40  ;;  %v84_v26 = vsel %vm82_vm1, %v2460_v58, %v79_v21 }
  0xbf   :  { %4477 = vst [vmem:[#allocation47_spill] sm:$0xff] %v2706_v51  ;;  %v134_v42 = vmul.f32 %v132_v6, %v2630_v47  ;;  %v135_v59 = vmul.f32 %v132_v6, %v2592_v36  ;;  %v136_v40 = vmul.f32 %v132_v6, %v2601_v3  ;;  %v137_v28 = vmul.f32 %v132_v6, %v2572_v5 }
  0xc0   :  { %v138_v58 = vmul.f32 %v132_v6, %v2642_v53  ;;  %v139_v21 = vmul.f32 %v132_v6, %v2645_v54  ;;  %4479 = vst [vmem:[#allocation49_spill] sm:$0xff] %v2734_v13  ;;  %v2740_v6 = vrot.slane %v88_v56, %v2458_v57  ;;  %4484 = vst [vmem:[#allocation54_spill] sm:$0xff] %v2753_v29 }
  0xc1   :  { %v2762_v25 = vrot.slane %v84_v26, %v2465_v60 }
  0xc2   :  { %4481 = vst [vmem:[#allocation51_spill] sm:$0xff] %v2740_v6 }
  0xc3   :  { %v2665_v30 = vpop.permute.xlu1 %147  ;;  %v2667_v37 = vpop.permute.xlu0 %187  ;;  %4487 = vst [vmem:[#allocation57_spill] sm:$0xff] %v2762_v25 }
  0xc4   :  { %v151_v29 = vmul.f32 %v2665_v30, %v2592_v36  ;;  %v153_v10 = vmul.f32 %v2665_v30, %v2572_v5 }
  0xc8   :  { %v204_v51 = vpop.permute.xlu1 %203  ;;  %v2720_v24 = vpop.permute.xlu0 %259 }
  0xc9   :  { %v206_v52 = vmul.f32 %v204_v51, %v2633_v43  ;;  %v207_v23 = vmul.f32 %v204_v51, %v2604_v39  ;;  %v208_v20 = vmul.f32 %v204_v51, %v2615_v41  ;;  %v209_v55 = vmul.f32 %v204_v51, %v2575_v34 }
  0xca   :  { %v210_v22 = vmul.f32 %v204_v51, %v2652_v1  ;;  %v211_v18 = vmul.f32 %v204_v51, %v2655_v19  ;;  %v2743_v51 = vrot.slane %v88_v56, %v2465_v60 }
  0xcb   :  { %v212_v27 = vadd.f32 %v206_v52, %v134_v42  ;;  %v213_v17 = vadd.f32 %v207_v23, %v135_v59  ;;  %v214_v16 = vadd.f32 %v208_v20, %v136_v40  ;;  %v215_v15 = vadd.f32 %v209_v55, %v137_v28 }
  0xcc   :  { %v216_v8 = vadd.f32 %v210_v22, %v138_v58  ;;  %v217_v11 = vadd.f32 %v211_v18, %v139_v21  ;;  %4482 = vst [vmem:[#allocation52_spill] sm:$0xff] %v2743_v51  ;;  %v2746_v23 = vrot.slane %v88_v56, %v2467_v61  ;;  %v2756_v18 = vrot.slane %v84_v26, %v2458_v57 }
  0xcd   :  { %v2748_v55 = vpop.permute.xlu1 %219  ;;  %v2750_v28 = vpop.permute.xlu0 %331  ;;  %v2759_v22 = vrot.slane %v83_v2, %v2458_v57  ;;  %v2765_v59 = vrot.slane %v83_v2, %v2465_v60  ;;  %v2768_v42 = vrot.slane %v84_v26, %v2467_v61  ;;  %v2771_v40 = vrot.slane %v83_v2, %v2467_v61 }
  0xce   :  { %4483 = vst [vmem:[#allocation53_spill] sm:$0xff] %v2746_v23  ;;  %4485 = vst [vmem:[#allocation55_spill] sm:$0xff] %v2756_v18  ;;  %v2774_v56 = vrot.slane %v84_v26, %v2469_v62  ;;  %v2777_v52 = vrot.slane %v83_v2, %v2469_v62  ;;  %v118_v20 = vmul.f32 %v2598_v38, %v2630_v47 }
  0xcf   :  { %4486 = vst [vmem:[#allocation56_spill] sm:$0xff] %v2759_v22  ;;  %4488 = vst [vmem:[#allocation58_spill] sm:$0xff] %v2765_v59  ;;  %v119_v58 = vmul.f32 %v2598_v38, %v2592_v36  ;;  %v120_v21 = vmul.f32 %v2598_v38, %v2601_v3  ;;  %v121_v57 = vmul.f32 %v2598_v38, %v2572_v5 }
  0xd0   :  { %4489 = vst [vmem:[#allocation59_spill] sm:$0xff] %v2768_v42  ;;  %4490 = vst [vmem:[#allocation60_spill] sm:$0xff] %v2771_v40  ;;  %v122_v61 = vmul.f32 %v2598_v38, %v2642_v53  ;;  %v190_v26 = vmul.f32 %v2667_v37, %v2633_v43  ;;  %v191_v2 = vmul.f32 %v2667_v37, %v2604_v39 }
  0xd1   :  { %4491 = vst [vmem:[#allocation61_spill] sm:$0xff] %v2774_v56  ;;  %4492 = vst [vmem:[#allocation62_spill] sm:$0xff] %v2777_v52  ;;  %v123_v62 = vmul.f32 %v2598_v38, %v2645_v54  ;;  %v150_v60 = vmul.f32 %v2665_v30, %v2630_v47  ;;  %v152_v56 = vmul.f32 %v2665_v30, %v2601_v3 }
  0xd2   :  { %v276_v13 = vpop.permute.xlu1 %275  ;;  %v2801_v52 = vpop.permute.xlu0 %403  ;;  %v2807_v23 = vmul.f32 %v2665_v30, %v2642_v53  ;;  %v192_v38 = vmul.f32 %v2667_v37, %v2615_v41  ;;  %v193_v47 = vmul.f32 %v2667_v37, %v2575_v34  ;;  %v194_v36 = vmul.f32 %v2667_v37, %v2652_v1 }
  0xd3   :  { %v195_v3 = vmul.f32 %v2667_v37, %v2655_v19  ;;  %v278_v6 = vmul.f32 %v276_v13, %v2636_v48  ;;  %v279_v5 = vmul.f32 %v276_v13, %v2618_v44  ;;  %v196_v18 = vadd.f32 %v190_v26, %v118_v20 }
  0xd4   :  { %4493 = vst [vmem:[#allocation63_spill] sm:$0xff] %v2807_v23  ;;  %v197_v22 = vadd.f32 %v191_v2, %v119_v58  ;;  %v280_v53 = vmul.f32 %v276_v13, %v2621_v45  ;;  %v281_v42 = vmul.f32 %v276_v13, %v2586_v4  ;;  %v282_v40 = vmul.f32 %v276_v13, %v2670_v35 }
  0xd5   :  { %v283_v51 = vmul.f32 %v276_v13, %v2673_v33  ;;  %v284_v14 = vadd.f32 %v278_v6, %v212_v27  ;;  %v285_v25 = vadd.f32 %v279_v5, %v213_v17  ;;  %v262_v59 = vmul.f32 %v2720_v24, %v2636_v48 }
  0xd6   :  { %v263_v37 = vmul.f32 %v2720_v24, %v2618_v44  ;;  %v286_v23 = vadd.f32 %v280_v53, %v214_v16  ;;  %v287_v9 = vadd.f32 %v281_v42, %v215_v15  ;;  %v264_v26 = vmul.f32 %v2720_v24, %v2621_v45 }
  0xd7   :  { %v2827_v20 = vpop.permute.xlu1 %291  ;;  %v2829_v58 = vpop.permute.xlu0 %475  ;;  %v265_v13 = vmul.f32 %v2720_v24, %v2586_v4  ;;  %v288_v27 = vadd.f32 %v282_v40, %v216_v8  ;;  %v289_v17 = vadd.f32 %v283_v51, %v217_v11  ;;  %v198_v6 = vadd.f32 %v192_v38, %v120_v21 }
  0xd8   :  { %4494 = vst [vmem:[#allocation64_spill] sm:$0xff] %v2829_v58  ;;  %v199_v2 = vadd.f32 %v193_v47, %v121_v57  ;;  %v266_v5 = vmul.f32 %v2720_v24, %v2670_v35  ;;  %v267_v15 = vmul.f32 %v2720_v24, %v2673_v33  ;;  %v222_v16 = vmul.f32 %v2748_v55, %v2633_v43 }
  0xd9   :  { %v223_v42 = vmul.f32 %v2748_v55, %v2604_v39  ;;  %v224_v53 = vmul.f32 %v2748_v55, %v2615_v41  ;;  %v225_v11 = vmul.f32 %v2748_v55, %v2575_v34  ;;  %v155_v57 = vmul.f32 %v2665_v30, %v2645_v54 }
  0xda   :  { %v200_v8 = vadd.f32 %v194_v36, %v122_v61  ;;  %v201_v51 = vadd.f32 %v195_v3, %v123_v62  ;;  %v268_v40 = vadd.f32 %v262_v59, %v196_v18  ;;  %v269_v21 = vadd.f32 %v263_v37, %v197_v22 }
  0xdb   :  { %v270_v24 = vadd.f32 %v264_v26, %v198_v6  ;;  %v271_v38 = vadd.f32 %v265_v13, %v199_v2  ;;  %v334_v43 = vmul.f32 %v2750_v28, %v2639_v50  ;;  %v226_v41 = vmul.f32 %v2748_v55, %v2652_v1 }
  0xdc   :  { %v348_v47 = vpop.permute.xlu1 %347  ;;  %v272_v39 = vadd.f32 %v266_v5, %v200_v8  ;;  %v273_v58 = vadd.f32 %v267_v15, %v201_v51  ;;  %v227_v34 = vmul.f32 %v2748_v55, %v2655_v19  ;;  %v2855_v33 = vpop.permute.xlu0 %547  ;;  %v228_v61 = vadd.f32 %v222_v16, %v150_v60  ;;  %v4496_v15 = vld [vmem:[#allocation16_spill] sm:$0xff]  ;;  %v4498_v51 = vld [vmem:[#allocation18_spill] sm:$0xff] }
  0xdd   :  { %v229_v62 = vadd.f32 %v223_v42, %v151_v29  ;;  %v230_v54 = vadd.f32 %v224_v53, %v152_v56  ;;  %v2857_v30 = vadd.f32 %v225_v11, %v153_v10  ;;  %v335_v18 = vmul.f32 %v2750_v28, %v2624_v46  ;;  %v4497_v11 = vld [vmem:[#allocation17_spill] sm:$0xff] }
  0xde   :  { %v336_v22 = vmul.f32 %v2750_v28, %v2627_v49  ;;  %v337_v59 = vmul.f32 %v2750_v28, %v2589_v7  ;;  %v338_v1 = vmul.f32 %v2750_v28, %v2676_v32  ;;  %v339_v19 = vmul.f32 %v2750_v28, %v2679_v31 }
  0xdf   :  { %v340_v60 = vadd.f32 %v334_v43, %v268_v40  ;;  %v350_v55 = vmul.f32 %v348_v47, %v2639_v50  ;;  %v351_v10 = vmul.f32 %v348_v47, %v2624_v46  ;;  %v406_v29 = vmul.f32 %v2801_v52, %v2494_v12 }
  0xe0   :  { %v407_v56 = vmul.f32 %v2801_v52, %v2473_v63  ;;  %v352_v36 = vmul.f32 %v348_v47, %v2627_v49  ;;  %v353_v3 = vmul.f32 %v348_v47, %v2589_v7  ;;  %v354_v28 = vmul.f32 %v348_v47, %v2676_v32 }
  0xe1   :  { %v2877_v37 = vpop.permute.xlu1 %363  ;;  %v2879_v26 = vpop.permute.xlu0 %651  ;;  %v355_v13 = vmul.f32 %v348_v47, %v2679_v31  ;;  %v356_v6 = vadd.f32 %v350_v55, %v284_v14  ;;  %v357_v2 = vadd.f32 %v351_v10, %v285_v25  ;;  %v408_v5 = vmul.f32 %v2801_v52, %v2477_v0 }
  0xe2   :  { %4495 = vst [vmem:[#allocation65_spill] sm:$0xff] %v2879_v26  ;;  %v409_v16 = vmul.f32 %v2801_v52, %v4496_v15  ;;  %v358_v42 = vadd.f32 %v352_v36, %v286_v23  ;;  %v359_v53 = vadd.f32 %v353_v3, %v287_v9  ;;  %v410_v8 = vmul.f32 %v2801_v52, %v4497_v11 }
  0xe3   :  { %v411_v40 = vmul.f32 %v2801_v52, %v4498_v51  ;;  %v360_v43 = vadd.f32 %v354_v28, %v288_v27  ;;  %v361_v26 = vadd.f32 %v355_v13, %v289_v17  ;;  %v341_v32 = vadd.f32 %v335_v18, %v269_v21  ;;  %v4500_v52 = vld [vmem:[#allocation63_spill] sm:$0xff] }
  0xe4   :  { %v342_v47 = vadd.f32 %v336_v22, %v270_v24  ;;  %v343_v14 = vadd.f32 %v337_v59, %v271_v38  ;;  %v294_v25 = vmul.f32 %v2827_v20, %v2636_v48  ;;  %v344_v55 = vadd.f32 %v338_v1, %v272_v39 }
  0xe5   :  { %v345_v10 = vadd.f32 %v339_v19, %v273_v58  ;;  %v295_v23 = vmul.f32 %v2827_v20, %v2618_v44  ;;  %v296_v9 = vmul.f32 %v2827_v20, %v2621_v45  ;;  %v232_v27 = vadd.f32 %v226_v41, %v4500_v52  ;;  %v4501_v58 = vld [vmem:[#allocation37_spill] sm:$0xff]  ;;  %v4502_v41 = vld [vmem:[#allocation24_spill] sm:$0xff]  ;;  %v4504_v19 = vld [vmem:[#allocation19_spill] sm:$0xff] }
  0xe6   :  { %v420_v36 = vpop.permute.xlu1 %419  ;;  %v2897_v3 = vpop.permute.xlu0 %763  ;;  %v233_v17 = vadd.f32 %v227_v34, %v155_v57  ;;  %v412_v21 = vadd.f32 %v406_v29, %v340_v60  ;;  %v413_v24 = vadd.f32 %v407_v56, %v341_v32  ;;  %v414_v38 = vadd.f32 %v408_v5, %v342_v47  ;;  %v4503_v34 = vld [vmem:[#allocation64_spill] sm:$0xff]  ;;  %v4506_v56 = vld [vmem:[#allocation21_spill] sm:$0xff]  ;;  %v4509_v52 = vld [vmem:[#allocation22_spill] sm:$0xff] }
  0xe7   :  { %4499 = vst [vmem:[#allocation16_spill] sm:$0xff] %v2897_v3  ;;  %v415_v18 = vadd.f32 %v409_v16, %v343_v14  ;;  %v2900_v22 = vadd.f32 %v410_v8, %v344_v55  ;;  %v2902_v48 = vadd.f32 %v411_v40, %v345_v10  ;;  %v297_v44 = vmul.f32 %v2827_v20, %v2586_v4  ;;  %v4505_v29 = vld [vmem:[#allocation20_spill] sm:$0xff]  ;;  %v4510_v3 = vld [vmem:[#allocation23_spill] sm:$0xff] }
  0xe8   :  { %v298_v45 = vmul.f32 %v2827_v20, %v2670_v35  ;;  %v299_v39 = vmul.f32 %v2827_v20, %v4501_v58  ;;  %v2910_v59 = vadd.f32 %v294_v25, %v228_v61  ;;  %v2912_v57 = vadd.f32 %v295_v23, %v229_v62 }
  0xe9   :  { %v2914_v32 = vadd.f32 %v296_v9, %v230_v54  ;;  %v478_v1 = vmul.f32 %v4503_v34, %v4502_v41  ;;  %v479_v60 = vmul.f32 %v4503_v34, %v4504_v19  ;;  %v480_v4 = vmul.f32 %v4503_v34, %v4505_v29 }
  0xea   :  { %v481_v35 = vmul.f32 %v4503_v34, %v4506_v56  ;;  %v422_v20 = vmul.f32 %v420_v36, %v2494_v12  ;;  %v423_v61 = vmul.f32 %v420_v36, %v2473_v63  ;;  %v424_v54 = vmul.f32 %v420_v36, %v2477_v0 }
  0xeb   :  { %v2926_v62 = vpop.permute.xlu1 %435  ;;  %v425_v28 = vmul.f32 %v420_v36, %v4496_v15  ;;  %v426_v13 = vmul.f32 %v420_v36, %v4497_v11  ;;  %v427_v5 = vmul.f32 %v420_v36, %v4498_v51  ;;  %v2932_v16 = vpop.permute.xlu0 %867  ;;  %v2935_v8 = vadd.f32 %v297_v44, %v2857_v30 }
  0xec   :  { %4507 = vst [vmem:[#allocation63_spill] sm:$0xff] %v2932_v16  ;;  %v2937_v40 = vadd.f32 %v298_v45, %v232_v27  ;;  %v428_v47 = vadd.f32 %v422_v20, %v356_v6  ;;  %v429_v14 = vadd.f32 %v423_v61, %v357_v2  ;;  %v430_v25 = vadd.f32 %v424_v54, %v358_v42  ;;  %v4511_v27 = vld [vmem:[#allocation30_spill] sm:$0xff]  ;;  %v4514_v45 = vld [vmem:[#allocation27_spill] sm:$0xff]  ;;  %v4515_v20 = vld [vmem:[#allocation28_spill] sm:$0xff] }
  0xed   :  { %v431_v55 = vadd.f32 %v425_v28, %v359_v53  ;;  %v432_v10 = vadd.f32 %v426_v13, %v360_v43  ;;  %v433_v23 = vadd.f32 %v427_v5, %v361_v26  ;;  %v2939_v9 = vadd.f32 %v299_v39, %v233_v17  ;;  %v4512_v53 = vld [vmem:[#allocation25_spill] sm:$0xff]  ;;  %v4513_v43 = vld [vmem:[#allocation26_spill] sm:$0xff] }
  0xee   :  { %v482_v58 = vmul.f32 %v4503_v34, %v4509_v52  ;;  %v483_v36 = vmul.f32 %v4503_v34, %v4510_v3  ;;  %v484_v16 = vadd.f32 %v478_v1, %v412_v21  ;;  %v485_v51 = vadd.f32 %v479_v60, %v413_v24 }
  0xef   :  { %4508 = vst [vmem:[#allocation37_spill] sm:$0xff] %v2939_v9  ;;  %v486_v30 = vadd.f32 %v480_v4, %v414_v38  ;;  %v487_v44 = vadd.f32 %v481_v35, %v415_v18  ;;  %v550_v6 = vmul.f32 %v2855_v33, %v4511_v27  ;;  %v551_v26 = vmul.f32 %v2855_v33, %v4512_v53 }
  0xf0   :  { %v492_v2 = vpop.permute.xlu1 %491  ;;  %v564_v42 = vpop.permute.xlu0 %563  ;;  %v552_v17 = vmul.f32 %v2855_v33, %v4513_v43  ;;  %v553_v39 = vmul.f32 %v2855_v33, %v4514_v45  ;;  %v554_v21 = vmul.f32 %v2855_v33, %v4515_v20 }
  0xf1   :  { %v494_v24 = vmul.f32 %v492_v2, %v4502_v41  ;;  %v495_v38 = vmul.f32 %v492_v2, %v4504_v19  ;;  %v496_v18 = vmul.f32 %v492_v2, %v4505_v29  ;;  %v497_v34 = vmul.f32 %v492_v2, %v4506_v56 }
  0xf2   :  { %v498_v1 = vmul.f32 %v492_v2, %v4509_v52  ;;  %v499_v60 = vmul.f32 %v492_v2, %v4510_v3  ;;  %v566_v4 = vmul.f32 %v564_v42, %v4511_v27  ;;  %v567_v35 = vmul.f32 %v564_v42, %v4512_v53  ;;  %v4516_v52 = vld [vmem:[#allocation29_spill] sm:$0xff] }
  0xf3   :  { %v501_v61 = vadd.f32 %v495_v38, %v429_v14  ;;  %v502_v54 = vadd.f32 %v496_v18, %v430_v25  ;;  %v503_v28 = vadd.f32 %v497_v34, %v431_v55  ;;  %v500_v13 = vadd.f32 %v494_v24, %v428_v47  ;;  %v4530_v34 = vld [vmem:[#allocation32_spill] sm:$0xff] }
  0xf4   :  { %v504_v5 = vadd.f32 %v498_v1, %v432_v10  ;;  %v505_v41 = vadd.f32 %v499_v60, %v433_v23  ;;  %v568_v19 = vmul.f32 %v564_v42, %v4513_v43  ;;  %v569_v29 = vmul.f32 %v564_v42, %v4514_v45  ;;  %v4531_v60 = vld [vmem:[#allocation33_spill] sm:$0xff] }
  0xf5   :  { %v508_v9 = vpop.permute.xlu1 %507  ;;  %v570_v56 = vmul.f32 %v564_v42, %v4515_v20  ;;  %v571_v11 = vmul.f32 %v564_v42, %v4516_v52  ;;  %v2967_v2 = vadd.f32 %v566_v4, %v500_v13  ;;  %v2969_v3 = vadd.f32 %v567_v35, %v501_v61  ;;  %v4533_v35 = vld [vmem:[#allocation35_spill] sm:$0xff] }
  0xf6   :  { %v555_v14 = vmul.f32 %v2855_v33, %v4516_v52  ;;  %v366_v47 = vmul.f32 %v2877_v37, %v2639_v50  ;;  %v2975_v25 = vadd.f32 %v568_v19, %v502_v54  ;;  %v2977_v55 = vadd.f32 %v569_v29, %v503_v28  ;;  %v4534_v28 = vld [vmem:[#allocation24_spill] sm:$0xff] }
  0xf7   :  { %4517 = vst [vmem:[#allocation64_spill] sm:$0xff] %v2967_v2  ;;  %4518 = vst [vmem:[#allocation30_spill] sm:$0xff] %v2969_v3  ;;  %v367_v10 = vmul.f32 %v2877_v37, %v2624_v46  ;;  %v368_v23 = vmul.f32 %v2877_v37, %v2627_v49  ;;  %v2983_v42 = vadd.f32 %v570_v56, %v504_v5  ;;  %v4523_v49 = vld [vmem:[#allocation38_spill] sm:$0xff]  ;;  %v4552_v3 = vld [vmem:[#allocation60_spill] sm:$0xff] }
  0xf8   :  { %4519 = vst [vmem:[#allocation25_spill] sm:$0xff] %v2975_v25  ;;  %4520 = vst [vmem:[#allocation26_spill] sm:$0xff] %v2977_v55  ;;  %v2985_v24 = vadd.f32 %v571_v11, %v505_v41  ;;  %v488_v38 = vadd.f32 %v482_v58, %v2900_v22  ;;  %v489_v33 = vadd.f32 %v483_v36, %v2902_v48 }
  0xf9   :  { %4521 = vst [vmem:[#allocation27_spill] sm:$0xff] %v2983_v42  ;;  %v2989_v18 = vadd.f32 %v550_v6, %v484_v16  ;;  %v369_v50 = vmul.f32 %v2877_v37, %v2589_v7  ;;  %v2993_v19 = vadd.f32 %v551_v26, %v485_v51  ;;  %v2995_v29 = vadd.f32 %v552_v17, %v486_v30  ;;  %v4525_v6 = vld [vmem:[#allocation65_spill] sm:$0xff]  ;;  %v4526_v17 = vld [vmem:[#allocation31_spill] sm:$0xff] }
  0xfa   :  { %4522 = vst [vmem:[#allocation28_spill] sm:$0xff] %v2985_v24  ;;  %v2997_v46 = vadd.f32 %v553_v39, %v487_v44  ;;  %v370_v56 = vmul.f32 %v2877_v37, %v4523_v49  ;;  %v580_v11 = vpop.permute.xlu1 %579  ;;  %v3001_v41 = vadd.f32 %v554_v21, %v488_v38  ;;  %v3003_v22 = vadd.f32 %v555_v14, %v489_v33  ;;  %v4524_v44 = vld [vmem:[#allocation36_spill] sm:$0xff]  ;;  %v4529_v39 = vld [vmem:[#allocation37_spill] sm:$0xff] }
  0xfb   :  { %v371_v48 = vmul.f32 %v2877_v37, %v2679_v31  ;;  %v372_v16 = vadd.f32 %v366_v47, %v2910_v59  ;;  %v373_v7 = vadd.f32 %v367_v10, %v2912_v57  ;;  %v374_v51 = vadd.f32 %v368_v23, %v2914_v32  ;;  %v4527_v57 = vld [vmem:[#allocation17_spill] sm:$0xff]  ;;  %v4528_v32 = vld [vmem:[#allocation18_spill] sm:$0xff]  ;;  %v4535_v14 = vld [vmem:[#allocation20_spill] sm:$0xff] }
  0xfc   :  { %v438_v58 = vmul.f32 %v2926_v62, %v2494_v12  ;;  %v439_v36 = vmul.f32 %v2926_v62, %v2473_v63  ;;  %v375_v30 = vadd.f32 %v369_v50, %v2935_v8  ;;  %v654_v26 = vmul.f32 %v4525_v6, %v4524_v44  ;;  %v4536_v10 = vld [vmem:[#allocation46_spill] sm:$0xff]  ;;  %v4537_v23 = vld [vmem:[#allocation16_spill] sm:$0xff] }
  0xfd   :  { %v3019_v31 = vmul.f32 %v4525_v6, %v4526_v17  ;;  %v440_v37 = vmul.f32 %v2926_v62, %v2477_v0  ;;  %v376_v59 = vadd.f32 %v370_v56, %v2937_v40  ;;  %v441_v12 = vmul.f32 %v2926_v62, %v4496_v15  ;;  %v4532_v40 = vld [vmem:[#allocation34_spill] sm:$0xff]  ;;  %v4538_v33 = vld [vmem:[#allocation40_spill] sm:$0xff] }
  0xfe   :  { %v442_v63 = vmul.f32 %v2926_v62, %v4527_v57  ;;  %v443_v8 = vmul.f32 %v2926_v62, %v4528_v32  ;;  %v377_v21 = vadd.f32 %v371_v48, %v4529_v39  ;;  %v3033_v1 = vmul.f32 %v4525_v6, %v4530_v34  ;;  %v4542_v32 = vld [vmem:[#allocation23_spill] sm:$0xff] }
  0xff   :  { %v3037_v0 = vmul.f32 %v4525_v6, %v4531_v60  ;;  %v3041_v4 = vmul.f32 %v4525_v6, %v4532_v40  ;;  %v620_v15 = vpop.permute.xlu1 %619  ;;  %v3045_v61 = vmul.f32 %v4525_v6, %v4533_v35  ;;  %v444_v62 = vadd.f32 %v438_v58, %v372_v16  ;;  %v4539_v16 = vld [vmem:[#allocation19_spill] sm:$0xff]  ;;  %v4540_v58 = vld [vmem:[#allocation21_spill] sm:$0xff] }
 0x100   :  { %v445_v54 = vadd.f32 %v439_v36, %v373_v7  ;;  %v510_v13 = vmul.f32 %v508_v9, %v4534_v28  ;;  %v446_v5 = vadd.f32 %v440_v37, %v374_v51  ;;  %v512_v47 = vmul.f32 %v508_v9, %v4535_v14  ;;  %v4541_v51 = vld [vmem:[#allocation22_spill] sm:$0xff] }
 0x101   :  { %v3051_v38 = vmul.f32 %v4537_v23, %v4536_v10  ;;  %v3055_v50 = vmul.f32 %v4537_v23, %v4538_v33  ;;  %v447_v49 = vadd.f32 %v441_v12, %v375_v30  ;;  %v448_v56 = vadd.f32 %v442_v63, %v376_v59  ;;  %v4543_v14 = vld [vmem:[#allocation58_spill] sm:$0xff]  ;;  %v4544_v30 = vld [vmem:[#allocation45_spill] sm:$0xff] }
 0x102   :  { %v449_v48 = vadd.f32 %v443_v8, %v377_v21  ;;  %v582_v6 = vmul.f32 %v580_v11, %v4511_v27  ;;  %v511_v7 = vmul.f32 %v508_v9, %v4539_v16  ;;  %v513_v36 = vmul.f32 %v508_v9, %v4540_v58  ;;  %v4545_v63 = vld [vmem:[#allocation41_spill] sm:$0xff]  ;;  %v4546_v8 = vld [vmem:[#allocation63_spill] sm:$0xff] }
 0x103   :  { %v514_v37 = vmul.f32 %v508_v9, %v4541_v51  ;;  %v584_v57 = vmul.f32 %v580_v11, %v4513_v43  ;;  %v515_v39 = vmul.f32 %v508_v9, %v4542_v32  ;;  %v3065_v24 = vmul.f32 %v4537_v23, %v4543_v14  ;;  %v4548_v16 = vld [vmem:[#allocation57_spill] sm:$0xff] }
 0x104   :  { %v692_v28 = vpop.permute.xlu1 %691  ;;  %v3069_v59 = vmul.f32 %v4537_v23, %v4544_v30  ;;  %v516_v27 = vadd.f32 %v510_v13, %v444_v62  ;;  %v583_v12 = vmul.f32 %v580_v11, %v4512_v53  ;;  %v3074_v21 = vmul.f32 %v4546_v8, %v4545_v63  ;;  %v4549_v62 = vld [vmem:[#allocation48_spill] sm:$0xff] }
 0x105   :  { %v3078_v43 = vmul.f32 %v4537_v23, %v4548_v16  ;;  %v518_v9 = vadd.f32 %v512_v47, %v446_v5  ;;  %v585_v58 = vmul.f32 %v580_v11, %v4514_v45  ;;  %v586_v51 = vmul.f32 %v580_v11, %v4515_v20  ;;  %v4551_v13 = vld [vmem:[#allocation52_spill] sm:$0xff]  ;;  %v4554_v45 = vld [vmem:[#allocation47_spill] sm:$0xff] }
 0x106   :  { %4547 = vst [vmem:[#allocation29_spill] sm:$0xff] %v3074_v21  ;;  %v587_v32 = vmul.f32 %v580_v11, %v4516_v52  ;;  %v588_v2 = vadd.f32 %v582_v6, %v516_v27  ;;  %v3085_v53 = vmul.f32 %v4546_v8, %v4549_v62  ;;  %v771_v55 = vmul.f32 %v4537_v23, %v4551_v13  ;;  %v4556_v27 = vld [vmem:[#allocation59_spill] sm:$0xff] }
 0x107   :  { %v590_v42 = vadd.f32 %v584_v57, %v518_v9  ;;  %v520_v25 = vadd.f32 %v514_v37, %v448_v56  ;;  %v3091_v21 = vmul.f32 %v4546_v8, %v4552_v3  ;;  %v517_v5 = vadd.f32 %v511_v7, %v445_v54  ;;  %v4558_v9 = vld [vmem:[#allocation44_spill] sm:$0xff]  ;;  %v4561_v13 = vld [vmem:[#allocation43_spill] sm:$0xff] }
 0x108   :  { %4550 = vst [vmem:[#allocation38_spill] sm:$0xff] %v3085_v53  ;;  %v3095_v20 = vmul.f32 %v4546_v8, %v4554_v45  ;;  %v519_v52 = vadd.f32 %v513_v36, %v447_v49  ;;  %v624_v47 = vmul.f32 %v620_v15, %v4530_v34  ;;  %v622_v6 = vmul.f32 %v620_v15, %v4524_v44  ;;  %v4560_v53 = vld [vmem:[#allocation56_spill] sm:$0xff] }
 0x109   :  { %4553 = vst [vmem:[#allocation65_spill] sm:$0xff] %v3091_v21  ;;  %v724_v11 = vpop.permute.xlu1 %723  ;;  %v626_v57 = vmul.f32 %v620_v15, %v4532_v40  ;;  %v3102_v23 = vmul.f32 %v4546_v8, %v4556_v27  ;;  %v623_v56 = vmul.f32 %v620_v15, %v4526_v17  ;;  %v660_v37 = vadd.f32 %v654_v26, %v588_v2  ;;  %v4559_v21 = vld [vmem:[#allocation39_spill] sm:$0xff] }
 0x10a   :  { %4555 = vst [vmem:[#allocation17_spill] sm:$0xff] %v3095_v20  ;;  %v625_v54 = vmul.f32 %v620_v15, %v4531_v60  ;;  %v592_v7 = vadd.f32 %v586_v51, %v520_v25  ;;  %v696_v20 = vmul.f32 %v692_v28, %v4558_v9  ;;  %v627_v49 = vmul.f32 %v620_v15, %v4533_v35  ;;  %v4562_v27 = vld [vmem:[#allocation55_spill] sm:$0xff] }
 0x10b   :  { %4557 = vst [vmem:[#allocation18_spill] sm:$0xff] %v3102_v23  ;;  %v589_v36 = vadd.f32 %v583_v12, %v517_v5  ;;  %v521_v34 = vadd.f32 %v515_v39, %v449_v48  ;;  %v694_v44 = vmul.f32 %v692_v28, %v4559_v21  ;;  %v698_v40 = vmul.f32 %v692_v28, %v4560_v53  ;;  %v4563_v26 = vld [vmem:[#allocation51_spill] sm:$0xff] }
 0x10c   :  { %v695_v16 = vmul.f32 %v692_v28, %v4561_v13  ;;  %v697_v23 = vmul.f32 %v692_v28, %v4562_v27  ;;  %v630_v17 = vadd.f32 %v624_v47, %v2995_v29  ;;  %v628_v2 = vadd.f32 %v622_v6, %v2989_v18 }
 0x10d   :  { %v632_v25 = vadd.f32 %v626_v57, %v3001_v41  ;;  %v699_v51 = vmul.f32 %v692_v28, %v4563_v26  ;;  %v629_v15 = vadd.f32 %v623_v56, %v2993_v19  ;;  %v631_v48 = vadd.f32 %v625_v54, %v2997_v46  ;;  %v4564_v56 = vld [vmem:[#allocation53_spill] sm:$0xff]  ;;  %v780_v54 = vpop.permute.xlu0 %779 }
 0x10e   :  { %v796_v60 = vpop.permute.xlu1 %795  ;;  %v591_v39 = vadd.f32 %v585_v58, %v519_v52  ;;  %v593_v12 = vadd.f32 %v587_v32, %v521_v34  ;;  %v702_v5 = vadd.f32 %v696_v20, %v630_v17  ;;  %v662_v35 = vadd.f32 %v3033_v1, %v590_v42 }
 0x10f   :  { %v633_v30 = vadd.f32 %v627_v49, %v3003_v22  ;;  %v664_v29 = vadd.f32 %v3041_v4, %v592_v7  ;;  %v700_v47 = vadd.f32 %v694_v44, %v628_v2  ;;  %v704_v18 = vadd.f32 %v698_v40, %v632_v25  ;;  %v4565_v2 = vld [vmem:[#allocation45_spill] sm:$0xff] }
 0x110   :  { %v701_v6 = vadd.f32 %v695_v16, %v629_v15  ;;  %v703_v41 = vadd.f32 %v697_v23, %v631_v48  ;;  %v726_v28 = vmul.f32 %v724_v11, %v4559_v21  ;;  %v661_v19 = vadd.f32 %v3019_v31, %v589_v36 }
 0x111   :  { %v705_v57 = vadd.f32 %v699_v51, %v633_v30  ;;  %v3125_v46 = vmul.f32 %v4546_v8, %v4564_v56  ;;  %v728_v17 = vmul.f32 %v724_v11, %v4558_v9  ;;  %v730_v42 = vmul.f32 %v724_v11, %v4560_v53 }
 0x112   :  { %v663_v22 = vadd.f32 %v3037_v0, %v591_v39  ;;  %v665_v44 = vadd.f32 %v3045_v61, %v593_v12  ;;  %v774_v1 = vadd.f32 %v3051_v38, %v702_v5  ;;  %v727_v40 = vmul.f32 %v724_v11, %v4561_v13  ;;  %v4568_v39 = vld [vmem:[#allocation42_spill] sm:$0xff] }
 0x113   :  { %v836_v34 = vpop.permute.xlu1 %835  ;;  %v729_v4 = vmul.f32 %v724_v11, %v4562_v27  ;;  %v731_v31 = vmul.f32 %v724_v11, %v4563_v26  ;;  %v772_v30 = vadd.f32 %v3055_v50, %v700_v47  ;;  %v776_v8 = vadd.f32 %v3065_v24, %v704_v18  ;;  %v4569_v47 = vld [vmem:[#allocation52_spill] sm:$0xff] }
 0x114   :  { %v773_v16 = vadd.f32 %v3069_v59, %v701_v6  ;;  %v775_v58 = vadd.f32 %v3078_v43, %v703_v41  ;;  %v840_v0 = vmul.f32 %v836_v34, %v4549_v62  ;;  %v838_v61 = vmul.f32 %v836_v34, %v4545_v63 }
 0x115   :  { %v732_v32 = vadd.f32 %v726_v28, %v660_v37  ;;  %v777_v38 = vadd.f32 %v771_v55, %v705_v57  ;;  %v798_v20 = vmul.f32 %v796_v60, %v4538_v33  ;;  %v734_v52 = vadd.f32 %v728_v17, %v662_v35  ;;  %v4566_v55 = vld [vmem:[#allocation57_spill] sm:$0xff]  ;;  %v4567_v35 = vld [vmem:[#allocation50_spill] sm:$0xff] }
 0x116   :  { %v800_v23 = vmul.f32 %v796_v60, %v4536_v10  ;;  %v736_v11 = vadd.f32 %v730_v42, %v664_v29  ;;  %v802_v50 = vmul.f32 %v796_v60, %v4543_v14  ;;  %v733_v24 = vadd.f32 %v727_v40, %v661_v19  ;;  %v4570_v57 = vld [vmem:[#allocation62_spill] sm:$0xff]  ;;  %v4571_v17 = vld [vmem:[#allocation49_spill] sm:$0xff] }
 0x117   :  { %v735_v7 = vadd.f32 %v729_v4, %v663_v22  ;;  %v737_v59 = vadd.f32 %v731_v31, %v665_v44  ;;  %v842_v43 = vmul.f32 %v836_v34, %v4552_v3  ;;  %v839_v36 = vmul.f32 %v836_v34, %v4554_v45  ;;  %v4572_v22 = vld [vmem:[#allocation59_spill] sm:$0xff] }
 0x118   :  { %v908_v49 = vpop.permute.xlu1 %907  ;;  %v799_v37 = vmul.f32 %v796_v60, %v4565_v2  ;;  %v801_v25 = vmul.f32 %v796_v60, %v4566_v55  ;;  %v846_v51 = vadd.f32 %v840_v0, %v774_v1  ;;  %v844_v48 = vadd.f32 %v838_v61, %v772_v30 }
 0x119   :  { %v912_v15 = vmul.f32 %v908_v49, %v4567_v35  ;;  %v910_v12 = vmul.f32 %v908_v49, %v4568_v39  ;;  %v804_v5 = vadd.f32 %v798_v20, %v732_v32  ;;  %v806_v29 = vadd.f32 %v800_v23, %v734_v52  ;;  %v4573_v32 = vld [vmem:[#allocation61_spill] sm:$0xff] }
 0x11a   :  { %v803_v18 = vmul.f32 %v796_v60, %v4569_v47  ;;  %v3152_v6 = vmul.f32 %v780_v54, %v4565_v2  ;;  %v914_v19 = vmul.f32 %v908_v49, %v4570_v57  ;;  %v911_v42 = vmul.f32 %v908_v49, %v4571_v17  ;;  %v4574_v2 = vld [vmem:[#allocation29_spill] sm:$0xff] }
 0x11b   :  { %v918_v41 = vadd.f32 %v912_v15, %v846_v51  ;;  %v916_v28 = vadd.f32 %v910_v12, %v844_v48  ;;  %v841_v44 = vmul.f32 %v836_v34, %v4572_v22  ;;  %v808_v1 = vadd.f32 %v802_v50, %v736_v11  ;;  %v4578_v51 = vld [vmem:[#allocation18_spill] sm:$0xff] }
 0x11c   :  { %v805_v40 = vadd.f32 %v799_v37, %v733_v24  ;;  %v807_v4 = vadd.f32 %v801_v25, %v735_v7  ;;  %v848_v60 = vadd.f32 %v842_v43, %v776_v8  ;;  %v845_v30 = vadd.f32 %v839_v36, %v773_v16  ;;  %v4575_v43 = vld [vmem:[#allocation38_spill] sm:$0xff]  ;;  %v4576_v36 = vld [vmem:[#allocation65_spill] sm:$0xff] }
 0x11d   :  { %v940_v31 = vpop.permute.xlu1 %939  ;;  %958 = vrot.lane.b32.xlu0 %v918_v41, %s2291_s5  ;;  %954 = vrot.lane.b32.xlu1 %v916_v28, %s2291_s5  ;;  %v843_v0 = vmul.f32 %v836_v34, %v4564_v56  ;;  %v913_v20 = vmul.f32 %v908_v49, %v4573_v32  ;;  %v3162_v52 = vadd.f32 %v803_v18, %v737_v59  ;;  %v4580_v18 = vld [vmem:[#allocation36_spill] sm:$0xff]  ;;  %v4581_v41 = vld [vmem:[#allocation31_spill] sm:$0xff] }
 0x11e   :  { %v942_v61 = vmul.f32 %v940_v31, %v4568_v39  ;;  %v784_v23 = vmul.f32 %v780_v54, %v4536_v10  ;;  %v920_v11 = vadd.f32 %v914_v19, %v848_v60  ;;  %v917_v50 = vadd.f32 %v911_v42, %v845_v30  ;;  %v4577_v10 = vld [vmem:[#allocation17_spill] sm:$0xff]  ;;  %v4582_v19 = vld [vmem:[#allocation32_spill] sm:$0xff] }
 0x11f   :  { %v785_v24 = vmul.f32 %v780_v54, %v4566_v55  ;;  %v3167_v7 = vmul.f32 %v780_v54, %v4543_v14  ;;  %v876_v8 = vadd.f32 %v4574_v2, %v804_v5  ;;  %v847_v16 = vadd.f32 %v841_v44, %v775_v58  ;;  %v4579_v5 = vld [vmem:[#allocation54_spill] sm:$0xff]  ;;  %v4583_v44 = vld [vmem:[#allocation33_spill] sm:$0xff] }
 0x120   :  { %v878_v34 = vadd.f32 %v4575_v43, %v806_v29  ;;  %v880_v37 = vadd.f32 %v4576_v36, %v808_v1  ;;  %v849_v59 = vadd.f32 %v843_v0, %v777_v38  ;;  %v877_v25 = vadd.f32 %v4577_v10, %v805_v40  ;;  %v4584_v38 = vld [vmem:[#allocation34_spill] sm:$0xff]  ;;  %v4585_v40 = vld [vmem:[#allocation35_spill] sm:$0xff]  ;;  %v4590_v36 = vld [vmem:[#allocation64_spill] sm:$0xff] }
 0x121   :  { %962 = vrot.lane.b32.xlu0 %v920_v11, %s2291_s5  ;;  %956 = vrot.lane.b32.xlu1 %v917_v50, %s2291_s5  ;;  %v879_v15 = vadd.f32 %v4578_v51, %v807_v4  ;;  %v948_v48 = vadd.f32 %v942_v61, %v876_v8  ;;  %v919_v14 = vadd.f32 %v913_v20, %v847_v16  ;;  %v4587_v20 = vld [vmem:[#allocation25_spill] sm:$0xff]  ;;  %v4588_v50 = vld [vmem:[#allocation26_spill] sm:$0xff]  ;;  %v4589_v16 = vld [vmem:[#allocation27_spill] sm:$0xff] }
 0x122   :  { %v636_v55 = vpop.permute.xlu1 %635  ;;  %v944_v12 = vmul.f32 %v940_v31, %v4567_v35  ;;  %v915_v58 = vmul.f32 %v908_v49, %v4579_v5  ;;  %v782_v4 = vmul.f32 %v780_v54, %v4538_v33  ;;  %v787_v0 = vmul.f32 %v780_v54, %v4569_v47  ;;  %v4586_v49 = vld [vmem:[#allocation30_spill] sm:$0xff]  ;;  %v4591_v51 = vld [vmem:[#allocation28_spill] sm:$0xff] }
 0x123   :  { %v638_v29 = vmul.f32 %v636_v55, %v4580_v18  ;;  %v639_v28 = vmul.f32 %v636_v55, %v4581_v41  ;;  %v640_v42 = vmul.f32 %v636_v55, %v4582_v19  ;;  %v641_v1 = vmul.f32 %v636_v55, %v4583_v44 }
 0x124   :  { %v642_v60 = vmul.f32 %v636_v55, %v4584_v38  ;;  %v643_v30 = vmul.f32 %v636_v55, %v4585_v40  ;;  %v921_v8 = vadd.f32 %v915_v58, %v849_v59  ;;  %v950_v54 = vadd.f32 %v944_v12, %v878_v34 }
 0x125   :  { %979 = vrot.lane.b32.xlu0 %v948_v48, %s2292_s6  ;;  %960 = vrot.lane.b32.xlu1 %v919_v14, %s2291_s5  ;;  %v645_v61 = vadd.f32 %v639_v28, %v4586_v49  ;;  %v646_v11 = vadd.f32 %v640_v42, %v4587_v20  ;;  %v647_v2 = vadd.f32 %v641_v1, %v4588_v50 }
 0x126   :  { %v648_v43 = vadd.f32 %v642_v60, %v4589_v16  ;;  %v644_v10 = vadd.f32 %v638_v29, %v4590_v36  ;;  %v649_v33 = vadd.f32 %v643_v30, %v4591_v51  ;;  %v946_v47 = vmul.f32 %v940_v31, %v4570_v57 }
 0x127   :  { %v708_v55 = vpop.permute.xlu1 %707  ;;  %v943_v48 = vmul.f32 %v940_v31, %v4571_v17  ;;  %v945_v14 = vmul.f32 %v940_v31, %v4573_v32  ;;  %v947_v34 = vmul.f32 %v940_v31, %v4579_v5  ;;  %v2299_v51 = vmov 63  }
 0x128   :  { %v710_v18 = vmul.f32 %v708_v55, %v4559_v21  ;;  %v711_v41 = vmul.f32 %v708_v55, %v4561_v13  ;;  %v712_v59 = vmul.f32 %v708_v55, %v4558_v9  ;;  %v713_v58 = vmul.f32 %v708_v55, %v4562_v27 }
 0x129   :  { %v714_v29 = vmul.f32 %v708_v55, %v4560_v53  ;;  %v715_v28 = vmul.f32 %v708_v55, %v4563_v26  ;;  %983 = vrot.lane.b32.xlu0 %v950_v54, %s2292_s6  ;;  %964 = vrot.lane.b32.xlu1 %v921_v8, %s2291_s5  ;;  %v952_v44 = vadd.f32 %v946_v47, %v880_v37  ;;  %v2301_v55 = vmov 40  }
 0x12a   :  { %v717_v12 = vadd.f32 %v711_v41, %v645_v61  ;;  %v718_v19 = vadd.f32 %v712_v59, %v646_v11  ;;  %v719_v42 = vadd.f32 %v713_v58, %v647_v2  ;;  %v716_v21 = vadd.f32 %v710_v18, %v644_v10  ;;  %v3216_v2 = vld [vmem:[#allocation5 + $0x30] sm:$0xff] }
 0x12b   :  { %v949_v13 = vadd.f32 %v943_v48, %v877_v25  ;;  %v720_v1 = vadd.f32 %v714_v29, %v648_v43  ;;  %v721_v9 = vadd.f32 %v715_v28, %v649_v33  ;;  %v2298_v10 = vmov 67  }
 0x12c   :  { %v852_v38 = vpop.permute.xlu1 %851  ;;  %v789_v27 = vadd.f32 %v3152_v6, %v717_v12  ;;  %v790_v53 = vadd.f32 %v784_v23, %v718_v19  ;;  %v791_v60 = vadd.f32 %v785_v24, %v719_v42  ;;  %v788_v26 = vadd.f32 %v782_v4, %v716_v21  ;;  %v1006_v19 = vpop.permute.xlu0 %1005 }
 0x12d   :  { %987 = vrot.lane.b32.xlu0 %v952_v44, %s2292_s6  ;;  %981 = vrot.lane.b32.xlu1 %v949_v13, %s2292_s6  ;;  %v855_v31 = vmul.f32 %v852_v38, %v4554_v45  ;;  %v856_v40 = vmul.f32 %v852_v38, %v4549_v62  ;;  %v792_v30 = vadd.f32 %v3167_v7, %v720_v1  ;;  %v2300_v33 = vmov 45  }
 0x12e   :  { %v857_v37 = vmul.f32 %v852_v38, %v4572_v22  ;;  %v858_v25 = vmul.f32 %v852_v38, %v4552_v3  ;;  %v793_v49 = vadd.f32 %v787_v0, %v721_v9  ;;  %v854_v6 = vmul.f32 %v852_v38, %v4545_v63 }
 0x12f   :  { %v951_v23 = vadd.f32 %v945_v14, %v879_v15  ;;  %v861_v24 = vadd.f32 %v855_v31, %v789_v27  ;;  %v862_v4 = vadd.f32 %v856_v40, %v790_v53  ;;  %v859_v61 = vmul.f32 %v852_v38, %v4564_v56  ;;  %v4592_v53 = vld [vmem:[#allocation11_spill] sm:$0xff] }
 0x130   :  { %v863_v20 = vadd.f32 %v857_v37, %v791_v60  ;;  %v864_v11 = vadd.f32 %v858_v25, %v792_v30  ;;  %v860_v50 = vadd.f32 %v854_v6, %v788_v26  ;;  %v881_v3 = vadd.f32 %v3125_v46, %v3162_v52  ;;  %v3263_v21 = vpop.permute.xlu0 %1087 }
 0x131   :  { %v924_v45 = vpop.permute.xlu1 %923  ;;  %1159 = vperm.xlu0 %2133, %v3216_v2   ;;  %985 = vrot.lane.b32.xlu1 %v951_v23, %s2292_s6  ;;  %v865_v62 = vadd.f32 %v859_v61, %v793_v49  ;;  %v2296_v52 = vmov 42   ;;  %v2302_v54 = vmov 70   ;;  %v2303_v47 = vmov 41  }
 0x132   :  { %v927_v63 = vmul.f32 %v924_v45, %v4571_v17  ;;  %v928_v22 = vmul.f32 %v924_v45, %v4567_v35  ;;  %v929_v56 = vmul.f32 %v924_v45, %v4573_v32  ;;  %v930_v7 = vmul.f32 %v924_v45, %v4570_v57 }
 0x133   :  { %v953_v15 = vadd.f32 %v947_v34, %v881_v3  ;;  %v926_v0 = vmul.f32 %v924_v45, %v4568_v39  ;;  %v931_v8 = vmul.f32 %v924_v45, %v4579_v5  ;;  %v2293_v17 = vmov 39  }
 0x134   :  { %v3228_v16 = vadd.f32 %v927_v63, %v861_v24  ;;  %v3230_v43 = vadd.f32 %v928_v22, %v862_v4  ;;  %v3232_v36 = vadd.f32 %v929_v56, %v863_v20  ;;  %v3234_v46 = vadd.f32 %v930_v7, %v864_v11  ;;  %v42_v56 = vld [vmem:[#allocation5] sm:$0xff]  ;;  %v43_v7 = vld [vmem:[#allocation5 + $0x8] sm:$0xff] }
 0x135   :  { %2136 = vset.pattern.permute.xlu0 %v2293_v17  ;;  %989 = vrot.lane.b32.xlu1 %v953_v15, %s2292_s6  ;;  %v3237_v35 = vadd.f32 %v926_v0, %v860_v50  ;;  %v3239_v57 = vadd.f32 %v931_v8, %v865_v62  ;;  %v2294_v39 = vmov 64   ;;  %v2295_v32 = vmov 50  }
 0x136   :  { %1231 = vperm.xlu0 %2136, %v3216_v2   ;;  %v2297_v5 = vmov 62   ;;  %v2304_v48 = vmov 48   ;;  %v2305_v14 = vmov 65   ;;  %v2306_v18 = vmov 66   ;;  %v3261_v42 = vpop.permute.xlu1 %1103 }
 0x137   :  { %v2307_v41 = vmov 43   ;;  %v2308_v59 = vmov 44   ;;  %v2309_v58 = vmov 68   ;;  %v2310_v29 = vmov 69  }
 0x138   :  { %v2311_v28 = vmov 46   ;;  %v2312_v34 = vmov 47   ;;  %v2313_v12 = vmov 71   ;;  %vm966_vm2 = vcmp.lt.s32.totalorder %v4592_v53, 18 }
 0x139   :  { %1119 = vperm.xlu1 %2132, %v3216_v2   ;;  %vm991_vm3 = vcmp.lt.s32.totalorder %v4592_v53, 110 }
 0x13a   :  { %2139 = vset.pattern.permute.xlu0 %v2294_v39 }
 0x13b   :  { %1335 = vperm.xlu0 %2139, %v3216_v2  }
 0x13d   :  { %2134 = vset.pattern.permute.xlu1 %v2295_v32 }
 0x13e   :  { %1175 = vperm.xlu1 %2134, %v3216_v2  }
 0x13f   :  { %2142 = vset.pattern.permute.xlu0 %v2296_v52 }
 0x140   :  { %1447 = vperm.xlu0 %2142, %v3216_v2  }
 0x142   :  { %2135 = vset.pattern.permute.xlu1 %v2297_v5 }
 0x143   :  { %1191 = vperm.xlu1 %2135, %v3216_v2  }
 0x144   :  { %2145 = vset.pattern.permute.xlu0 %v2298_v10 }
 0x145   :  { %1551 = vperm.xlu0 %2145, %v3216_v2  }
 0x147   :  { %2137 = vset.pattern.permute.xlu1 %v2299_v51  ;;  %v44_v51 = vld [vmem:[#allocation5 + $0x10] sm:$0xff] }
 0x148   :  { %1263 = vperm.xlu1 %2137, %v3216_v2  }
 0x149   :  { %2148 = vset.pattern.permute.xlu0 %v2300_v33  ;;  %v45_v33 = vld [vmem:[#allocation5 + $0x18] sm:$0xff] }
 0x14a   :  { %1663 = vperm.xlu0 %2148, %v3216_v2  }
 0x14c   :  { %2138 = vset.pattern.permute.xlu1 %v2301_v55 }
 0x14d   :  { %1303 = vperm.xlu1 %2138, %v3216_v2  }
 0x14e   :  { %2151 = vset.pattern.permute.xlu0 %v2302_v54 }
 0x14f   :  { %1767 = vperm.xlu0 %2151, %v3216_v2  }
 0x151   :  { %2140 = vset.pattern.permute.xlu1 %v2303_v47 }
 0x152   :  { %1375 = vperm.xlu1 %2140, %v3216_v2  }
 0x153   :  { %2154 = vset.pattern.permute.xlu0 %v2304_v48 }
 0x156   :  { %2141 = vset.pattern.permute.xlu1 %v2305_v14 }
 0x157   :  { %1407 = vperm.xlu1 %2141, %v3216_v2  }
 0x15b   :  { %2143 = vset.pattern.permute.xlu1 %v2306_v18 }
 0x15c   :  { %1479 = vperm.xlu1 %2143, %v3216_v2  }
 0x160   :  { %2144 = vset.pattern.permute.xlu1 %v2307_v41 }
 0x161   :  { %1519 = vperm.xlu1 %2144, %v3216_v2  }
 0x165   :  { %2146 = vset.pattern.permute.xlu1 %v2308_v59 }
 0x166   :  { %1591 = vperm.xlu1 %2146, %v3216_v2  }
 0x16a   :  { %2147 = vset.pattern.permute.xlu1 %v2309_v58  ;;  %v46_v58 = vld [vmem:[#allocation5 + $0x20] sm:$0xff] }
 0x16b   :  { %1623 = vperm.xlu1 %2147, %v3216_v2  }
 0x16f   :  { %2149 = vset.pattern.permute.xlu1 %v2310_v29  ;;  %v47_v29 = vld [vmem:[#allocation5 + $0x28] sm:$0xff] }
 0x170   :  { %1695 = vperm.xlu1 %2149, %v3216_v2  }
 0x174   :  { %2150 = vset.pattern.permute.xlu1 %v2311_v28 }
 0x175   :  { %1735 = vperm.xlu1 %2150, %v3216_v2  }
 0x179   :  { %2152 = vset.pattern.permute.xlu1 %v2312_v34 }
 0x17a   :  { %1807 = vperm.xlu1 %2152, %v3216_v2  }
 0x17e   :  { %2153 = vset.pattern.permute.xlu1 %v2313_v12 }
 0x18f   :  { %v959_v44 = vpop.permute.xlu0 %958  ;;  %v955_v13 = vpop.permute.xlu1 %954 }
 0x193   :  { %v963_v1 = vpop.permute.xlu0 %962  ;;  %v957_v9 = vpop.permute.xlu1 %956 }
 0x194   :  { %v971_v26 = vsel %vm966_vm2, %v955_v13, %v957_v9  ;;  %v970_v30 = vsel %vm966_vm2, %v957_v9, %v959_v44  ;;  %v2316_v9 = vmov 51  }
 0x195   :  { %v974_v37 = vadd.f32 %v971_v26, %v3228_v16  ;;  %v975_v20 = vadd.f32 %v970_v30, %v3230_v43  ;;  %v2319_v26 = vmov 58   ;;  %v2321_v30 = vmov 73  }
 0x197   :  { %v980_v38 = vpop.permute.xlu0 %979  ;;  %v961_v27 = vpop.permute.xlu1 %960 }
 0x198   :  { %v969_v6 = vsel %vm966_vm2, %v959_v44, %v961_v27  ;;  %v968_v11 = vsel %vm966_vm2, %v961_v27, %v963_v1  ;;  %v2318_v27 = vmov 53  }
 0x199   :  { %v976_v50 = vadd.f32 %v969_v6, %v3232_v36  ;;  %v977_v36 = vadd.f32 %v968_v11, %v3234_v46 }
 0x19b   :  { %v965_v60 = vpop.permute.xlu1 %964  ;;  %v984_v40 = vpop.permute.xlu0 %983 }
 0x19c   :  { %v972_v31 = vsel %vm966_vm2, %v965_v60, %v955_v13  ;;  %v967_v45 = vsel %vm966_vm2, %v963_v1, %v965_v60  ;;  %v2315_v13 = vmov 52  }
 0x19d   :  { %v973_v25 = vadd.f32 %v972_v31, %v3237_v35  ;;  %v978_v35 = vadd.f32 %v967_v45, %v3239_v57  ;;  %v2320_v31 = vmov 54  }
 0x19f   :  { %v982_v49 = vpop.permute.xlu1 %981  ;;  %v988_v3 = vpop.permute.xlu0 %987 }
 0x1a0   :  { %v995_v23 = vsel %vm991_vm3, %v982_v49, %v984_v40  ;;  %v996_v24 = vsel %vm991_vm3, %v980_v38, %v982_v49  ;;  %v2323_v49 = vmov 57  }
 0x1a1   :  { %v998_v4 = vadd.f32 %v996_v24, %v973_v25  ;;  %v999_v61 = vadd.f32 %v995_v23, %v974_v37  ;;  %v2322_v37 = vmov 56   ;;  %v2324_v23 = vmov 59  }
 0x1a3   :  { %v1008_v62 = vadd.f32 %v1006_v19, %v998_v4  ;;  %v1009_v63 = vadd.f32 %v1006_v19, %v999_v61  ;;  %v986_v22 = vpop.permute.xlu1 %985  ;;  %v2325_v4 = vmov 60  }
 0x1a4   :  { %v993_v15 = vsel %vm991_vm3, %v986_v22, %v988_v3  ;;  %v994_v0 = vsel %vm991_vm3, %v984_v40, %v986_v22 }
 0x1a5   :  { %v1014_v8 = vmax.f32 %v1008_v62, 0.0  ;;  %v1015_v16 = vmax.f32 %v1009_v63, 0.0  ;;  %v1000_v43 = vadd.f32 %v994_v0, %v975_v20  ;;  %v1001_v17 = vadd.f32 %v993_v15, %v976_v50 }
 0x1a7   :  { %v3293_v39 = vmul.f32 %v1014_v8, %v42_v56  ;;  %v3295_v32 = vmul.f32 %v1015_v16, %v43_v7  ;;  %v1010_v52 = vadd.f32 %v1006_v19, %v1000_v43  ;;  %v1011_v5 = vadd.f32 %v1006_v19, %v1001_v17  ;;  %v990_v10 = vpop.permute.xlu1 %989  ;;  %v4597_v8 = vld [vmem:[#allocation14_spill] sm:$0xff]  ;;  %v4600_v17 = vld [vmem:[#allocation12_spill] sm:$0xff] }
 0x1a8   :  { %v992_v55 = vsel %vm991_vm3, %v988_v3, %v990_v10  ;;  %v997_v54 = vsel %vm991_vm3, %v990_v10, %v980_v38  ;;  %v2317_v38 = vmov 55  }
 0x1a9   :  { %v1016_v47 = vmax.f32 %v1010_v52, 0.0  ;;  %v1017_v48 = vmax.f32 %v1011_v5, 0.0  ;;  %v1002_v46 = vadd.f32 %v992_v55, %v977_v36  ;;  %v1003_v14 = vadd.f32 %v997_v54, %v978_v35  ;;  %1026 = vrot.lane.b32.xlu0 %v3293_v39, %s2250_s4  ;;  %1028 = vrot.lane.b32.xlu1 %v3295_v32, %s2250_s4  ;;  %v4603_v52 = vld [vmem:[#allocation15_spill] sm:$0xff] }
 0x1aa   :  { %v3383_v16 = vrot.slane %v3293_v39, %v4597_v8  ;;  %v3387_v43 = vrot.slane %v3295_v32, %v4597_v8  ;;  %v3391_v36 = vrot.slane %v3293_v39, %v4600_v17  ;;  %v3395_v35 = vrot.slane %v3295_v32, %v4600_v17 }
 0x1ab   :  { %v3305_v57 = vmul.f32 %v1016_v47, %v44_v51  ;;  %v3307_v18 = vmul.f32 %v1017_v48, %v45_v33  ;;  %v1012_v41 = vadd.f32 %v1006_v19, %v1002_v46  ;;  %v1013_v59 = vadd.f32 %v1006_v19, %v1003_v14 }
 0x1ac   :  { %v2314_v19 = vmov 72   ;;  %4598 = vst [vmem:[#allocation46_spill] sm:$0xff] %v3383_v16  ;;  %4599 = vst [vmem:[#allocation16_spill] sm:$0xff] %v3387_v43  ;;  %v3399_v5 = vrot.slane %v3293_v39, %v4603_v52  ;;  %v3415_v55 = vrot.slane %v3295_v32, %v4603_v52 }
 0x1ad   :  { %v1018_v28 = vmax.f32 %v1012_v41, 0.0  ;;  %v1019_v34 = vmax.f32 %v1013_v59, 0.0  ;;  %1030 = vrot.lane.b32.xlu0 %v3305_v57, %s2250_s4  ;;  %1032 = vrot.lane.b32.xlu1 %v3307_v18, %s2250_s4  ;;  %4601 = vst [vmem:[#allocation40_spill] sm:$0xff] %v3391_v36  ;;  %4602 = vst [vmem:[#allocation19_spill] sm:$0xff] %v3395_v35  ;;  %v3411_v33 = vrot.slane %v3305_v57, %v4597_v8 }
 0x1ae   :  { %4604 = vst [vmem:[#allocation21_spill] sm:$0xff] %v3399_v5  ;;  %4608 = vst [vmem:[#allocation41_spill] sm:$0xff] %v3415_v55  ;;  %v3423_v54 = vrot.slane %v3305_v57, %v4600_v17  ;;  %v3427_v47 = vrot.slane %v3307_v18, %v4600_v17  ;;  %v3431_v48 = vrot.slane %v3305_v57, %v4603_v52 }
 0x1af   :  { %v3313_v12 = vmul.f32 %v1018_v28, %v46_v58  ;;  %v3315_v44 = vmul.f32 %v1019_v34, %v47_v29  ;;  %4607 = vst [vmem:[#allocation58_spill] sm:$0xff] %v3411_v33 }
 0x1b0   :  { %v3357_v20 = vpop.permute.xlu0 %1159  ;;  %4610 = vst [vmem:[#allocation48_spill] sm:$0xff] %v3423_v54  ;;  %4611 = vst [vmem:[#allocation60_spill] sm:$0xff] %v3427_v47 }
 0x1b1   :  { %1036 = vrot.lane.b32.xlu1 %v3315_v44, %s2250_s4  ;;  %1034 = vrot.lane.b32.xlu0 %v3313_v12, %s2250_s4  ;;  %4612 = vst [vmem:[#allocation47_spill] sm:$0xff] %v3431_v48  ;;  %v3447_v59 = vrot.slane %v3313_v12, %v4597_v8  ;;  %v3455_v58 = vrot.slane %v3315_v44, %v4597_v8 }
 0x1b2   :  { %v3459_v29 = vrot.slane %v3313_v12, %v4600_v17  ;;  %v3463_v28 = vrot.slane %v3315_v44, %v4600_v17  ;;  %v3467_v34 = vrot.slane %v3313_v12, %v4603_v52 }
 0x1b3   :  { %4616 = vst [vmem:[#allocation43_spill] sm:$0xff] %v3447_v59  ;;  %4618 = vst [vmem:[#allocation51_spill] sm:$0xff] %v3455_v58 }
 0x1b4   :  { %4619 = vst [vmem:[#allocation53_spill] sm:$0xff] %v3459_v29  ;;  %4620 = vst [vmem:[#allocation45_spill] sm:$0xff] %v3463_v28 }
 0x1b5   :  { %1839 = vperm.xlu1 %2153, %v3216_v2   ;;  %1044 = vrot.lane.b32.xlu0 %v3293_v39, %s2251_s1  ;;  %v3361_v50 = vpop.permute.xlu0 %1231  ;;  %4621 = vst [vmem:[#allocation57_spill] sm:$0xff] %v3467_v34 }
 0x1b8   :  { %v3337_v1 = vpop.permute.xlu1 %1119 }
 0x1b9   :  { %1046 = vrot.lane.b32.xlu1 %v3295_v32, %s2251_s1  ;;  %1048 = vrot.lane.b32.xlu0 %v3305_v57, %s2251_s1 }
 0x1ba   :  { %2155 = vset.pattern.permute.xlu1 %v2314_v19  ;;  %v3365_v3 = vpop.permute.xlu0 %1335 }
 0x1bd   :  { %1050 = vrot.lane.b32.xlu1 %v3307_v18, %s2251_s1  ;;  %1052 = vrot.lane.b32.xlu0 %v3313_v12, %s2251_s1  ;;  %v3341_v60 = vpop.permute.xlu1 %1175 }
 0x1bf   :  { %v1448_v63 = vpop.permute.xlu0 %1447 }
 0x1c1   :  { %1054 = vrot.lane.b32.xlu1 %v3315_v44, %s2251_s1  ;;  %1879 = vperm.xlu0 %2154, %v3216_v2  }
 0x1c2   :  { %v3346_v40 = vpop.permute.xlu1 %1191 }
 0x1c4   :  { %v1552_v7 = vpop.permute.xlu0 %1551 }
 0x1c5   :  { %1911 = vperm.xlu1 %2155, %v3216_v2   ;;  %2157 = vset.pattern.permute.xlu0 %v2315_v13 }
 0x1c6   :  { %1319 = vperm.xlu0 %2157, %v3216_v2  }
 0x1c7   :  { %v3350_v25 = vpop.permute.xlu1 %1263 }
 0x1c9   :  { %2156 = vset.pattern.permute.xlu1 %v2316_v9  ;;  %v3433_v46 = vpop.permute.xlu0 %1663  ;;  %v3480_v9 = vrot.slane %v3315_v44, %v4603_v52 }
 0x1ca   :  { %1247 = vperm.xlu1 %2156, %v3216_v2   ;;  %2160 = vset.pattern.permute.xlu0 %v2317_v38 }
 0x1cb   :  { %1535 = vperm.xlu0 %2160, %v3216_v2   ;;  %4623 = vst [vmem:[#allocation42_spill] sm:$0xff] %v3480_v9 }
 0x1cc   :  { %v3353_v6 = vpop.permute.xlu1 %1303 }
 0x1ce   :  { %2158 = vset.pattern.permute.xlu1 %v2318_v27 }
 0x1cf   :  { %1391 = vperm.xlu1 %2158, %v3216_v2   ;;  %2163 = vset.pattern.permute.xlu0 %v2319_v26  ;;  %v3492_v26 = vmul.f32 %v1552_v7, %v3383_v16 }
 0x1d0   :  { %1751 = vperm.xlu0 %2163, %v3216_v2  }
 0x1d1   :  { %v1376_v24 = vpop.permute.xlu1 %1375  ;;  %4626 = vst [vmem:[#allocation49_spill] sm:$0xff] %v3492_v26  ;;  %v3518_v26 = vpop.permute.xlu0 %1767 }
 0x1d2   :  { %4631 = vst [vmem:[#allocation65_spill] sm:$0xff] %v3518_v26 }
 0x1d3   :  { %2159 = vset.pattern.permute.xlu1 %v2320_v31  ;;  %v3495_v31 = vmul.f32 %v1552_v7, %v3387_v43 }
 0x1d4   :  { %1463 = vperm.xlu1 %2159, %v3216_v2   ;;  %2166 = vset.pattern.permute.xlu0 %v2321_v30  ;;  %v3498_v30 = vmul.f32 %v1552_v7, %v3411_v33 }
 0x1d5   :  { %1975 = vperm.xlu0 %2166, %v3216_v2  }
 0x1d6   :  { %v1408_v61 = vpop.permute.xlu1 %1407  ;;  %4627 = vst [vmem:[#allocation59_spill] sm:$0xff] %v3498_v30 }
 0x1d7   :  { %v3544_v26 = vmul.f32 %v1408_v61, %v3459_v29 }
 0x1d8   :  { %2161 = vset.pattern.permute.xlu1 %v2322_v37  ;;  %v3504_v37 = vmul.f32 %v1552_v7, %v3447_v59 }
 0x1d9   :  { %1607 = vperm.xlu1 %2161, %v3216_v2  }
 0x1da   :  { %4629 = vst [vmem:[#allocation29_spill] sm:$0xff] %v3504_v37  ;;  %v3526_v37 = vmul.f32 %v1376_v24, %v3459_v29 }
 0x1db   :  { %v3359_v11 = vpop.permute.xlu1 %1479 }
 0x1dd   :  { %2162 = vset.pattern.permute.xlu1 %v2323_v49  ;;  %v3507_v49 = vmul.f32 %v1552_v7, %v3455_v58 }
 0x1de   :  { %1679 = vperm.xlu1 %2162, %v3216_v2  }
 0x1df   :  { %4630 = vst [vmem:[#allocation38_spill] sm:$0xff] %v3507_v49  ;;  %v3535_v49 = vmul.f32 %v1408_v61, %v3395_v35 }
 0x1e0   :  { %v3363_v45 = vpop.permute.xlu1 %1519 }
 0x1e2   :  { %2164 = vset.pattern.permute.xlu1 %v2324_v23  ;;  %v3510_v23 = vmul.f32 %v1376_v24, %v3391_v36 }
 0x1e3   :  { %1823 = vperm.xlu1 %2164, %v3216_v2  }
 0x1e5   :  { %v3367_v62 = vpop.permute.xlu1 %1591 }
 0x1e7   :  { %2165 = vset.pattern.permute.xlu1 %v2325_v4  ;;  %v3513_v4 = vmul.f32 %v1376_v24, %v3395_v35 }
 0x1e8   :  { %1895 = vperm.xlu1 %2165, %v3216_v2   ;;  %v4594_v2 = vld [vmem:[#allocation13_spill] sm:$0xff] }
 0x1e9   :  { %v3375_v15 = vrot.slane %v3293_v39, %v4594_v2  ;;  %v3379_v0 = vrot.slane %v3295_v32, %v4594_v2  ;;  %v3403_v10 = vrot.slane %v3305_v57, %v4594_v2  ;;  %v3407_v51 = vrot.slane %v3307_v18, %v4594_v2 }
 0x1ea   :  { %v3369_v22 = vpop.permute.xlu1 %1623  ;;  %v3419_v39 = vrot.slane %v3307_v18, %v4597_v8  ;;  %v3439_v14 = vrot.slane %v3313_v12, %v4594_v2  ;;  %v3443_v41 = vrot.slane %v3315_v44, %v4594_v2  ;;  %v3451_v57 = vrot.slane %v3307_v18, %v4603_v52 }
 0x1eb   :  { %4595 = vst [vmem:[#allocation24_spill] sm:$0xff] %v3375_v15  ;;  %4596 = vst [vmem:[#allocation20_spill] sm:$0xff] %v3379_v0  ;;  %v3470_v19 = vmul.f32 %v1448_v63, %v3375_v15  ;;  %v3473_v18 = vmul.f32 %v1448_v63, %v3379_v0  ;;  %v3476_v13 = vmul.f32 %v1448_v63, %v3403_v10 }
 0x1ec   :  { %4605 = vst [vmem:[#allocation22_spill] sm:$0xff] %v3403_v10  ;;  %4606 = vst [vmem:[#allocation23_spill] sm:$0xff] %v3407_v51  ;;  %v3483_v38 = vmul.f32 %v1448_v63, %v3407_v51  ;;  %v3486_v27 = vmul.f32 %v1448_v63, %v3439_v14  ;;  %v3489_v12 = vmul.f32 %v1448_v63, %v3443_v41 }
 0x1ed   :  { %4609 = vst [vmem:[#allocation63_spill] sm:$0xff] %v3419_v39  ;;  %4614 = vst [vmem:[#allocation39_spill] sm:$0xff] %v3439_v14  ;;  %v3501_v44 = vmul.f32 %v1552_v7, %v3419_v39  ;;  %v3516_v63 = vmul.f32 %v1376_v24, %v3423_v54  ;;  %v3529_v7 = vmul.f32 %v1376_v24, %v3463_v28 }
 0x1ee   :  { %4615 = vst [vmem:[#allocation56_spill] sm:$0xff] %v3443_v41  ;;  %4617 = vst [vmem:[#allocation55_spill] sm:$0xff] %v3451_v57  ;;  %v3555_v35 = vmul.f32 %v3359_v11, %v3379_v0  ;;  %v3575_v0 = vmul.f32 %v3363_v45, %v3383_v16 }
 0x1ef   :  { %v3371_v56 = vpop.permute.xlu1 %1695  ;;  %4622 = vst [vmem:[#allocation50_spill] sm:$0xff] %v3476_v13  ;;  %4624 = vst [vmem:[#allocation52_spill] sm:$0xff] %v3486_v27  ;;  %v3523_v27 = vmul.f32 %v1376_v24, %v3427_v47  ;;  %v3532_v13 = vmul.f32 %v1408_v61, %v3391_v36  ;;  %v3551_v24 = vmul.f32 %v3359_v11, %v3375_v15 }
 0x1f0   :  { %4593 = vst [vmem:[#allocation37_spill] sm:$0xff] %v3371_v56  ;;  %4625 = vst [vmem:[#allocation62_spill] sm:$0xff] %v3489_v12  ;;  %v3571_v15 = vmul.f32 %v3359_v11, %v3443_v41  ;;  %v3599_v41 = vmul.f32 %v3367_v62, %v3399_v5  ;;  %v3613_v36 = vmul.f32 %v3367_v62, %v3451_v57 }
 0x1f1   :  { %4628 = vst [vmem:[#allocation61_spill] sm:$0xff] %v3501_v44  ;;  %v3538_v44 = vmul.f32 %v1408_v61, %v3423_v54  ;;  %4633 = vst [vmem:[#allocation18_spill] sm:$0xff] %v3551_v24  ;;  %v3559_v54 = vmul.f32 %v3359_v11, %v3403_v10  ;;  %v3579_v10 = vmul.f32 %v3363_v45, %v3387_v43 }
 0x1f2   :  { %4636 = vst [vmem:[#allocation31_spill] sm:$0xff] %v3571_v15  ;;  %4637 = vst [vmem:[#allocation32_spill] sm:$0xff] %v3575_v0  ;;  %v3607_v24 = vmul.f32 %v3367_v62, %v3431_v48  ;;  %v3648_v43 = vmul.f32 %v3369_v22, %v3451_v57 }
 0x1f3   :  { %4634 = vst [vmem:[#allocation54_spill] sm:$0xff] %v3559_v54  ;;  %v3583_v54 = vmul.f32 %v3363_v45, %v3411_v33  ;;  %4642 = vst [vmem:[#allocation25_spill] sm:$0xff] %v3599_v41  ;;  %v3644_v33 = vmul.f32 %v3369_v22, %v3431_v48 }
 0x1f4   :  { %v3435_v32 = vpop.permute.xlu1 %1735  ;;  %4643 = vst [vmem:[#allocation26_spill] sm:$0xff] %v3607_v24  ;;  %4644 = vst [vmem:[#allocation27_spill] sm:$0xff] %v3613_v36 }
 0x1f5   :  { %4613 = vst [vmem:[#allocation44_spill] sm:$0xff] %v3435_v32  ;;  %v3547_v32 = vmul.f32 %v1408_v61, %v3463_v28  ;;  %4638 = vst [vmem:[#allocation33_spill] sm:$0xff] %v3583_v54 }
 0x1f6   :  { %4650 = vst [vmem:[#allocation15_spill] sm:$0xff] %v3644_v33  ;;  %4651 = vst [vmem:[#allocation66_spill] sm:$0xff] %v3648_v43 }
 0x1f9   :  { %v3520_v30 = vpop.permute.xlu1 %1807 }
 0x1fa   :  { %4632 = vst [vmem:[#allocation17_spill] sm:$0xff] %v3520_v30  ;;  %v3541_v30 = vmul.f32 %v1408_v61, %v3427_v47  ;;  %v3563_v47 = vmul.f32 %v3359_v11, %v3407_v51  ;;  %v3567_v61 = vmul.f32 %v3359_v11, %v3439_v14  ;;  %v3587_v14 = vmul.f32 %v3363_v45, %v3419_v39 }
 0x1fb   :  { %v3591_v11 = vmul.f32 %v3363_v45, %v3447_v59  ;;  %v3603_v51 = vmul.f32 %v3367_v62, %v3415_v55 }
 0x1fc   :  { %4635 = vst [vmem:[#allocation36_spill] sm:$0xff] %v3567_v61  ;;  %4639 = vst [vmem:[#allocation34_spill] sm:$0xff] %v3587_v14  ;;  %v3595_v61 = vmul.f32 %v3363_v45, %v3455_v58  ;;  %v3617_v45 = vmul.f32 %v3367_v62, %v3467_v34 }
 0x1fd   :  { %4640 = vst [vmem:[#allocation35_spill] sm:$0xff] %v3591_v11  ;;  %v3621_v11 = vmul.f32 %v3367_v62, %v3480_v9  ;;  %v3640_v62 = vmul.f32 %v3369_v22, %v3415_v55 }
 0x1fe   :  { %4641 = vst [vmem:[#allocation30_spill] sm:$0xff] %v3595_v61  ;;  %4645 = vst [vmem:[#allocation64_spill] sm:$0xff] %v3617_v45  ;;  %v3636_v45 = vmul.f32 %v3369_v22, %v3399_v5 }
 0x1ff   :  { %4646 = vst [vmem:[#allocation28_spill] sm:$0xff] %v3621_v11 }
 0x200   :  { %4649 = vst [vmem:[#allocation12_spill] sm:$0xff] %v3636_v45 }
 0x21b   :  { %v3609_v28 = vpop.permute.xlu0 %1026  ;;  %v1029_v29 = vpop.permute.xlu1 %1028 }
 0x21c   :  { %v1042_v54 = vsel %vm63_vm0, %v3609_v28, %v1029_v29 }
 0x21d   :  { %v1069_v24 = vrot.slane %v1042_v54, %v4600_v17  ;;  %v1141_v58 = vrot.slane %v1042_v54, %v4594_v2  ;;  %v3629_v59 = vrot.slane %v1042_v54, %v4597_v8  ;;  %v3632_v39 = vrot.slane %v1042_v54, %v4603_v52 }
 0x21f   :  { %4647 = vst [vmem:[#allocation13_spill] sm:$0xff] %v3629_v59  ;;  %4648 = vst [vmem:[#allocation14_spill] sm:$0xff] %v3632_v39  ;;  %v1091_v16 = vmul.f32 %v3263_v21, %v1069_v24  ;;  %v1107_v54 = vmul.f32 %v3261_v42, %v1069_v24  ;;  %v1123_v11 = vmul.f32 %v3337_v1, %v1069_v24  ;;  %v1031_v45 = vpop.permute.xlu0 %1030  ;;  %v1033_v48 = vpop.permute.xlu1 %1032 }
 0x220   :  { %v1163_v5 = vmul.f32 %v3357_v20, %v1141_v58  ;;  %v1179_v55 = vmul.f32 %v3341_v60, %v1141_v58  ;;  %v1195_v61 = vmul.f32 %v3346_v40, %v1141_v58  ;;  %v1235_v33 = vmul.f32 %v3361_v50, %v3629_v59 }
 0x221   :  { %v1267_v57 = vmul.f32 %v3350_v25, %v3629_v59  ;;  %v1307_v43 = vmul.f32 %v3353_v6, %v3632_v39  ;;  %v1339_v24 = vmul.f32 %v3365_v3, %v3632_v39  ;;  %v1041_v41 = vsel %vm63_vm0, %v1029_v29, %v1031_v45 }
 0x222   :  { %v1169_v36 = vadd.f32 %v1163_v5, %v1091_v16  ;;  %v3666_v14 = vadd.f32 %v1179_v55, %v1107_v54  ;;  %v1201_v58 = vadd.f32 %v1195_v61, %v1123_v11  ;;  %v1073_v0 = vrot.slane %v1041_v41, %v4600_v17 }
 0x223   :  { %v1145_v15 = vrot.slane %v1041_v41, %v4594_v2  ;;  %v3671_v59 = vrot.slane %v1041_v41, %v4597_v8  ;;  %v3674_v16 = vrot.slane %v1041_v41, %v4603_v52  ;;  %v1040_v5 = vsel %vm63_vm0, %v1031_v45, %v1033_v48 }
 0x224   :  { %4652 = vst [vmem:[#allocation67_spill] sm:$0xff] %v3666_v14  ;;  %v1241_v12 = vadd.f32 %v1235_v33, %v1169_v36  ;;  %v1273_v39 = vadd.f32 %v1267_v57, %v1201_v58  ;;  %v1092_v29 = vmul.f32 %v3263_v21, %v1073_v0  ;;  %v1108_v55 = vmul.f32 %v3261_v42, %v1073_v0 }
 0x225   :  { %4653 = vst [vmem:[#allocation68_spill] sm:$0xff] %v3671_v59  ;;  %v1124_v61 = vmul.f32 %v3337_v1, %v1073_v0  ;;  %v1164_v54 = vmul.f32 %v3357_v20, %v1145_v15  ;;  %v1180_v36 = vmul.f32 %v3341_v60, %v1145_v15  ;;  %v1196_v33 = vmul.f32 %v3346_v40, %v1145_v15 }
 0x226   :  { %v1313_v11 = vadd.f32 %v1307_v43, %v1241_v12  ;;  %v3686_v41 = vmul.f32 %v3369_v22, %v3467_v34  ;;  %v1345_v14 = vadd.f32 %v1339_v24, %v1273_v39  ;;  %v1236_v57 = vmul.f32 %v3361_v50, %v3671_v59 }
 0x227   :  { %v1268_v45 = vmul.f32 %v3350_v25, %v3671_v59  ;;  %v1170_v58 = vadd.f32 %v1164_v54, %v1092_v29  ;;  %v3692_v0 = vadd.f32 %v1180_v36, %v1108_v55  ;;  %v1202_v43 = vadd.f32 %v1196_v33, %v1124_v61  ;;  %v1035_v33 = vpop.permute.xlu0 %1034 }
 0x228   :  { %4654 = vst [vmem:[#allocation69_spill] sm:$0xff] %v3686_v41  ;;  %v1308_v12 = vmul.f32 %v3353_v6, %v3674_v16  ;;  %v1385_v15 = vadd.f32 %v3513_v4, %v1313_v11  ;;  %v1417_v56 = vadd.f32 %v3535_v49, %v1345_v14  ;;  %v1077_v41 = vrot.slane %v1040_v5, %v4600_v17 }
 0x229   :  { %v1149_v39 = vrot.slane %v1040_v5, %v4594_v2  ;;  %v1242_v24 = vadd.f32 %v1236_v57, %v1170_v58  ;;  %v1274_v34 = vadd.f32 %v1268_v45, %v1202_v43  ;;  %v1340_v59 = vmul.f32 %v3365_v3, %v3674_v16 }
 0x22a   :  { %v3703_v29 = vrot.slane %v1040_v5, %v4597_v8  ;;  %v3706_v55 = vadd.f32 %v3555_v35, %v1417_v56  ;;  %v1093_v61 = vmul.f32 %v3263_v21, %v1077_v41  ;;  %v1109_v4 = vmul.f32 %v3261_v42, %v1077_v41 }
 0x22b   :  { %v1125_v14 = vmul.f32 %v3337_v1, %v1077_v41  ;;  %v3713_v49 = vmul.f32 %v3369_v22, %v3480_v9  ;;  %v1314_v11 = vadd.f32 %v1308_v12, %v1242_v24  ;;  %v1165_v54 = vmul.f32 %v3357_v20, %v1149_v39  ;;  %v1037_v12 = vpop.permute.xlu1 %1036 }
 0x22c   :  { %v1181_v36 = vmul.f32 %v3341_v60, %v1149_v39  ;;  %v3718_v57 = vadd.f32 %v3473_v18, %v1385_v15  ;;  %v1346_v56 = vadd.f32 %v1340_v59, %v1274_v34  ;;  %v1197_v35 = vmul.f32 %v3346_v40, %v1149_v39 }
 0x22d   :  { %v3722_v45 = vrot.slane %v1040_v5, %v4603_v52  ;;  %v1171_v41 = vadd.f32 %v1165_v54, %v1093_v61  ;;  %v1237_v22 = vmul.f32 %v3361_v50, %v3703_v29  ;;  %v1269_v43 = vmul.f32 %v3350_v25, %v3703_v29 }
 0x22e   :  { %v3724_v58 = vadd.f32 %v1181_v36, %v1109_v4  ;;  %v3731_v24 = vadd.f32 %v3516_v63, %v1314_v11  ;;  %v1203_v18 = vadd.f32 %v1197_v35, %v1125_v14  ;;  %v1039_v34 = vsel %vm63_vm0, %v1033_v48, %v1035_v33 }
 0x22f   :  { %v1309_v59 = vmul.f32 %v3353_v6, %v3722_v45  ;;  %v1243_v5 = vadd.f32 %v1237_v22, %v1171_v41  ;;  %v1081_v15 = vrot.slane %v1039_v34, %v4600_v17  ;;  %v1153_v39 = vrot.slane %v1039_v34, %v4594_v2 }
 0x230   :  { %4655 = vst [vmem:[#allocation70_spill] sm:$0xff] %v3731_v24  ;;  %v3740_v61 = vrot.slane %v1039_v34, %v4597_v8  ;;  %v1275_v4 = vadd.f32 %v1269_v43, %v1203_v18  ;;  %v1341_v63 = vmul.f32 %v3365_v3, %v3722_v45  ;;  %v3745_v14 = vrot.slane %v1039_v34, %v4603_v52 }
 0x231   :  { %v1038_v11 = vsel %vm63_vm0, %v1035_v33, %v1037_v12  ;;  %v1094_v48 = vmul.f32 %v3263_v21, %v1081_v15  ;;  %v1110_v54 = vmul.f32 %v3261_v42, %v1081_v15  ;;  %v1126_v36 = vmul.f32 %v3337_v1, %v1081_v15 }
 0x232   :  { %v1043_v35 = vsel %vm63_vm0, %v1037_v12, %v3609_v28  ;;  %v1347_v41 = vadd.f32 %v1341_v63, %v1275_v4  ;;  %v1166_v22 = vmul.f32 %v3357_v20, %v1153_v39  ;;  %v1182_v43 = vmul.f32 %v3341_v60, %v1153_v39 }
 0x233   :  { %v1198_v18 = vmul.f32 %v3346_v40, %v1153_v39  ;;  %v3759_v34 = vadd.f32 %v3538_v44, %v1346_v56  ;;  %v1315_v33 = vadd.f32 %v1309_v59, %v1243_v5  ;;  %v1238_v9 = vmul.f32 %v3361_v50, %v3740_v61 }
 0x234   :  { %v1270_v15 = vmul.f32 %v3350_v25, %v3740_v61  ;;  %v1419_v24 = vadd.f32 %v3541_v30, %v1347_v41  ;;  %v1172_v28 = vadd.f32 %v1166_v22, %v1094_v48  ;;  %v3766_v12 = vadd.f32 %v1182_v43, %v1110_v54  ;;  %v3782_v22 = vpop.permute.xlu1 %1839 }
 0x235   :  { %4656 = vst [vmem:[#allocation71_spill] sm:$0xff] %v3759_v34  ;;  %v1204_v4 = vadd.f32 %v1198_v18, %v1126_v36  ;;  %v1310_v63 = vmul.f32 %v3353_v6, %v3745_v14  ;;  %v1342_v44 = vmul.f32 %v3365_v3, %v3745_v14  ;;  %v1065_v56 = vrot.slane %v1043_v35, %v4600_v17 }
 0x236   :  { %4657 = vst [vmem:[#allocation72_spill] sm:$0xff] %v3766_v12  ;;  %v1085_v59 = vrot.slane %v1038_v11, %v4600_v17  ;;  %v3775_v5 = vadd.f32 %v3563_v47, %v1419_v24  ;;  %v1244_v39 = vadd.f32 %v1238_v9, %v1172_v28  ;;  %v1137_v30 = vrot.slane %v1043_v35, %v4594_v2 }
 0x237   :  { %v1276_v34 = vadd.f32 %v1270_v15, %v1204_v4  ;;  %v1387_v48 = vadd.f32 %v3523_v27, %v1315_v33  ;;  %v1090_v54 = vmul.f32 %v3263_v21, %v1065_v56  ;;  %v1106_v41 = vmul.f32 %v3261_v42, %v1065_v56  ;;  %v3790_v15 = vpop.permute.xlu0 %1044 }
 0x238   :  { %v1095_v36 = vmul.f32 %v3263_v21, %v1085_v59  ;;  %v1316_v43 = vadd.f32 %v1310_v63, %v1244_v39  ;;  %v1111_v12 = vmul.f32 %v3261_v42, %v1085_v59  ;;  %v1122_v47 = vmul.f32 %v3337_v1, %v1065_v56 }
 0x239   :  { %v1348_v18 = vadd.f32 %v1342_v44, %v1276_v34  ;;  %v1157_v9 = vrot.slane %v1038_v11, %v4594_v2  ;;  %v1162_v24 = vmul.f32 %v3357_v20, %v1137_v30  ;;  %v1178_v27 = vmul.f32 %v3341_v60, %v1137_v30 }
 0x23a   :  { %v1194_v33 = vmul.f32 %v3346_v40, %v1137_v30  ;;  %v1127_v28 = vmul.f32 %v3337_v1, %v1085_v59  ;;  %v3797_v34 = vrot.slane %v1043_v35, %v4597_v8  ;;  %v3800_v42 = vrot.slane %v1038_v11, %v4597_v8 }
 0x23b   :  { %v3793_v21 = vadd.f32 %v3544_v26, %v1348_v18  ;;  %v1167_v4 = vmul.f32 %v3357_v20, %v1157_v9  ;;  %v1168_v63 = vadd.f32 %v1162_v24, %v1090_v54  ;;  %v1183_v44 = vmul.f32 %v3341_v60, %v1157_v9  ;;  %v1047_v54 = vpop.permute.xlu1 %1046 }
 0x23c   :  { %v3804_v56 = vadd.f32 %v1178_v27, %v1106_v41  ;;  %v1199_v39 = vmul.f32 %v3346_v40, %v1157_v9  ;;  %v1200_v30 = vadd.f32 %v1194_v33, %v1122_v47  ;;  %v1234_v26 = vmul.f32 %v3361_v50, %v3797_v34  ;;  %v1049_v9 = vpop.permute.xlu0 %1048 }
 0x23d   :  { %4658 = vst [vmem:[#allocation73_spill] sm:$0xff] %v3793_v21  ;;  %v1239_v1 = vmul.f32 %v3361_v50, %v3800_v42  ;;  %v1173_v59 = vadd.f32 %v1167_v4, %v1095_v36  ;;  %v3811_v18 = vadd.f32 %v1183_v44, %v1111_v12  ;;  %v1266_v20 = vmul.f32 %v3350_v25, %v3797_v34 }
 0x23e   :  { %v1271_v60 = vmul.f32 %v3350_v25, %v3800_v42  ;;  %v1205_v41 = vadd.f32 %v1199_v39, %v1127_v28  ;;  %v1240_v24 = vadd.f32 %v1234_v26, %v1168_v63  ;;  %v3818_v40 = vrot.slane %v1043_v35, %v4603_v52 }
 0x23f   :  { %v3821_v47 = vrot.slane %v1038_v11, %v4603_v52  ;;  %v1459_v50 = vadd.f32 %v3483_v38, %v1387_v48  ;;  %v1245_v36 = vadd.f32 %v1239_v1, %v1173_v59  ;;  %v1272_v12 = vadd.f32 %v1266_v20, %v1200_v30 }
 0x240   :  { %v1529_v27 = vadd.f32 %v3579_v10, %v3718_v57  ;;  %v1277_v33 = vadd.f32 %v1271_v60, %v1205_v41  ;;  %v1306_v25 = vmul.f32 %v3353_v6, %v3818_v40  ;;  %v1338_v35 = vmul.f32 %v3365_v3, %v3818_v40  ;;  %v1053_v20 = vpop.permute.xlu0 %1052 }
 0x241   :  { %v1311_v28 = vmul.f32 %v3353_v6, %v3821_v47  ;;  %v3833_v11 = vadd.f32 %v3526_v37, %v1316_v43  ;;  %v1343_v38 = vmul.f32 %v3365_v3, %v3821_v47  ;;  %v1561_v48 = vadd.f32 %v3495_v31, %v3706_v55  ;;  %v1051_v31 = vpop.permute.xlu1 %1050 }
 0x242   :  { %v1059_v10 = vsel %vm82_vm1, %v1047_v54, %v1049_v9  ;;  %v1312_v57 = vadd.f32 %v1306_v25, %v1240_v24  ;;  %v1344_v63 = vadd.f32 %v1338_v35, %v1272_v12  ;;  %v1060_v6 = vsel %vm82_vm1, %v3790_v15, %v1047_v54  ;;  %v4664_v24 = vld [vmem:[#allocation62_spill] sm:$0xff] }
 0x243   :  { %v1317_v4 = vadd.f32 %v1311_v28, %v1245_v36  ;;  %v1349_v44 = vadd.f32 %v1343_v38, %v1277_v33  ;;  %v3845_v37 = vrot.slane %v1060_v6, %v4600_v17  ;;  %v3848_v43 = vrot.slane %v1059_v10, %v4600_v17  ;;  %v4665_v36 = vld [vmem:[#allocation31_spill] sm:$0xff] }
 0x244   :  { %v3851_v3 = vrot.slane %v1060_v6, %v4594_v2  ;;  %v1384_v55 = vadd.f32 %v3510_v23, %v1312_v57  ;;  %v1601_v30 = vadd.f32 %v3603_v51, %v1529_v27  ;;  %v3857_v26 = vrot.slane %v1059_v10, %v4594_v2  ;;  %v4662_v51 = vld [vmem:[#allocation37_spill] sm:$0xff]  ;;  %v4666_v27 = vld [vmem:[#allocation44_spill] sm:$0xff] }
 0x245   :  { %4659 = vst [vmem:[#allocation74_spill] sm:$0xff] %v3845_v37  ;;  %4660 = vst [vmem:[#allocation75_spill] sm:$0xff] %v3848_v43  ;;  %v1389_v39 = vadd.f32 %v3529_v7, %v1317_v4  ;;  %v3860_v1 = vadd.f32 %v3532_v13, %v1344_v63  ;;  %v1421_v59 = vadd.f32 %v3547_v32, %v1349_v44  ;;  %v4671_v57 = vld [vmem:[#allocation65_spill] sm:$0xff]  ;;  %v4673_v63 = vld [vmem:[#allocation34_spill] sm:$0xff] }
 0x246   :  { %4661 = vst [vmem:[#allocation76_spill] sm:$0xff] %v3857_v26  ;;  %v1633_v60 = vadd.f32 %v3640_v62, %v1561_v48  ;;  %v1667_v54 = vmul.f32 %v3433_v46, %v3848_v43  ;;  %v1456_v23 = vadd.f32 %v3470_v19, %v1384_v55  ;;  %v1666_v7 = vmul.f32 %v3433_v46, %v3845_v37  ;;  %v4667_v19 = vld [vmem:[#allocation32_spill] sm:$0xff]  ;;  %v4674_v55 = vld [vmem:[#allocation61_spill] sm:$0xff] }
 0x247   :  { %v3871_v41 = vmul.f32 %v4662_v51, %v3845_v37  ;;  %v1699_v13 = vmul.f32 %v4662_v51, %v3848_v43  ;;  %v1461_v32 = vadd.f32 %v4664_v24, %v1389_v39  ;;  %v1493_v12 = vadd.f32 %v4665_v36, %v1421_v59  ;;  %v1055_v59 = vpop.permute.xlu1 %1054  ;;  %v4676_v24 = vld [vmem:[#allocation17_spill] sm:$0xff] }
 0x248   :  { %v3877_v62 = vadd.f32 %v1667_v54, %v1601_v30  ;;  %v3881_v33 = vmul.f32 %v4666_v27, %v3851_v3  ;;  %v1528_v25 = vadd.f32 %v4667_v19, %v1456_v23  ;;  %v3886_v28 = vmul.f32 %v4666_v27, %v3857_v26  ;;  %v3903_v30 = vpop.permute.xlu0 %1879  ;;  %v4675_v54 = vld [vmem:[#allocation25_spill] sm:$0xff] }
 0x249   :  { %4663 = vst [vmem:[#allocation37_spill] sm:$0xff] %v3871_v41  ;;  %v3889_v35 = vrot.slane %v1060_v6, %v4597_v8  ;;  %v3892_v38 = vrot.slane %v1059_v10, %v4597_v8  ;;  %v3894_v48 = vadd.f32 %v1699_v13, %v1633_v60  ;;  %v3898_v4 = vmul.f32 %v4671_v57, %v3857_v26 }
 0x24a   :  { %v1531_v44 = vadd.f32 %v4673_v63, %v1459_v50  ;;  %v1563_v39 = vadd.f32 %v4674_v55, %v3775_v5  ;;  %v1600_v23 = vadd.f32 %v4675_v54, %v1528_v25  ;;  %v3911_v60 = vrot.slane %v1060_v6, %v4603_v52  ;;  %v4678_v5 = vld [vmem:[#allocation66_spill] sm:$0xff]  ;;  %v4680_v6 = vld [vmem:[#allocation27_spill] sm:$0xff] }
 0x24b   :  { %4668 = vst [vmem:[#allocation62_spill] sm:$0xff] %v3889_v35  ;;  %4669 = vst [vmem:[#allocation31_spill] sm:$0xff] %v3892_v38  ;;  %v3908_v36 = vmul.f32 %v4676_v24, %v3889_v35  ;;  %v3914_v13 = vrot.slane %v1059_v10, %v4603_v52  ;;  %v3918_v50 = vmul.f32 %v4676_v24, %v3892_v38  ;;  %v3971_v21 = vpop.permute.xlu1 %1911  ;;  %v4691_v35 = vld [vmem:[#allocation38_spill] sm:$0xff] }
 0x24c   :  { %4670 = vst [vmem:[#allocation44_spill] sm:$0xff] %v3894_v48  ;;  %4672 = vst [vmem:[#allocation32_spill] sm:$0xff] %v3898_v4  ;;  %v1635_v19 = vadd.f32 %v4678_v5, %v1563_v39  ;;  %v1057_v63 = vsel %vm82_vm1, %v1051_v31, %v1053_v20  ;;  %v1058_v25 = vsel %vm82_vm1, %v1049_v9, %v1051_v31 }
 0x24d   :  { %4677 = vst [vmem:[#allocation65_spill] sm:$0xff] %v3911_v60  ;;  %v3927_v55 = vmul.f32 %v3782_v22, %v3892_v38  ;;  %v1603_v54 = vadd.f32 %v4680_v6, %v1531_v44  ;;  %v3931_v10 = vrot.slane %v1058_v25, %v4600_v17  ;;  %v3934_v26 = vrot.slane %v1057_v63, %v4600_v17 }
 0x24e   :  { %v1672_v43 = vadd.f32 %v1666_v7, %v1600_v23  ;;  %v3937_v39 = vrot.slane %v1058_v25, %v4594_v2  ;;  %v3940_v5 = vrot.slane %v1057_v63, %v4594_v2  ;;  %v3943_v9 = vrot.slane %v1057_v63, %v4597_v8  ;;  %4687 = vst [vmem:[#allocation78_spill] sm:$0xff] %v3971_v21 }
 0x24f   :  { %4679 = vst [vmem:[#allocation34_spill] sm:$0xff] %v3927_v55  ;;  %4681 = vst [vmem:[#allocation61_spill] sm:$0xff] %v3931_v10  ;;  %v1669_v31 = vmul.f32 %v3433_v46, %v3934_v26  ;;  %v1701_v44 = vmul.f32 %v4662_v51, %v3934_v26  ;;  %v3950_v6 = vrot.slane %v1058_v25, %v4597_v8 }
 0x250   :  { %4682 = vst [vmem:[#allocation25_spill] sm:$0xff] %v3934_v26  ;;  %4683 = vst [vmem:[#allocation17_spill] sm:$0xff] %v3940_v5  ;;  %v3953_v7 = vrot.slane %v1058_v25, %v4603_v52  ;;  %v3957_v23 = vmul.f32 %v3433_v46, %v3931_v10  ;;  %v3961_v38 = vmul.f32 %v4662_v51, %v3931_v10  ;;  %v1320_v25 = vpop.permute.xlu0 %1319 }
 0x251   :  { %4684 = vst [vmem:[#allocation66_spill] sm:$0xff] %v3943_v9  ;;  %v3965_v37 = vmul.f32 %v4666_v27, %v3940_v5  ;;  %v3969_v26 = vmul.f32 %v4671_v57, %v3940_v5  ;;  %v3973_v55 = vadd.f32 %v1669_v31, %v1603_v54  ;;  %v3977_v41 = vmul.f32 %v4676_v24, %v3943_v9 }
 0x252   :  { %4685 = vst [vmem:[#allocation27_spill] sm:$0xff] %v3961_v38  ;;  %v3981_v10 = vmul.f32 %v3782_v22, %v3943_v9  ;;  %v4689_v38 = vld [vmem:[#allocation30_spill] sm:$0xff]  ;;  %v3984_v48 = vadd.f32 %v1701_v44, %v1635_v19  ;;  %v1565_v5 = vadd.f32 %v4691_v35, %v1493_v12  ;;  %v1061_v54 = vsel %vm82_vm1, %v1055_v59, %v3790_v15  ;;  %v4694_v12 = vld [vmem:[#allocation28_spill] sm:$0xff] }
 0x253   :  { %4686 = vst [vmem:[#allocation77_spill] sm:$0xff] %v3969_v26  ;;  %v1533_v4 = vadd.f32 %v4689_v38, %v1461_v32  ;;  %v1056_v26 = vsel %vm82_vm1, %v1053_v20, %v1055_v59  ;;  %v3993_v31 = vrot.slane %v1057_v63, %v4603_v52  ;;  %v3999_v9 = vrot.slane %v1061_v54, %v4600_v17 }
 0x254   :  { %4688 = vst [vmem:[#allocation79_spill] sm:$0xff] %v3981_v10  ;;  %4690 = vst [vmem:[#allocation30_spill] sm:$0xff] %v3984_v48  ;;  %v3996_v21 = vrot.slane %v1056_v26, %v4600_v17  ;;  %v4002_v32 = vmul.f32 %v1320_v25, %v3818_v40  ;;  %v1637_v20 = vadd.f32 %v3713_v49, %v1565_v5 }
 0x255   :  { %4693 = vst [vmem:[#allocation80_spill] sm:$0xff] %v3999_v9  ;;  %v1605_v35 = vadd.f32 %v4694_v12, %v1533_v4  ;;  %v4007_v38 = vrot.slane %v1061_v54, %v4594_v2  ;;  %v4010_v15 = vrot.slane %v1061_v54, %v4597_v8  ;;  %v1671_v59 = vmul.f32 %v3433_v46, %v3999_v9 }
 0x256   :  { %4692 = vst [vmem:[#allocation38_spill] sm:$0xff] %v3996_v21  ;;  %v1703_v17 = vmul.f32 %v4662_v51, %v3999_v9  ;;  %v4017_v19 = vrot.slane %v1056_v26, %v4594_v2  ;;  %v4020_v40 = vrot.slane %v1056_v26, %v4597_v8  ;;  %v4024_v49 = vmul.f32 %v3433_v46, %v3996_v21  ;;  %v1248_v2 = vpop.permute.xlu1 %1247 }
 0x257   :  { %4695 = vst [vmem:[#allocation28_spill] sm:$0xff] %v4007_v38  ;;  %4696 = vst [vmem:[#allocation81_spill] sm:$0xff] %v4010_v15  ;;  %v4028_v4 = vmul.f32 %v4662_v51, %v3996_v21  ;;  %v4032_v63 = vmul.f32 %v4666_v27, %v4007_v38  ;;  %v4036_v5 = vmul.f32 %v4671_v57, %v4007_v38  ;;  %v4701_v38 = vld [vmem:[#allocation14_spill] sm:$0xff] }
 0x258   :  { %v4038_v44 = vadd.f32 %v1671_v59, %v1605_v35  ;;  %v4040_v8 = vadd.f32 %v1703_v17, %v1637_v20  ;;  %v4044_v46 = vmul.f32 %v4676_v24, %v4010_v15  ;;  %v4048_v51 = vmul.f32 %v3782_v22, %v4010_v15 }
 0x259   :  { %4697 = vst [vmem:[#allocation82_spill] sm:$0xff] %v4028_v4  ;;  %4698 = vst [vmem:[#allocation83_spill] sm:$0xff] %v4036_v5  ;;  %v4051_v12 = vrot.slane %v1056_v26, %v4603_v52  ;;  %v4054_v53 = vrot.slane %v1061_v54, %v4603_v52  ;;  %v1323_v4 = vmul.f32 %v1320_v25, %v4701_v38  ;;  %v4703_v26 = vld [vmem:[#allocation68_spill] sm:$0xff]  ;;  %v1536_v38 = vpop.permute.xlu0 %1535 }
 0x25a   :  { %4699 = vst [vmem:[#allocation84_spill] sm:$0xff] %v4040_v8  ;;  %4700 = vst [vmem:[#allocation85_spill] sm:$0xff] %v4048_v51  ;;  %v1324_v35 = vmul.f32 %v1320_v25, %v3674_v16  ;;  %v1325_v20 = vmul.f32 %v1320_v25, %v3722_v45  ;;  %v1744_v59 = vadd.f32 %v3881_v33, %v1672_v43  ;;  %v4702_v51 = vld [vmem:[#allocation13_spill] sm:$0xff]  ;;  %v4704_v8 = vld [vmem:[#allocation67_spill] sm:$0xff] }
 0x25b   :  { %v1882_v17 = vmul.f32 %v3903_v30, %v3911_v60  ;;  %v1250_v15 = vmul.f32 %v1248_v2, %v3797_v34  ;;  %v1251_v9 = vmul.f32 %v1248_v2, %v4702_v51  ;;  %v1252_v5 = vmul.f32 %v1248_v2, %v4703_v26  ;;  %v4705_v26 = vld [vmem:[#allocation72_spill] sm:$0xff] }
 0x25c   :  { %v1253_v52 = vmul.f32 %v1248_v2, %v3703_v29  ;;  %v1254_v54 = vmul.f32 %v1248_v2, %v3740_v61  ;;  %v1326_v16 = vmul.f32 %v1320_v25, %v3745_v14  ;;  %v1816_v45 = vadd.f32 %v3908_v36, %v1744_v59  ;;  %v4706_v14 = vld [vmem:[#allocation46_spill] sm:$0xff]  ;;  %v1392_v36 = vpop.permute.xlu1 %1391 }
 0x25d   :  { %v1255_v43 = vmul.f32 %v1248_v2, %v3800_v42  ;;  %v1256_v33 = vadd.f32 %v1250_v15, %v3804_v56  ;;  %v1257_v21 = vadd.f32 %v1251_v9, %v4704_v8  ;;  %v1258_v34 = vadd.f32 %v1252_v5, %v3692_v0  ;;  %v4707_v42 = vld [vmem:[#allocation16_spill] sm:$0xff]  ;;  %v4708_v56 = vld [vmem:[#allocation58_spill] sm:$0xff]  ;;  %v4709_v0 = vld [vmem:[#allocation63_spill] sm:$0xff] }
 0x25e   :  { %v1259_v51 = vadd.f32 %v1253_v52, %v3724_v58  ;;  %v1260_v10 = vadd.f32 %v1254_v54, %v4705_v26  ;;  %v1327_v29 = vmul.f32 %v1320_v25, %v3821_v47  ;;  %v1888_v61 = vadd.f32 %v1882_v17, %v1816_v45  ;;  %v4710_v47 = vld [vmem:[#allocation43_spill] sm:$0xff]  ;;  %v4713_v59 = vld [vmem:[#allocation70_spill] sm:$0xff] }
 0x25f   :  { %v1261_v48 = vadd.f32 %v1255_v43, %v3811_v18  ;;  %v4078_v60 = vmul.f32 %v1536_v38, %v4706_v14  ;;  %v4081_v2 = vmul.f32 %v1536_v38, %v4707_v42  ;;  %v4084_v9 = vmul.f32 %v1536_v38, %v4708_v56  ;;  %v4711_v25 = vld [vmem:[#allocation51_spill] sm:$0xff]  ;;  %v4714_v17 = vld [vmem:[#allocation50_spill] sm:$0xff]  ;;  %v4715_v43 = vld [vmem:[#allocation33_spill] sm:$0xff] }
 0x260   :  { %v4087_v15 = vmul.f32 %v1536_v38, %v4709_v0  ;;  %v1745_v58 = vadd.f32 %v3886_v28, %v3877_v62  ;;  %1926 = vrot.lane.b32.xlu1 %v1888_v61, %s2291_s5  ;;  %v4093_v18 = vmul.f32 %v1536_v38, %v4710_v47  ;;  %v4096_v5 = vmul.f32 %v1536_v38, %v4711_v25  ;;  %v4716_v14 = vld [vmem:[#allocation52_spill] sm:$0xff]  ;;  %v4718_v47 = vld [vmem:[#allocation35_spill] sm:$0xff] }
 0x261   :  { %v1883_v8 = vmul.f32 %v3903_v30, %v3914_v13  ;;  %v1458_v52 = vadd.f32 %v4714_v17, %v4713_v59  ;;  %v1740_v45 = vmul.f32 %v4666_v27, %v3937_v39  ;;  %v1812_v62 = vmul.f32 %v4676_v24, %v3950_v6 }
 0x262   :  { %4712 = vst [vmem:[#allocation14_spill] sm:$0xff] %v4096_v5  ;;  %v1817_v54 = vadd.f32 %v3918_v50, %v1745_v58  ;;  %v1747_v28 = vadd.f32 %v3965_v37, %v3973_v55  ;;  %v1884_v26 = vmul.f32 %v3903_v30, %v3953_v7  ;;  %v1885_v61 = vmul.f32 %v3903_v30, %v3993_v31  ;;  %v4717_v37 = vld [vmem:[#allocation26_spill] sm:$0xff] }
 0x263   :  { %v1530_v38 = vadd.f32 %v4715_v43, %v1458_v52  ;;  %v1460_v50 = vadd.f32 %v4716_v14, %v3833_v11  ;;  %v1742_v0 = vmul.f32 %v4666_v27, %v4017_v19  ;;  %v1328_v58 = vadd.f32 %v4002_v32, %v1256_v33  ;;  %v1464_v52 = vpop.permute.xlu1 %1463  ;;  %v4720_v27 = vld [vmem:[#allocation40_spill] sm:$0xff]  ;;  %v4721_v32 = vld [vmem:[#allocation19_spill] sm:$0xff] }
 0x264   :  { %v1889_v42 = vadd.f32 %v1883_v8, %v1817_v54  ;;  %v1819_v56 = vadd.f32 %v3977_v41, %v1747_v28  ;;  %v1329_v59 = vadd.f32 %v1323_v4, %v1257_v21  ;;  %v1330_v17 = vadd.f32 %v1324_v35, %v1258_v34  ;;  %v4719_v54 = vld [vmem:[#allocation64_spill] sm:$0xff]  ;;  %v4724_v4 = vld [vmem:[#allocation53_spill] sm:$0xff] }
 0x265   :  { %v1602_v55 = vadd.f32 %v4717_v37, %v1530_v38  ;;  %v1532_v25 = vadd.f32 %v4718_v47, %v1460_v50  ;;  %v1331_v5 = vadd.f32 %v1325_v20, %v1259_v51  ;;  %v1332_v11 = vadd.f32 %v1326_v16, %v1260_v10  ;;  %v4722_v38 = vld [vmem:[#allocation48_spill] sm:$0xff]  ;;  %v4725_v34 = vld [vmem:[#allocation45_spill] sm:$0xff] }
 0x266   :  { %1928 = vrot.lane.b32.xlu1 %v1889_v42, %s2291_s5  ;;  %v1891_v43 = vadd.f32 %v1885_v61, %v1819_v56  ;;  %v1333_v8 = vadd.f32 %v1327_v29, %v1261_v48  ;;  %v1394_v14 = vmul.f32 %v1392_v36, %v4720_v27  ;;  %v1395_v33 = vmul.f32 %v1392_v36, %v4721_v32  ;;  %v4723_v50 = vld [vmem:[#allocation60_spill] sm:$0xff] }
 0x267   :  { %v1674_v41 = vadd.f32 %v3957_v23, %v1602_v55  ;;  %v1604_v28 = vadd.f32 %v4719_v54, %v1532_v25  ;;  %v1396_v37 = vmul.f32 %v1392_v36, %v4722_v38  ;;  %v1397_v21 = vmul.f32 %v1392_v36, %v4723_v50  ;;  %v4726_v25 = vld [vmem:[#allocation18_spill] sm:$0xff]  ;;  %v4734_v38 = vld [vmem:[#allocation12_spill] sm:$0xff] }
 0x268   :  { %v1398_v35 = vmul.f32 %v1392_v36, %v4724_v4  ;;  %v1399_v42 = vmul.f32 %v1392_v36, %v4725_v34  ;;  %v1814_v48 = vmul.f32 %v4676_v24, %v4020_v40  ;;  %v1886_v23 = vmul.f32 %v3903_v30, %v4051_v12  ;;  %v4737_v4 = vld [vmem:[#allocation78_spill] sm:$0xff] }
 0x269   :  { %v1746_v61 = vadd.f32 %v1740_v45, %v1674_v41  ;;  %v1676_v10 = vadd.f32 %v4024_v49, %v1604_v28  ;;  %v1400_v20 = vadd.f32 %v1394_v14, %v1328_v58  ;;  %v1401_v16 = vadd.f32 %v1395_v33, %v1329_v59  ;;  %v1608_v45 = vpop.permute.xlu1 %1607  ;;  %v4731_v28 = vld [vmem:[#allocation23_spill] sm:$0xff] }
 0x26a   :  { %1932 = vrot.lane.b32.xlu1 %v1891_v43, %s2291_s5  ;;  %v1402_v51 = vadd.f32 %v1396_v37, %v1330_v17  ;;  %v1403_v29 = vadd.f32 %v1397_v21, %v1331_v5  ;;  %v1404_v47 = vadd.f32 %v1398_v35, %v1332_v11  ;;  %v1749_v36 = vadd.f32 %v4032_v63, %v4038_v44  ;;  %v4728_v43 = vld [vmem:[#allocation49_spill] sm:$0xff]  ;;  %v4729_v63 = vld [vmem:[#allocation20_spill] sm:$0xff]  ;;  %v4732_v14 = vld [vmem:[#allocation39_spill] sm:$0xff] }
 0x26b   :  { %v1818_v56 = vadd.f32 %v1812_v62, %v1746_v61  ;;  %v1748_v55 = vadd.f32 %v1742_v0, %v1676_v10  ;;  %v1405_v49 = vadd.f32 %v1399_v42, %v1333_v8  ;;  %v1887_v24 = vmul.f32 %v3903_v30, %v4054_v53  ;;  %v4727_v62 = vld [vmem:[#allocation24_spill] sm:$0xff]  ;;  %v4730_v8 = vld [vmem:[#allocation22_spill] sm:$0xff]  ;;  %v4736_v21 = vld [vmem:[#allocation65_spill] sm:$0xff] }
 0x26c   :  { %v1488_v41 = vadd.f32 %v4726_v25, %v3860_v1  ;;  %v1770_v58 = vmul.f32 %v4671_v57, %v3851_v3  ;;  %v1821_v5 = vadd.f32 %v4044_v46, %v1749_v36  ;;  %v1466_v0 = vmul.f32 %v1464_v52, %v4727_v62  ;;  %v4735_v37 = vld [vmem:[#allocation62_spill] sm:$0xff]  ;;  %v4744_v62 = vld [vmem:[#allocation59_spill] sm:$0xff] }
 0x26d   :  { %v1890_v59 = vadd.f32 %v1884_v26, %v1818_v56  ;;  %v1820_v17 = vadd.f32 %v1814_v48, %v1748_v55  ;;  %v1467_v44 = vmul.f32 %v1464_v52, %v4729_v63  ;;  %v1468_v54 = vmul.f32 %v1464_v52, %v4730_v8  ;;  %v4733_v26 = vld [vmem:[#allocation56_spill] sm:$0xff]  ;;  %v4740_v55 = vld [vmem:[#allocation37_spill] sm:$0xff] }
 0x26e   :  { %v1560_v11 = vadd.f32 %v4728_v43, %v1488_v41  ;;  %v1469_v30 = vmul.f32 %v1464_v52, %v4731_v28  ;;  %v1893_v27 = vadd.f32 %v1887_v24, %v1821_v5  ;;  %v1470_v32 = vmul.f32 %v1464_v52, %v4732_v14  ;;  %v4738_v48 = vld [vmem:[#allocation44_spill] sm:$0xff]  ;;  %v4741_v41 = vld [vmem:[#allocation71_spill] sm:$0xff] }
 0x26f   :  { %1930 = vrot.lane.b32.xlu0 %v1890_v59, %s2291_s5  ;;  %v1892_v1 = vadd.f32 %v1886_v23, %v1820_v17  ;;  %v1471_v33 = vmul.f32 %v1464_v52, %v4733_v26  ;;  %v1842_v50 = vmul.f32 %v3782_v22, %v4735_v37  ;;  %v1914_v35 = vmul.f32 %v4737_v4, %v4736_v21  ;;  %v4739_v23 = vld [vmem:[#allocation32_spill] sm:$0xff]  ;;  %v1680_v52 = vpop.permute.xlu1 %1679  ;;  %v4749_v14 = vld [vmem:[#allocation15_spill] sm:$0xff]  ;;  %v4750_v26 = vld [vmem:[#allocation30_spill] sm:$0xff] }
 0x270   :  { %v1632_v46 = vadd.f32 %v4734_v38, %v1560_v11  ;;  %v4159_v34 = vadd.f32 %v1466_v0, %v1400_v20  ;;  %1936 = vrot.lane.b32.xlu1 %v1893_v27, %s2291_s5  ;;  %v1473_v42 = vadd.f32 %v1467_v44, %v1401_v16  ;;  %v1474_v61 = vadd.f32 %v1468_v54, %v1402_v51  ;;  %v4742_v20 = vld [vmem:[#allocation54_spill] sm:$0xff]  ;;  %v4745_v11 = vld [vmem:[#allocation21_spill] sm:$0xff]  ;;  %v4747_v54 = vld [vmem:[#allocation47_spill] sm:$0xff] }
 0x271   :  { %v4162_v10 = vadd.f32 %v1469_v30, %v1403_v29  ;;  %v1777_v56 = vadd.f32 %v4739_v23, %v4738_v48  ;;  %v4167_v24 = vadd.f32 %v1470_v32, %v1404_v47  ;;  %v1915_v25 = vmul.f32 %v4737_v4, %v3914_v13  ;;  %v4743_v51 = vld [vmem:[#allocation34_spill] sm:$0xff]  ;;  %v4748_v30 = vld [vmem:[#allocation55_spill] sm:$0xff] }
 0x272   :  { %v1704_v36 = vadd.f32 %v4740_v55, %v1632_v46  ;;  %v1490_v59 = vadd.f32 %v4742_v20, %v4741_v41  ;;  %v4174_v16 = vadd.f32 %v1471_v33, %v1405_v49  ;;  %v1772_v17 = vmul.f32 %v4671_v57, %v3937_v39  ;;  %v4746_v49 = vld [vmem:[#allocation41_spill] sm:$0xff]  ;;  %v4753_v23 = vld [vmem:[#allocation42_spill] sm:$0xff] }
 0x273   :  { %1934 = vrot.lane.b32.xlu0 %v1892_v1, %s2291_s5  ;;  %v1849_v29 = vadd.f32 %v4743_v51, %v1777_v56  ;;  %v1844_v5 = vmul.f32 %v3782_v22, %v3950_v6  ;;  %v1916_v43 = vmul.f32 %v4737_v4, %v3953_v7  ;;  %v4185_v63 = vmul.f32 %v1608_v45, %v4745_v11  ;;  %v4752_v46 = vld [vmem:[#allocation57_spill] sm:$0xff]  ;;  %v4204_v41 = vpop.permute.xlu1 %1823 }
 0x274   :  { %v1776_v47 = vadd.f32 %v1770_v58, %v1704_v36  ;;  %v1562_v0 = vadd.f32 %v4744_v62, %v1490_v59  ;;  %v1611_v8 = vmul.f32 %v1608_v45, %v4746_v49  ;;  %v1612_v28 = vmul.f32 %v1608_v45, %v4747_v54  ;;  %v4751_v58 = vld [vmem:[#allocation77_spill] sm:$0xff]  ;;  %v4755_v36 = vld [vmem:[#allocation36_spill] sm:$0xff]  ;;  %v4756_v59 = vld [vmem:[#allocation27_spill] sm:$0xff] }
 0x275   :  { %v1921_v44 = vadd.f32 %v1915_v25, %v1849_v29  ;;  %v1613_v1 = vmul.f32 %v1608_v45, %v4748_v30  ;;  %v1779_v33 = vadd.f32 %v4751_v58, %v4750_v26  ;;  %v1917_v38 = vmul.f32 %v4737_v4, %v3993_v31  ;;  %v4754_v55 = vld [vmem:[#allocation73_spill] sm:$0xff]  ;;  %v4757_v29 = vld [vmem:[#allocation79_spill] sm:$0xff]  ;;  %v4217_v30 = vpop.permute.xlu0 %1751 }
 0x276   :  { %v1848_v27 = vadd.f32 %v1842_v50, %v1776_v47  ;;  %v1634_v32 = vadd.f32 %v4749_v14, %v1562_v0  ;;  %v1614_v48 = vmul.f32 %v1608_v45, %v4752_v46  ;;  %v4198_v56 = vmul.f32 %v1608_v45, %v4753_v23  ;;  %v4758_v0 = vld [vmem:[#allocation29_spill] sm:$0xff]  ;;  %v4760_v54 = vld [vmem:[#allocation75_spill] sm:$0xff]  ;;  %v4764_v46 = vld [vmem:[#allocation38_spill] sm:$0xff] }
 0x277   :  { %1952 = vrot.lane.b32.xlu1 %v1921_v44, %s2292_s6  ;;  %v1492_v25 = vadd.f32 %v4755_v36, %v4754_v55  ;;  %v1774_v50 = vmul.f32 %v4671_v57, %v4017_v19  ;;  %v1851_v47 = vadd.f32 %v4757_v29, %v1779_v33  ;;  %v1846_v62 = vmul.f32 %v3782_v22, %v4020_v40  ;;  %v4759_v44 = vld [vmem:[#allocation74_spill] sm:$0xff]  ;;  %v4761_v14 = vld [vmem:[#allocation61_spill] sm:$0xff]  ;;  %v4765_v55 = vld [vmem:[#allocation84_spill] sm:$0xff] }
 0x278   :  { %v1920_v20 = vadd.f32 %v1914_v35, %v1848_v27  ;;  %v1706_v51 = vadd.f32 %v4756_v59, %v1634_v32  ;;  %v1918_v45 = vmul.f32 %v4737_v4, %v4051_v12  ;;  %v4214_v49 = vmul.f32 %v1680_v52, %v4759_v44  ;;  %v4762_v26 = vld [vmem:[#allocation25_spill] sm:$0xff]  ;;  %v4766_v36 = vld [vmem:[#allocation83_spill] sm:$0xff] }
 0x279   :  { %v1564_v11 = vadd.f32 %v4758_v0, %v1492_v25  ;;  %v1683_v57 = vmul.f32 %v1680_v52, %v4760_v54  ;;  %v1923_v27 = vadd.f32 %v1917_v38, %v1851_v47  ;;  %v1684_v32 = vmul.f32 %v1680_v52, %v4761_v14  ;;  %v4763_v58 = vld [vmem:[#allocation69_spill] sm:$0xff]  ;;  %v4767_v0 = vld [vmem:[#allocation80_spill] sm:$0xff]  ;;  %v1896_v54 = vpop.permute.xlu1 %1895 }
 0x27a   :  { %1950 = vrot.lane.b32.xlu0 %v1920_v20, %s2292_s6  ;;  %v1778_v35 = vadd.f32 %v1772_v17, %v1706_v51  ;;  %v1685_v22 = vmul.f32 %v1680_v52, %v4762_v26  ;;  %v1686_v23 = vmul.f32 %v1680_v52, %v4764_v46  ;;  %v1781_v25 = vadd.f32 %v4766_v36, %v4765_v55  ;;  %v4768_v51 = vld [vmem:[#allocation82_spill] sm:$0xff]  ;;  %v4770_v26 = vld [vmem:[#allocation76_spill] sm:$0xff]  ;;  %v4772_v46 = vld [vmem:[#allocation17_spill] sm:$0xff] }
 0x27b   :  { %v1636_v33 = vadd.f32 %v4763_v58, %v1564_v11  ;;  %v1545_v59 = vadd.f32 %v4081_v2, %v1473_v42  ;;  %1956 = vrot.lane.b32.xlu1 %v1923_v27, %s2292_s6  ;;  %v1687_v20 = vmul.f32 %v1680_v52, %v4767_v0  ;;  %v1919_v17 = vmul.f32 %v4737_v4, %v4054_v53  ;;  %v4769_v11 = vld [vmem:[#allocation85_spill] sm:$0xff]  ;;  %v4771_v52 = vld [vmem:[#allocation31_spill] sm:$0xff] }
 0x27c   :  { %v1850_v29 = vadd.f32 %v1844_v5, %v1778_v35  ;;  %v1546_v38 = vadd.f32 %v4084_v9, %v1474_v61  ;;  %v1853_v44 = vadd.f32 %v4769_v11, %v1781_v25  ;;  %v1755_v58 = vmul.f32 %v4217_v30, %v4770_v26  ;;  %v4775_v11 = vld [vmem:[#allocation28_spill] sm:$0xff] }
 0x27d   :  { %v1708_v47 = vadd.f32 %v4768_v51, %v1636_v33  ;;  %v1617_v14 = vadd.f32 %v1611_v8, %v1545_v59  ;;  %v1756_v5 = vmul.f32 %v4217_v30, %v3937_v39  ;;  %v1827_v35 = vmul.f32 %v4204_v41, %v4771_v52 }
 0x27e   :  { %v1922_v2 = vadd.f32 %v1916_v43, %v1850_v29  ;;  %v1618_v42 = vadd.f32 %v1612_v28, %v1546_v38  ;;  %v1925_v27 = vadd.f32 %v1919_v17, %v1853_v44  ;;  %v1828_v61 = vmul.f32 %v4204_v41, %v3950_v6  ;;  %v4776_v44 = vld [vmem:[#allocation81_spill] sm:$0xff] }
 0x27f   :  { %v1780_v4 = vadd.f32 %v1774_v50, %v1708_v47  ;;  %v1689_v9 = vadd.f32 %v1683_v57, %v1617_v14  ;;  %v1899_v33 = vmul.f32 %v1896_v54, %v3914_v13  ;;  %v1547_v43 = vadd.f32 %v4087_v15, %v4162_v10  ;;  %v4773_v10 = vld [vmem:[#allocation66_spill] sm:$0xff] }
 0x280   :  { %1954 = vrot.lane.b32.xlu0 %v1922_v2, %s2292_s6  ;;  %v1690_v8 = vadd.f32 %v1684_v32, %v1618_v42  ;;  %v1548_v39 = vadd.f32 %v4093_v18, %v4167_v24  ;;  %1960 = vrot.lane.b32.xlu1 %v1925_v27, %s2292_s6  ;;  %v1900_v57 = vmul.f32 %v1896_v54, %v3953_v7 }
 0x281   :  { %v1852_v28 = vadd.f32 %v1846_v62, %v1780_v4  ;;  %v1761_v50 = vadd.f32 %v1755_v58, %v1689_v9  ;;  %v1757_v6 = vmul.f32 %v4217_v30, %v4772_v46  ;;  %v1619_v36 = vadd.f32 %v1613_v1, %v1547_v43 }
 0x282   :  { %v1762_v55 = vadd.f32 %v1756_v5, %v1690_v8  ;;  %v1620_v32 = vadd.f32 %v1614_v48, %v1548_v39  ;;  %v1758_v13 = vmul.f32 %v4217_v30, %v4017_v19  ;;  %v1829_v18 = vmul.f32 %v4204_v41, %v4773_v10 }
 0x283   :  { %v1924_v25 = vadd.f32 %v1918_v45, %v1852_v28  ;;  %v1833_v15 = vadd.f32 %v1827_v35, %v1761_v50  ;;  %v1830_v24 = vmul.f32 %v4204_v41, %v4020_v40  ;;  %v1691_v59 = vadd.f32 %v1685_v22, %v1619_v36  ;;  %v4774_v45 = vld [vmem:[#allocation14_spill] sm:$0xff]  ;;  %v1976_v35 = vpop.permute.xlu0 %1975  ;;  %v2168_v36 = vld [vmem:[#allocation2] sm:$0xff] }
 0x284   :  { %v1834_v62 = vadd.f32 %v1828_v61, %v1762_v55  ;;  %v1692_v7 = vadd.f32 %v1686_v23, %v1620_v32  ;;  %v1544_v29 = vadd.f32 %v4078_v60, %v4159_v34  ;;  %v1901_v48 = vmul.f32 %v1896_v54, %v3993_v31 }
 0x285   :  { %1958 = vrot.lane.b32.xlu0 %v1924_v25, %s2292_s6  ;;  %v1905_v1 = vadd.f32 %v1899_v33, %v1833_v15  ;;  %v1902_v19 = vmul.f32 %v1896_v54, %v4051_v12  ;;  %v1549_v0 = vadd.f32 %v4774_v45, %v4174_v16  ;;  %v1763_v38 = vadd.f32 %v1757_v6, %v1691_v59 }
 0x286   :  { %v1906_v17 = vadd.f32 %v1900_v57, %v1834_v62  ;;  %v1764_v51 = vadd.f32 %v1758_v13, %v1692_v7  ;;  %v1616_v40 = vadd.f32 %v4185_v63, %v1544_v29  ;;  %v1754_v60 = vmul.f32 %v4217_v30, %v3851_v3 }
 0x287   :  { %v1621_v22 = vadd.f32 %v4198_v56, %v1549_v0  ;;  %v1835_v34 = vadd.f32 %v1829_v18, %v1763_v38  ;;  %v1826_v31 = vmul.f32 %v4204_v41, %v4735_v37  ;;  %v1759_v16 = vmul.f32 %v4217_v30, %v4775_v11  ;;  %v2169_v38 = vld [vmem:[#allocation2 + $0x8] sm:$0xff] }
 0x288   :  { %v1836_v23 = vadd.f32 %v1830_v24, %v1764_v51  ;;  %v1688_v47 = vadd.f32 %v4214_v49, %v1616_v40  ;;  %v1831_v14 = vmul.f32 %v4204_v41, %v4776_v44  ;;  %v1898_v58 = vmul.f32 %v1896_v54, %v4736_v21  ;;  %v2172_v44 = vld [vmem:[#allocation2 + $0x18] sm:$0xff] }
 0x289   :  { %v1693_v12 = vadd.f32 %v1687_v20, %v1621_v22  ;;  %v1907_v63 = vadd.f32 %v1901_v48, %v1835_v34  ;;  %v1903_v2 = vmul.f32 %v1896_v54, %v4054_v53  ;;  %v2170_v22 = vld [vmem:[#allocation2 + $0x10] sm:$0xff] }
 0x28a   :  { %v1908_v26 = vadd.f32 %v1902_v19, %v1836_v23  ;;  %v1760_v56 = vadd.f32 %v1754_v60, %v1688_v47 }
 0x28b   :  { %v1765_v3 = vadd.f32 %v1759_v16, %v1693_v12 }
 0x28c   :  { %v1832_v42 = vadd.f32 %v1826_v31, %v1760_v56  ;;  %v2171_v31 = vld [vmem:[#allocation2 + $0x28] sm:$0xff] }
 0x28d   :  { %v1837_v49 = vadd.f32 %v1831_v14, %v1765_v3 }
 0x28e   :  { %v1904_v5 = vadd.f32 %v1898_v58, %v1832_v42 }
 0x28f   :  { %v1909_v52 = vadd.f32 %v1903_v2, %v1837_v49 }
 0x2d2   :  { %v1927_v37 = vpop.permute.xlu1 %1926 }
 0x2d8   :  { %v1929_v20 = vpop.permute.xlu1 %1928 }
 0x2d9   :  { %v1942_v28 = vsel %vm966_vm2, %v1927_v37, %v1929_v20 }
 0x2da   :  { %v1945_v46 = vadd.f32 %v1942_v28, %v1905_v1 }
 0x2dc   :  { %v1933_v4 = vpop.permute.xlu1 %1932 }
 0x2e1   :  { %v1931_v30 = vpop.permute.xlu0 %1930 }
 0x2e2   :  { %v1937_v27 = vpop.permute.xlu1 %1936  ;;  %v1941_v39 = vsel %vm966_vm2, %v1929_v20, %v1931_v30  ;;  %v1940_v13 = vsel %vm966_vm2, %v1931_v30, %v1933_v4 }
 0x2e3   :  { %v1943_v61 = vsel %vm966_vm2, %v1937_v27, %v1927_v37  ;;  %v1946_v6 = vadd.f32 %v1941_v39, %v1906_v17  ;;  %v1947_v19 = vadd.f32 %v1940_v13, %v1907_v63  ;;  %v2173_v63 = vld [vmem:[#allocation2 + $0x20] sm:$0xff] }
 0x2e4   :  { %v1944_v21 = vadd.f32 %v1943_v61, %v1904_v5 }
 0x2e5   :  { %v1935_v9 = vpop.permute.xlu0 %1934 }
 0x2e6   :  { %v1938_v50 = vsel %vm966_vm2, %v1935_v9, %v1937_v27  ;;  %v1939_v24 = vsel %vm966_vm2, %v1933_v4, %v1935_v9 }
 0x2e7   :  { %v1949_v25 = vadd.f32 %v1938_v50, %v1909_v52  ;;  %v1948_v45 = vadd.f32 %v1939_v24, %v1908_v26 }
 0x2e9   :  { %v1953_v8 = vpop.permute.xlu1 %1952 }
 0x2ec   :  { %v1951_v33 = vpop.permute.xlu0 %1950 }
 0x2ed   :  { %v1966_v53 = vsel %vm991_vm3, %v1951_v33, %v1953_v8  ;;  %v1957_v43 = vpop.permute.xlu1 %1956 }
 0x2ee   :  { %v1968_v54 = vadd.f32 %v1966_v53, %v1944_v21 }
 0x2f0   :  { %v1978_v57 = vadd.f32 %v1976_v35, %v1968_v54 }
 0x2f2   :  { %v1955_v55 = vpop.permute.xlu0 %1954  ;;  %v1984_v32 = vadd.f32 %v2168_v36, %v1978_v57  ;;  %v1961_v18 = vpop.permute.xlu1 %1960 }
 0x2f3   :  { %v1965_v15 = vsel %vm991_vm3, %v1953_v8, %v1955_v55  ;;  %v1964_v10 = vsel %vm991_vm3, %v1955_v55, %v1957_v43  ;;  %v1967_v7 = vsel %vm991_vm3, %v1961_v18, %v1951_v33 }
 0x2f4   :  { %v1969_v62 = vadd.f32 %v1965_v15, %v1945_v46  ;;  %1990 = vst [vmem:[#allocation7] sm:$0xff] %v1984_v32  ;;  %v1970_v59 = vadd.f32 %v1964_v10, %v1946_v6  ;;  %v1973_v29 = vadd.f32 %v1967_v7, %v1949_v25 }
 0x2f6   :  { %v1979_v1 = vadd.f32 %v1976_v35, %v1969_v62  ;;  %v1980_v48 = vadd.f32 %v1976_v35, %v1970_v59  ;;  %v1983_v17 = vadd.f32 %v1976_v35, %v1973_v29 }
 0x2f7   :  { %v1959_v0 = vpop.permute.xlu0 %1958 }
 0x2f8   :  { %v1985_v51 = vadd.f32 %v2169_v38, %v1979_v1  ;;  %v1963_v40 = vsel %vm991_vm3, %v1957_v43, %v1959_v0  ;;  %v1986_v60 = vadd.f32 %v2170_v22, %v1980_v48  ;;  %v1962_v34 = vsel %vm991_vm3, %v1959_v0, %v1961_v18 }
 0x2f9   :  { %v1971_v23 = vadd.f32 %v1963_v40, %v1947_v19  ;;  %v1972_v47 = vadd.f32 %v1962_v34, %v1948_v45  ;;  %v1989_v12 = vadd.f32 %v2171_v31, %v1983_v17 }
 0x2fa   :  { %1991 = vst [vmem:[#allocation7 + $0x8] sm:$0xff] %v1985_v51  ;;  %1992 = vst [vmem:[#allocation7 + $0x10] sm:$0xff] %v1986_v60 }
 0x2fb   :  { %v1981_v11 = vadd.f32 %v1976_v35, %v1971_v23  ;;  %v1982_v16 = vadd.f32 %v1976_v35, %v1972_v47  ;;  %1995 = vst [vmem:[#allocation7 + $0x28] sm:$0xff] %v1989_v12 }
 0x2fd   :  { %v1987_v14 = vadd.f32 %v2172_v44, %v1981_v11  ;;  %v1988_v26 = vadd.f32 %v2173_v63, %v1982_v16 }
 0x2ff   :  { %1993 = vst [vmem:[#allocation7 + $0x18] sm:$0xff] %v1987_v14  ;;  %1994 = vst [vmem:[#allocation7 + $0x20] sm:$0xff] %v1988_v26 }
 0x300   :  { %2229 = shalt.err (!%p2226_p6)
}
 0x301   :  { %s2230_s12 = scalar_lea.hbm %s4316_s2, 768 }
 0x302   :  { %p2231_p7 = scmp.ne.s32.totalorder %s4316_s2, %s2230_s12  ;;  %p2234_p8 = scmp.lt.u32.totalorder %s2230_s12, %s4316_s2 }
 0x304   :  { %p2236_p9 = pnand %p2234_p8, %p2231_p7 }
 0x306   :  { %2239 = shalt.err (!%p2236_p9)
}
 0x307   :  { %2005 = dma.vmem_to_hbm [thread:$0]  %s2003_s8, 768, %s4316_s2, [#allocation4]  }
 0x308   :  { %2244 = dma.done.wait [#allocation4], 768  }
 0x309   :  { %2245 = vsyncadd [#allocation4], 4294966528 }
 0x30a   :  { %2009 = vsyncpa [#allocation3], 1 }
 0x30b   :  { %2010 = vsyncpa [#allocation6], 1 }
 0x30c   :  { %2011 = vsyncpa [#allocation4], 1 }

</bundles_post_ra>
